<compile_context>
chip_gen: v5e
topology: v5e:2x2
jax: 0.10.0
libtpu: 0.0.40
codegen_flags: <defaults>
</compile_context>

<pallas_src>
import math

import numpy as np
import jax
import jax.numpy as jnp
from jax.experimental import pallas as pl
from jax.experimental.pallas import tpu as pltpu


LANE = 128


def _ceil_to(x, m):
    return -(-x // m) * m


# ----------------------------------------------------------------------------
# Parameter init (mirrors the PyTorch __init__)
# ----------------------------------------------------------------------------
def _orthogonal(key, rows, cols):
    """Deterministic stand-in for torch.nn.init.orthogonal_ on a flat weight."""
    n, m = (rows, cols) if rows >= cols else (cols, rows)
    a = jax.random.normal(key, (n, m), dtype=jnp.float32)
    q, r = jnp.linalg.qr(a)
    q = q * jnp.sign(jnp.diag(r))[None, :]
    if rows < cols:
        q = q.T
    return q


def init_convgru_params(key, input_size, hidden_size, k):
    cin, ch = input_size, hidden_size
    ks = jax.random.split(key, 6)
    fan_in = (cin + ch) * k * k
    bound = 1.0 / math.sqrt(fan_in)

    def conv_w(kk):
        return _orthogonal(kk, ch, (cin + ch) * k * k).reshape(ch, cin + ch, k, k)

    return dict(
        w_reset=conv_w(ks[0]),
        w_update=conv_w(ks[1]),
        w_out=conv_w(ks[2]),
        w_bottleneck=_orthogonal(ks[3], cin, ch).reshape(cin, ch, 1, 1),
        # PyTorch __init__ zeroes reset & bottleneck biases; update/out biases
        # keep the default U(-1/sqrt(fan_in), 1/sqrt(fan_in)) init.
        b_reset=jnp.zeros((ch,), jnp.float32),
        b_update=jax.random.uniform(ks[4], (ch,), jnp.float32, -bound, bound),
        b_out=jax.random.uniform(ks[5], (ch,), jnp.float32, -bound, bound),
        b_bottleneck=jnp.zeros((cin,), jnp.float32),
    )


# ----------------------------------------------------------------------------
# Host-side weight preparation: banded (Toeplitz-along-width) conv matrices.
# ----------------------------------------------------------------------------
def _band_toeplitz(w_oikk, W, p, lane_pad_in, lane_pad_out):
    """w: (Co, Ci, k, k) -> T: (k, Kin, Lout) banded weights.

    Input-slab column layout (per row of the padded scratch):
      [ interior: wi*Ci+ci for wi in 0..W-1 | lane pad (zeros) |
        left halo (p width positions x Ci)  | right halo (p x Ci) ]
    Output column layout: [ wo*Co+co for wo in 0..W-1 | lane pad (zeros) ].
    """
    Co, Ci, k, _ = w_oikk.shape
    Lc_in = W * Ci + lane_pad_in          # lane-padded interior width
    Kin = Lc_in + 2 * p * Ci              # + halo columns at the end
    Lout = W * Co + lane_pad_out
    T = np.zeros((k, Kin, Lout), np.float32)

    def in_start(wp):                     # true width position -> column start
        if 0 <= wp < W:
            return wp * Ci
        if wp < 0:                        # left halo
            return Lc_in + (wp + p) * Ci
        return Lc_in + p * Ci + (wp - W) * Ci   # right halo

    for dy in range(k):
        for dx in range(k):
            blk = np.asarray(w_oikk[:, :, dy, dx], np.float32).T   # (Ci, Co)
            for wo in range(W):
                wi = wo + dx - p
                s = in_start(wi)
                T[dy, s:s + Ci, wo * Co:(wo + 1) * Co] = blk
    return T


def prepare_weights(params, k, H, W, mxu_dtype=jnp.bfloat16):
    """Build fused banded conv weights + lane-dense slab biases (host-side)."""
    del H  # spatial height does not enter the weight layout
    w_u = np.asarray(params["w_update"], np.float32)
    w_r = np.asarray(params["w_reset"], np.float32)
    w_o = np.asarray(params["w_out"], np.float32)
    Ch = w_u.shape[0]
    Cin = w_u.shape[1] - Ch
    p = k // 2
    WCin, WCh = W * Cin, W * Ch
    Lx = _ceil_to(WCin, LANE)             # lane-dense x / y slab width
    Lh = _ceil_to(WCh, LANE)              # lane-dense h slab width
    pad_x, pad_h = Lx - WCin, Lh - WCh

    def split(w):                         # (Ch, Cin+Ch, k, k) -> x-part, h-part
        return w[:, :Cin], w[:, Cin:]

    wux, wuh = split(w_u)
    wrx, wrh = split(w_r)
    wox, woh = split(w_o)

    # Gate-fused banded weights: output columns are [update | reset | out]
    # bands, each lane-dense (width Lh, multiple of 128).
    tx = np.concatenate([_band_toeplitz(wux, W, p, pad_x, pad_h),
                         _band_toeplitz(wrx, W, p, pad_x, pad_h),
                         _band_toeplitz(wox, W, p, pad_x, pad_h)], axis=-1)
    th = np.concatenate([_band_toeplitz(wuh, W, p, pad_h, pad_h),
                         _band_toeplitz(wrh, W, p, pad_h, pad_h)], axis=-1)
    toh = _band_toeplitz(woh, W, p, pad_h, pad_h)

    # 1x1 bottleneck as a block-diagonal slab matmul, padded to (Lh, Lx).
    wb = np.asarray(params["w_bottleneck"], np.float32)[:, :, 0, 0]   # (Cin, Ch)
    bneck = np.zeros((Lh, Lx), np.float32)
    for w_ in range(W):
        bneck[w_ * Ch:(w_ + 1) * Ch, w_ * Cin:(w_ + 1) * Cin] = wb.T

    bg = np.zeros((1, 3 * Lh), np.float32)
    bg[0, 0 * Lh:0 * Lh + WCh] = np.tile(np.asarray(params["b_update"], np.float32), W)
    bg[0, 1 * Lh:1 * Lh + WCh] = np.tile(np.asarray(params["b_reset"], np.float32), W)
    bg[0, 2 * Lh:2 * Lh + WCh] = np.tile(np.asarray(params["b_out"], np.float32), W)
    bb = np.zeros((1, Lx), np.float32)
    bb[0, :WCin] = np.tile(np.asarray(params["b_bottleneck"], np.float32), W)

    return dict(
        tx=jnp.asarray(tx, mxu_dtype),
        th=jnp.asarray(th, mxu_dtype),
        toh=jnp.asarray(toh, mxu_dtype),
        bneck=jnp.asarray(bneck, mxu_dtype),
        bg=jnp.asarray(bg, jnp.float32),
        bb=jnp.asarray(bb, jnp.float32),
    )


# ----------------------------------------------------------------------------
# Pallas forward (one recurrent step)
# ----------------------------------------------------------------------------
def convgru_forward(x_nchw, h_nchw, prep, target_rows=256):
    """One ConvGRU step.  Returns (y, h_new) in NCHW, matching PyTorch forward."""
    B, Cin, H, W = x_nchw.shape
    Ch = h_nchw.shape[1]
    k = prep["tx"].shape[0]
    p = k // 2
    Hp = H + 2 * p
    WCin, WCh = W * Cin, W * Ch
    Lx = _ceil_to(WCin, LANE)
    Lh = _ceil_to(WCh, LANE)
    Kx = Lx + 2 * p * Cin                  # padded-x slab row width (with halo)
    Kh = Lh + 2 * p * Ch                   # padded-h slab row width (with halo)
    mxu_dtype = prep["tx"].dtype

    # Batch blocking: aim for >= target_rows MXU rows per grid step.
    # (When more than one grid block is used, Bblk*H should be a multiple of 8.)
    Bblk = max(1, min(B, max(1, target_rows // H)))
    nb = -(-B // Bblk)
    B_pad = nb * Bblk
    Mrows = Bblk * Hp                      # padded-scratch rows per block
    M_out = Mrows - 2 * p                  # gate rows (valid + inter-image junk)

    # Glue: NCHW -> lane-dense, lane-padded, batch-padded, row-stacked slabs.
    def to_slab(a, C, L):
        s = jnp.transpose(a, (0, 2, 3, 1)).reshape(B, H, W * C).astype(jnp.float32)
        s = jnp.pad(s, ((0, B_pad - B), (0, 0), (0, L - W * C)))
        return s.reshape(B_pad * H, L)

    x_slab = to_slab(x_nchw, Cin, Lx)
    h_slab = to_slab(h_nchw, Ch, Lh)

    def kernel(x_ref, h_ref, tx_ref, th_ref, toh_ref, bg_ref, bneck_ref, bb_ref,
               y_ref, hn_ref, xp_s, hp_s, rhp_s):
        x_f32 = x_ref[...]                             # (Bblk*H, Lx) f32
        h_f32 = h_ref[...]                             # (Bblk*H, Lh) f32

        # Stage padded slabs in VMEM scratch.  The whole scratch is re-zeroed
        # every grid step with full-lane-width stores (scratch persists per
        # core -> megacore-safe), then each image's interior is written with a
        # lane-aligned full-width store.  Halo columns sit at the END of each
        # row, so interiors start at lane 0.
        xp_s[...] = jnp.zeros(xp_s.shape, xp_s.dtype)
        hp_s[...] = jnp.zeros(hp_s.shape, hp_s.dtype)
        rhp_s[...] = jnp.zeros(rhp_s.shape, rhp_s.dtype)
        for b in range(Bblk):
            r0, m0 = b * H, b * Hp + p
            xp_s[m0:m0 + H, 0:Lx] = x_f32[r0:r0 + H, :]
            hp_s[m0:m0 + H, 0:Lh] = h_f32[r0:r0 + H, :]

        # Fused gate convolutions: k row-tap matmuls per input, with all images
        # of the block stacked along M.  Gate results land in 128-lane-aligned
        # bands [update | reset | out].  Activations cast to the MXU dtype at
        # the dot (bf16 by default); accumulation stays f32.
        gx = jnp.zeros((M_out, 3 * Lh), jnp.float32)
        gh = jnp.zeros((M_out, 2 * Lh), jnp.float32)
        for dy in range(k):
            gx = gx + jnp.dot(xp_s[dy:dy + M_out, :].astype(mxu_dtype), tx_ref[dy],
                              preferred_element_type=jnp.float32)
            gh = gh + jnp.dot(hp_s[dy:dy + M_out, :].astype(mxu_dtype), th_ref[dy],
                              preferred_element_type=jnp.float32)
        gx = gx + bg_ref[...]                          # fused biases

        update = jax.nn.sigmoid(gx[:, 0:Lh] + gh[:, 0:Lh])
        reset = jax.nn.sigmoid(gx[:, Lh:2 * Lh] + gh[:, Lh:2 * Lh])

        # Hidden state aligned to the gate rows (gate row m <-> padded row m+p).
        # Exact f32 (scratch is f32) -> no extra recurrent-state rounding.
        h_a = hp_s[p:p + M_out, 0:Lh]

        # Candidate conv input: reset-masked hidden, padded in scratch.  Inter-
        # image gap rows come out as 0 * garbage = 0, so no cross-image leak.
        rhp_s[p:p + M_out, 0:Lh] = h_a * reset
        go = jnp.zeros((M_out, Lh), jnp.float32)
        for dy in range(k):
            go = go + jnp.dot(rhp_s[dy:dy + M_out, :].astype(mxu_dtype), toh_ref[dy],
                              preferred_element_type=jnp.float32)
        cand = jnp.tanh(gx[:, 2 * Lh:3 * Lh] + go)

        h_new = cand * update + h_a * (1.0 - update)   # f32, (M_out, Lh)

        # 1x1 bottleneck (block-diagonal slab matmul) + bias; lane-dense output.
        y_all = (jnp.dot(h_new.astype(mxu_dtype), bneck_ref[...],
                         preferred_element_type=jnp.float32) + bb_ref[...])

        # Extract each image's valid rows (gate rows b*Hp .. b*Hp+H-1), add the
        # exact-f32 residual, and store with full-lane-width stores.
        for b in range(Bblk):
            r0, m0 = b * H, b * Hp
            hn_ref[r0:r0 + H, :] = h_new[m0:m0 + H, :]
            y_ref[r0:r0 + H, :] = y_all[m0:m0 + H, :] + x_f32[r0:r0 + H, :]

    y_slab, hn_slab = pl.pallas_call(
        kernel,
        out_shape=(jax.ShapeDtypeStruct((B_pad * H, Lx), jnp.float32),
                   jax.ShapeDtypeStruct((B_pad * H, Lh), jnp.float32)),
        grid_spec=pltpu.PrefetchScalarGridSpec(
            num_scalar_prefetch=0,
            grid=(nb,),
            in_specs=[
                pl.BlockSpec((Bblk * H, Lx), lambda b: (b, 0)),       # x slab block
                pl.BlockSpec((Bblk * H, Lh), lambda b: (b, 0)),       # h slab block
                # Grid-invariant weights (constant index maps -> VMEM resident).
                pl.BlockSpec((k, Kx, 3 * Lh), lambda b: (0, 0, 0)),   # tx
                pl.BlockSpec((k, Kh, 2 * Lh), lambda b: (0, 0, 0)),   # th
                pl.BlockSpec((k, Kh, Lh), lambda b: (0, 0, 0)),       # toh
                pl.BlockSpec((1, 3 * Lh), lambda b: (0, 0)),          # gate biases
                pl.BlockSpec((Lh, Lx), lambda b: (0, 0)),             # bottleneck
                pl.BlockSpec((1, Lx), lambda b: (0, 0)),              # bneck bias
            ],
            out_specs=(pl.BlockSpec((Bblk * H, Lx), lambda b: (b, 0)),
                       pl.BlockSpec((Bblk * H, Lh), lambda b: (b, 0))),
            scratch_shapes=[
                pltpu.VMEM((Mrows, Kx), jnp.float32),   # padded x slab
                pltpu.VMEM((Mrows, Kh), jnp.float32),   # padded h slab
                pltpu.VMEM((Mrows, Kh), jnp.float32),   # padded (h * reset) slab
            ]),
        compiler_params=pltpu.CompilerParams(
            dimension_semantics=("parallel",),          # batch blocks -> megacore
            vmem_limit_bytes=32 * 1024 * 1024),         # safe on v5e/v6e/v7x
    )(x_slab, h_slab, prep["tx"], prep["th"], prep["toh"],
      prep["bg"], prep["bneck"], prep["bb"])

    # Glue: slabs -> NCHW (drop batch and lane padding).
    y = y_slab.reshape(B_pad, H, Lx)[:B, :, :WCin].reshape(B, H, W, Cin)
    y = jnp.transpose(y, (0, 3, 1, 2))
    h_new = hn_slab.reshape(B_pad, H, Lh)[:B, :, :WCh].reshape(B, H, W, Ch)
    h_new = jnp.transpose(h_new, (0, 3, 1, 2))
    return y, h_new


# ----------------------------------------------------------------------------
# Pure-JAX (XLA conv) reference mirroring the PyTorch forward, for checking.
# ----------------------------------------------------------------------------
def convgru_reference(x, h, params, k):
    p = k // 2

    def conv2d(inp, w, b, pad):
        out = jax.lax.conv_general_dilated(
            inp, w, window_strides=(1, 1), padding=[(pad, pad), (pad, pad)],
            dimension_numbers=('NCHW', 'OIHW', 'NCHW'))
        return out + b.reshape(1, -1, 1, 1)

    full = jnp.concatenate([x, h], axis=1)
    u = jax.nn.sigmoid(conv2d(full, params["w_update"], params["b_update"], p))
    r = jax.nn.sigmoid(conv2d(full, params["w_reset"], params["b_reset"], p))
    cand = jnp.tanh(conv2d(jnp.concatenate([x, h * r], axis=1),
                           params["w_out"], params["b_out"], p))
    h_new = cand * u + h * (1.0 - u)
    y = conv2d(h_new, params["w_bottleneck"], params["b_bottleneck"], 0) + x
    return y, h_new


if __name__ == "__main__":
    B, Cin, Ch, H, W, K = 2, 4, 8, 16, 16, 3

    key = jax.random.PRNGKey(0)
    kp, kx1, kx2 = jax.random.split(key, 3)
    params = init_convgru_params(kp, Cin, Ch, K)

    x1 = jax.random.normal(kx1, (B, Cin, H, W), dtype=jnp.float32)
    x2 = jax.random.normal(kx2, (B, Cin, H, W), dtype=jnp.float32)
    # PyTorch module initializes hidden_state to zeros on the first call.
    h0 = jnp.zeros((B, Ch, H, W), jnp.float32)

    y1_r, h1_r = convgru_reference(x1, h0, params, K)
    y2_r, h2_r = convgru_reference(x2, h1_r, params, K)

    # --- f32 MXU path: strict check over two recurrent steps -----------------
    prep_f32 = prepare_weights(params, K, H, W, mxu_dtype=jnp.float32)
    y1, h1 = convgru_forward(x1, h0, prep_f32)
    y2, h2 = convgru_forward(x2, h1, prep_f32)
    jax.block_until_ready((y1, h1, y2, h2))
    assert jnp.allclose(y1, y1_r, atol=1e-4, rtol=1e-4), "y step1 mismatch"
    assert jnp.allclose(h1, h1_r, atol=1e-4, rtol=1e-4), "h step1 mismatch"
    assert jnp.allclose(y2, y2_r, atol=1e-4, rtol=1e-4), "y step2 mismatch"
    assert jnp.allclose(h2, h2_r, atol=1e-4, rtol=1e-4), "h step2 mismatch"

    # --- bf16 MXU path (default; native MXU dtype), loose check --------------
    prep_bf16 = prepare_weights(params, K, H, W)          # mxu_dtype=bf16 default
    y1b, h1b = convgru_forward(x1, h0, prep_bf16)
    y2b, h2b = convgru_forward(x2, h1b, prep_bf16)
    jax.block_until_ready((y1b, h1b, y2b, h2b))
    assert jnp.allclose(y2b, y2_r, atol=5e-2, rtol=5e-2), "bf16 y step2 mismatch"
    assert jnp.allclose(h2b, h2_r, atol=5e-2, rtol=5e-2), "bf16 h step2 mismatch"

    print("KERNEL_OK")
</pallas_src>

<mosaic_0001>
module attributes {stable_mosaic.version = 11 : i64} {
  func.func @kernel(%arg0: i32, %arg1: memref<32x128xf32, #tpu.memory_space<vmem>>, %arg2: memref<32x128xf32, #tpu.memory_space<vmem>>, %arg3: memref<3x136x384xf32, #tpu.memory_space<vmem>>, %arg4: memref<3x144x256xf32, #tpu.memory_space<vmem>>, %arg5: memref<3x144x128xf32, #tpu.memory_space<vmem>>, %arg6: memref<1x384xf32, #tpu.memory_space<vmem>>, %arg7: memref<128x128xf32, #tpu.memory_space<vmem>>, %arg8: memref<1x128xf32, #tpu.memory_space<vmem>>, %arg9: memref<32x128xf32, #tpu.memory_space<vmem>>, %arg10: memref<32x128xf32, #tpu.memory_space<vmem>>, %arg11: memref<36x136xf32, #tpu.memory_space<vmem>>, %arg12: memref<36x144xf32, #tpu.memory_space<vmem>>, %arg13: memref<36x144xf32, #tpu.memory_space<vmem>>) attributes {dimension_semantics = [#tpu.dimension_semantics<parallel>], iteration_bounds = array<i64: 1>, scalar_prefetch = 0 : i64, scratch_operands = 3 : i64, tpu.core_type = #tpu.core_type<tc>, window_params = [{transform_indices = @transform_0, window_bounds = array<i64: 32, 128>}, {transform_indices = @transform_1, window_bounds = array<i64: 32, 128>}, {pipeline_mode = #tpu.pipeline_mode<synchronous>, transform_indices = @transform_2, window_bounds = array<i64: 3, 136, 384>}, {pipeline_mode = #tpu.pipeline_mode<synchronous>, transform_indices = @transform_3, window_bounds = array<i64: 3, 144, 256>}, {pipeline_mode = #tpu.pipeline_mode<synchronous>, transform_indices = @transform_4, window_bounds = array<i64: 3, 144, 128>}, {pipeline_mode = #tpu.pipeline_mode<synchronous>, transform_indices = @transform_5, window_bounds = array<i64: 1, 384>}, {pipeline_mode = #tpu.pipeline_mode<synchronous>, transform_indices = @transform_6, window_bounds = array<i64: 128, 128>}, {pipeline_mode = #tpu.pipeline_mode<synchronous>, transform_indices = @transform_7, window_bounds = array<i64: 1, 128>}, {transform_indices = @transform_8, window_bounds = array<i64: 32, 128>}, {transform_indices = @transform_9, window_bounds = array<i64: 32, 128>}]} {
    %c0 = arith.constant 0 : index
    %c0_0 = arith.constant 0 : index
    %0 = vector.load %arg1[%c0, %c0_0] : memref<32x128xf32, #tpu.memory_space<vmem>>, vector<32x128xf32>
    %c0_1 = arith.constant 0 : index
    %c0_2 = arith.constant 0 : index
    %1 = vector.load %arg2[%c0_1, %c0_2] : memref<32x128xf32, #tpu.memory_space<vmem>>, vector<32x128xf32>
    %cst = arith.constant 0.000000e+00 : f32
    %2 = vector.broadcast %cst : f32 to vector<36x136xf32>
    %c0_3 = arith.constant 0 : index
    %c0_4 = arith.constant 0 : index
    %3 = vector.load %arg11[%c0_3, %c0_4] : memref<36x136xf32, #tpu.memory_space<vmem>>, vector<36x136xf32>
    tpu.vector_store %arg11[%c0_3, %c0_4], %2 {strides = array<i32>} : memref<36x136xf32, #tpu.memory_space<vmem>>, vector<36x136xf32>,
    %cst_5 = arith.constant 0.000000e+00 : f32
    %4 = vector.broadcast %cst_5 : f32 to vector<36x144xf32>
    %c0_6 = arith.constant 0 : index
    %c0_7 = arith.constant 0 : index
    %5 = vector.load %arg12[%c0_6, %c0_7] : memref<36x144xf32, #tpu.memory_space<vmem>>, vector<36x144xf32>
    tpu.vector_store %arg12[%c0_6, %c0_7], %4 {strides = array<i32>} : memref<36x144xf32, #tpu.memory_space<vmem>>, vector<36x144xf32>,
    %cst_8 = arith.constant 0.000000e+00 : f32
    %6 = vector.broadcast %cst_8 : f32 to vector<36x144xf32>
    %c0_9 = arith.constant 0 : index
    %c0_10 = arith.constant 0 : index
    %7 = vector.load %arg13[%c0_9, %c0_10] : memref<36x144xf32, #tpu.memory_space<vmem>>, vector<36x144xf32>
    tpu.vector_store %arg13[%c0_9, %c0_10], %6 {strides = array<i32>} : memref<36x144xf32, #tpu.memory_space<vmem>>, vector<36x144xf32>,
    %8 = vector.extract_strided_slice %0 {offsets = [0, 0], sizes = [16, 128], strides = [1, 1]} : vector<32x128xf32> to vector<16x128xf32>
    %c1 = arith.constant 1 : index
    %c0_11 = arith.constant 0 : index
    %9 = vector.load %arg11[%c1, %c0_11] : memref<36x136xf32, #tpu.memory_space<vmem>>, vector<16x128xf32>
    tpu.vector_store %arg11[%c1, %c0_11], %8 {strides = array<i32>} : memref<36x136xf32, #tpu.memory_space<vmem>>, vector<16x128xf32>,
    %10 = vector.extract_strided_slice %1 {offsets = [0, 0], sizes = [16, 128], strides = [1, 1]} : vector<32x128xf32> to vector<16x128xf32>
    %c1_12 = arith.constant 1 : index
    %c0_13 = arith.constant 0 : index
    %11 = vector.load %arg12[%c1_12, %c0_13] : memref<36x144xf32, #tpu.memory_space<vmem>>, vector<16x128xf32>
    tpu.vector_store %arg12[%c1_12, %c0_13], %10 {strides = array<i32>} : memref<36x144xf32, #tpu.memory_space<vmem>>, vector<16x128xf32>,
    %12 = vector.extract_strided_slice %0 {offsets = [16, 0], sizes = [16, 128], strides = [1, 1]} : vector<32x128xf32> to vector<16x128xf32>
    %c19 = arith.constant 19 : index
    %c0_14 = arith.constant 0 : index
    %13 = vector.load %arg11[%c19, %c0_14] : memref<36x136xf32, #tpu.memory_space<vmem>>, vector<16x128xf32>
    tpu.vector_store %arg11[%c19, %c0_14], %12 {strides = array<i32>} : memref<36x136xf32, #tpu.memory_space<vmem>>, vector<16x128xf32>,
    %14 = vector.extract_strided_slice %1 {offsets = [16, 0], sizes = [16, 128], strides = [1, 1]} : vector<32x128xf32> to vector<16x128xf32>
    %c19_15 = arith.constant 19 : index
    %c0_16 = arith.constant 0 : index
    %15 = vector.load %arg12[%c19_15, %c0_16] : memref<36x144xf32, #tpu.memory_space<vmem>>, vector<16x128xf32>
    tpu.vector_store %arg12[%c19_15, %c0_16], %14 {strides = array<i32>} : memref<36x144xf32, #tpu.memory_space<vmem>>, vector<16x128xf32>,
    %cst_17 = arith.constant 0.000000e+00 : f32
    %16 = vector.broadcast %cst_17 : f32 to vector<34x384xf32>
    %cst_18 = arith.constant 0.000000e+00 : f32
    %17 = vector.broadcast %cst_18 : f32 to vector<34x256xf32>
    %c0_19 = arith.constant 0 : index
    %c0_20 = arith.constant 0 : index
    %18 = vector.load %arg11[%c0_19, %c0_20] : memref<36x136xf32, #tpu.memory_space<vmem>>, vector<34x136xf32>
    %c0_21 = arith.constant 0 : index
    %c0_22 = arith.constant 0 : index
    %c0_23 = arith.constant 0 : index
    %19 = vector.load %arg3[%c0_21, %c0_22, %c0_23] : memref<3x136x384xf32, #tpu.memory_space<vmem>>, vector<1x136x384xf32>
    %20 = vector.shape_cast %19 : vector<1x136x384xf32> to vector<136x384xf32>
    %cst_24 = arith.constant dense<0.000000e+00> : vector<34x384xf32>
    %21 = tpu.matmul %18, %20, %cst_24 {dimension_numbers = #tpu.dot_dimension_numbers<[1], [0], [0], [1], [0, 0, 1, 1], [], []>} : vector<34x136xf32>, vector<136x384xf32>, vector<34x384xf32> -> vector<34x384xf32>
    %22 = arith.addf %16, %21 : vector<34x384xf32>
    %c0_25 = arith.constant 0 : index
    %c0_26 = arith.constant 0 : index
    %23 = vector.load %arg12[%c0_25, %c0_26] : memref<36x144xf32, #tpu.memory_space<vmem>>, vector<34x144xf32>
    %c0_27 = arith.constant 0 : index
    %c0_28 = arith.constant 0 : index
    %c0_29 = arith.constant 0 : index
    %24 = vector.load %arg4[%c0_27, %c0_28, %c0_29] : memref<3x144x256xf32, #tpu.memory_space<vmem>>, vector<1x144x256xf32>
    %25 = vector.shape_cast %24 : vector<1x144x256xf32> to vector<144x256xf32>
    %cst_30 = arith.constant dense<0.000000e+00> : vector<34x256xf32>
    %26 = tpu.matmul %23, %25, %cst_30 {dimension_numbers = #tpu.dot_dimension_numbers<[1], [0], [0], [1], [0, 0, 1, 1], [], []>} : vector<34x144xf32>, vector<144x256xf32>, vector<34x256xf32> -> vector<34x256xf32>
    %27 = arith.addf %17, %26 : vector<34x256xf32>
    %c1_31 = arith.constant 1 : index
    %c0_32 = arith.constant 0 : index
    %28 = vector.load %arg11[%c1_31, %c0_32] : memref<36x136xf32, #tpu.memory_space<vmem>>, vector<34x136xf32>
    %c1_33 = arith.constant 1 : index
    %c0_34 = arith.constant 0 : index
    %c0_35 = arith.constant 0 : index
    %29 = vector.load %arg3[%c1_33, %c0_34, %c0_35] : memref<3x136x384xf32, #tpu.memory_space<vmem>>, vector<1x136x384xf32>
    %30 = vector.shape_cast %29 : vector<1x136x384xf32> to vector<136x384xf32>
    %cst_36 = arith.constant dense<0.000000e+00> : vector<34x384xf32>
    %31 = tpu.matmul %28, %30, %cst_36 {dimension_numbers = #tpu.dot_dimension_numbers<[1], [0], [0], [1], [0, 0, 1, 1], [], []>} : vector<34x136xf32>, vector<136x384xf32>, vector<34x384xf32> -> vector<34x384xf32>
    %32 = arith.addf %22, %31 : vector<34x384xf32>
    %c1_37 = arith.constant 1 : index
    %c0_38 = arith.constant 0 : index
    %33 = vector.load %arg12[%c1_37, %c0_38] : memref<36x144xf32, #tpu.memory_space<vmem>>, vector<34x144xf32>
    %c1_39 = arith.constant 1 : index
    %c0_40 = arith.constant 0 : index
    %c0_41 = arith.constant 0 : index
    %34 = vector.load %arg4[%c1_39, %c0_40, %c0_41] : memref<3x144x256xf32, #tpu.memory_space<vmem>>, vector<1x144x256xf32>
    %35 = vector.shape_cast %34 : vector<1x144x256xf32> to vector<144x256xf32>
    %cst_42 = arith.constant dense<0.000000e+00> : vector<34x256xf32>
    %36 = tpu.matmul %33, %35, %cst_42 {dimension_numbers = #tpu.dot_dimension_numbers<[1], [0], [0], [1], [0, 0, 1, 1], [], []>} : vector<34x144xf32>, vector<144x256xf32>, vector<34x256xf32> -> vector<34x256xf32>
    %37 = arith.addf %27, %36 : vector<34x256xf32>
    %c2 = arith.constant 2 : index
    %c0_43 = arith.constant 0 : index
    %38 = vector.load %arg11[%c2, %c0_43] : memref<36x136xf32, #tpu.memory_space<vmem>>, vector<34x136xf32>
    %c2_44 = arith.constant 2 : index
    %c0_45 = arith.constant 0 : index
    %c0_46 = arith.constant 0 : index
    %39 = vector.load %arg3[%c2_44, %c0_45, %c0_46] : memref<3x136x384xf32, #tpu.memory_space<vmem>>, vector<1x136x384xf32>
    %40 = vector.shape_cast %39 : vector<1x136x384xf32> to vector<136x384xf32>
    %cst_47 = arith.constant dense<0.000000e+00> : vector<34x384xf32>
    %41 = tpu.matmul %38, %40, %cst_47 {dimension_numbers = #tpu.dot_dimension_numbers<[1], [0], [0], [1], [0, 0, 1, 1], [], []>} : vector<34x136xf32>, vector<136x384xf32>, vector<34x384xf32> -> vector<34x384xf32>
    %42 = arith.addf %32, %41 : vector<34x384xf32>
    %c2_48 = arith.constant 2 : index
    %c0_49 = arith.constant 0 : index
    %43 = vector.load %arg12[%c2_48, %c0_49] : memref<36x144xf32, #tpu.memory_space<vmem>>, vector<34x144xf32>
    %c2_50 = arith.constant 2 : index
    %c0_51 = arith.constant 0 : index
    %c0_52 = arith.constant 0 : index
    %44 = vector.load %arg4[%c2_50, %c0_51, %c0_52] : memref<3x144x256xf32, #tpu.memory_space<vmem>>, vector<1x144x256xf32>
    %45 = vector.shape_cast %44 : vector<1x144x256xf32> to vector<144x256xf32>
    %cst_53 = arith.constant dense<0.000000e+00> : vector<34x256xf32>
    %46 = tpu.matmul %43, %45, %cst_53 {dimension_numbers = #tpu.dot_dimension_numbers<[1], [0], [0], [1], [0, 0, 1, 1], [], []>} : vector<34x144xf32>, vector<144x256xf32>, vector<34x256xf32> -> vector<34x256xf32>
    %47 = arith.addf %37, %46 : vector<34x256xf32>
    %c0_54 = arith.constant 0 : index
    %c0_55 = arith.constant 0 : index
    %48 = vector.load %arg6[%c0_54, %c0_55] : memref<1x384xf32, #tpu.memory_space<vmem>>, vector<1x384xf32>
    %49 = vector.broadcast %48 : vector<1x384xf32> to vector<34x384xf32>
    %50 = arith.addf %42, %49 : vector<34x384xf32>
    %51 = vector.extract_strided_slice %50 {offsets = [0, 0], sizes = [34, 128], strides = [1, 1]} : vector<34x384xf32> to vector<34x128xf32>
    %52 = vector.extract_strided_slice %47 {offsets = [0, 0], sizes = [34, 128], strides = [1, 1]} : vector<34x256xf32> to vector<34x128xf32>
    %53 = arith.addf %51, %52 : vector<34x128xf32>
    %54 = arith.negf %53 : vector<34x128xf32>
    %55 = math.exp %54 : vector<34x128xf32>
    %cst_56 = arith.constant 1.000000e+00 : f32
    %56 = vector.broadcast %cst_56 : f32 to vector<34x128xf32>
    %57 = arith.addf %56, %55 : vector<34x128xf32>
    %58 = arith.divf %56, %57 : vector<34x128xf32>
    %59 = vector.extract_strided_slice %50 {offsets = [0, 128], sizes = [34, 128], strides = [1, 1]} : vector<34x384xf32> to vector<34x128xf32>
    %60 = vector.extract_strided_slice %47 {offsets = [0, 128], sizes = [34, 128], strides = [1, 1]} : vector<34x256xf32> to vector<34x128xf32>
    %61 = arith.addf %59, %60 : vector<34x128xf32>
    %62 = arith.negf %61 : vector<34x128xf32>
    %63 = math.exp %62 : vector<34x128xf32>
    %cst_57 = arith.constant 1.000000e+00 : f32
    %64 = vector.broadcast %cst_57 : f32 to vector<34x128xf32>
    %65 = arith.addf %64, %63 : vector<34x128xf32>
    %66 = arith.divf %64, %65 : vector<34x128xf32>
    %c1_58 = arith.constant 1 : index
    %c0_59 = arith.constant 0 : index
    %67 = vector.load %arg12[%c1_58, %c0_59] : memref<36x144xf32, #tpu.memory_space<vmem>>, vector<34x128xf32>
    %68 = arith.mulf %67, %66 : vector<34x128xf32>
    %c1_60 = arith.constant 1 : index
    %c0_61 = arith.constant 0 : index
    %69 = vector.load %arg13[%c1_60, %c0_61] : memref<36x144xf32, #tpu.memory_space<vmem>>, vector<34x128xf32>
    tpu.vector_store %arg13[%c1_60, %c0_61], %68 {strides = array<i32>} : memref<36x144xf32, #tpu.memory_space<vmem>>, vector<34x128xf32>,
    %cst_62 = arith.constant 0.000000e+00 : f32
    %70 = vector.broadcast %cst_62 : f32 to vector<34x128xf32>
    %c0_63 = arith.constant 0 : index
    %c0_64 = arith.constant 0 : index
    %71 = vector.load %arg13[%c0_63, %c0_64] : memref<36x144xf32, #tpu.memory_space<vmem>>, vector<34x144xf32>
    %c0_65 = arith.constant 0 : index
    %c0_66 = arith.constant 0 : index
    %c0_67 = arith.constant 0 : index
    %72 = vector.load %arg5[%c0_65, %c0_66, %c0_67] : memref<3x144x128xf32, #tpu.memory_space<vmem>>, vector<1x144x128xf32>
    %73 = vector.shape_cast %72 : vector<1x144x128xf32> to vector<144x128xf32>
    %cst_68 = arith.constant dense<0.000000e+00> : vector<34x128xf32>
    %74 = tpu.matmul %71, %73, %cst_68 {dimension_numbers = #tpu.dot_dimension_numbers<[1], [0], [0], [1], [0, 0, 1, 1], [], []>} : vector<34x144xf32>, vector<144x128xf32>, vector<34x128xf32> -> vector<34x128xf32>
    %75 = arith.addf %70, %74 : vector<34x128xf32>
    %c1_69 = arith.constant 1 : index
    %c0_70 = arith.constant 0 : index
    %76 = vector.load %arg13[%c1_69, %c0_70] : memref<36x144xf32, #tpu.memory_space<vmem>>, vector<34x144xf32>
    %c1_71 = arith.constant 1 : index
    %c0_72 = arith.constant 0 : index
    %c0_73 = arith.constant 0 : index
    %77 = vector.load %arg5[%c1_71, %c0_72, %c0_73] : memref<3x144x128xf32, #tpu.memory_space<vmem>>, vector<1x144x128xf32>
    %78 = vector.shape_cast %77 : vector<1x144x128xf32> to vector<144x128xf32>
    %cst_74 = arith.constant dense<0.000000e+00> : vector<34x128xf32>
    %79 = tpu.matmul %76, %78, %cst_74 {dimension_numbers = #tpu.dot_dimension_numbers<[1], [0], [0], [1], [0, 0, 1, 1], [], []>} : vector<34x144xf32>, vector<144x128xf32>, vector<34x128xf32> -> vector<34x128xf32>
    %80 = arith.addf %75, %79 : vector<34x128xf32>
    %c2_75 = arith.constant 2 : index
    %c0_76 = arith.constant 0 : index
    %81 = vector.load %arg13[%c2_75, %c0_76] : memref<36x144xf32, #tpu.memory_space<vmem>>, vector<34x144xf32>
    %c2_77 = arith.constant 2 : index
    %c0_78 = arith.constant 0 : index
    %c0_79 = arith.constant 0 : index
    %82 = vector.load %arg5[%c2_77, %c0_78, %c0_79] : memref<3x144x128xf32, #tpu.memory_space<vmem>>, vector<1x144x128xf32>
    %83 = vector.shape_cast %82 : vector<1x144x128xf32> to vector<144x128xf32>
    %cst_80 = arith.constant dense<0.000000e+00> : vector<34x128xf32>
    %84 = tpu.matmul %81, %83, %cst_80 {dimension_numbers = #tpu.dot_dimension_numbers<[1], [0], [0], [1], [0, 0, 1, 1], [], []>} : vector<34x144xf32>, vector<144x128xf32>, vector<34x128xf32> -> vector<34x128xf32>
    %85 = arith.addf %80, %84 : vector<34x128xf32>
    %86 = vector.extract_strided_slice %50 {offsets = [0, 256], sizes = [34, 128], strides = [1, 1]} : vector<34x384xf32> to vector<34x128xf32>
    %87 = arith.addf %86, %85 : vector<34x128xf32>
    %88 = math.tanh %87 : vector<34x128xf32>
    %89 = arith.mulf %88, %58 : vector<34x128xf32>
    %cst_81 = arith.constant 1.000000e+00 : f32
    %90 = vector.broadcast %cst_81 : f32 to vector<34x128xf32>
    %91 = arith.subf %90, %58 : vector<34x128xf32>
    %92 = arith.mulf %67, %91 : vector<34x128xf32>
    %93 = arith.addf %89, %92 : vector<34x128xf32>
    %c0_82 = arith.constant 0 : index
    %c0_83 = arith.constant 0 : index
    %94 = vector.load %arg7[%c0_82, %c0_83] : memref<128x128xf32, #tpu.memory_space<vmem>>, vector<128x128xf32>
    %cst_84 = arith.constant dense<0.000000e+00> : vector<34x128xf32>
    %95 = tpu.matmul %93, %94, %cst_84 {dimension_numbers = #tpu.dot_dimension_numbers<[1], [0], [0], [1], [0, 0, 1, 1], [], []>} : vector<34x128xf32>, vector<128x128xf32>, vector<34x128xf32> -> vector<34x128xf32>
    %c0_85 = arith.constant 0 : index
    %c0_86 = arith.constant 0 : index
    %96 = vector.load %arg8[%c0_85, %c0_86] : memref<1x128xf32, #tpu.memory_space<vmem>>, vector<1x128xf32>
    %97 = vector.broadcast %96 : vector<1x128xf32> to vector<34x128xf32>
    %98 = arith.addf %95, %97 : vector<34x128xf32>
    %99 = vector.extract_strided_slice %93 {offsets = [0, 0], sizes = [16, 128], strides = [1, 1]} : vector<34x128xf32> to vector<16x128xf32>
    %c0_87 = arith.constant 0 : index
    %c0_88 = arith.constant 0 : index
    %100 = vector.load %arg10[%c0_87, %c0_88] : memref<32x128xf32, #tpu.memory_space<vmem>>, vector<16x128xf32>
    tpu.vector_store %arg10[%c0_87, %c0_88], %99 {strides = array<i32>} : memref<32x128xf32, #tpu.memory_space<vmem>>, vector<16x128xf32>,
    %101 = vector.extract_strided_slice %98 {offsets = [0, 0], sizes = [16, 128], strides = [1, 1]} : vector<34x128xf32> to vector<16x128xf32>
    %102 = vector.extract_strided_slice %0 {offsets = [0, 0], sizes = [16, 128], strides = [1, 1]} : vector<32x128xf32> to vector<16x128xf32>
    %103 = arith.addf %101, %102 : vector<16x128xf32>
    %c0_89 = arith.constant 0 : index
    %c0_90 = arith.constant 0 : index
    %104 = vector.load %arg9[%c0_89, %c0_90] : memref<32x128xf32, #tpu.memory_space<vmem>>, vector<16x128xf32>
    tpu.vector_store %arg9[%c0_89, %c0_90], %103 {strides = array<i32>} : memref<32x128xf32, #tpu.memory_space<vmem>>, vector<16x128xf32>,
    %105 = vector.extract_strided_slice %93 {offsets = [18, 0], sizes = [16, 128], strides = [1, 1]} : vector<34x128xf32> to vector<16x128xf32>
    %c16 = arith.constant 16 : index
    %c0_91 = arith.constant 0 : index
    %106 = vector.load %arg10[%c16, %c0_91] : memref<32x128xf32, #tpu.memory_space<vmem>>, vector<16x128xf32>
    tpu.vector_store %arg10[%c16, %c0_91], %105 {strides = array<i32>} : memref<32x128xf32, #tpu.memory_space<vmem>>, vector<16x128xf32>,
    %107 = vector.extract_strided_slice %98 {offsets = [18, 0], sizes = [16, 128], strides = [1, 1]} : vector<34x128xf32> to vector<16x128xf32>
    %108 = vector.extract_strided_slice %0 {offsets = [16, 0], sizes = [16, 128], strides = [1, 1]} : vector<32x128xf32> to vector<16x128xf32>
    %109 = arith.addf %107, %108 : vector<16x128xf32>
    %c16_92 = arith.constant 16 : index
    %c0_93 = arith.constant 0 : index
    %110 = vector.load %arg9[%c16_92, %c0_93] : memref<32x128xf32, #tpu.memory_space<vmem>>, vector<16x128xf32>
    tpu.vector_store %arg9[%c16_92, %c0_93], %109 {strides = array<i32>} : memref<32x128xf32, #tpu.memory_space<vmem>>, vector<16x128xf32>,
    return
  }
  func.func @transform_0(%arg0: i32) -> (i32, i32) {
    %c0_i32 = arith.constant 0 : i32
    %c0_i32_0 = arith.constant 0 : i32
    return %arg0, %c0_i32 : i32, i32
  }
  func.func @transform_1(%arg0: i32) -> (i32, i32) {
    %c0_i32 = arith.constant 0 : i32
    %c0_i32_0 = arith.constant 0 : i32
    return %arg0, %c0_i32 : i32, i32
  }
  func.func @transform_2(%arg0: i32) -> (i32, i32, i32) {
    %c0_i32 = arith.constant 0 : i32
    %c0_i32_0 = arith.constant 0 : i32
    %c0_i32_1 = arith.constant 0 : i32
    %c0_i32_2 = arith.constant 0 : i32
    return %c0_i32, %c0_i32_0, %c0_i32_1 : i32, i32, i32
  }
  func.func @transform_3(%arg0: i32) -> (i32, i32, i32) {
    %c0_i32 = arith.constant 0 : i32
    %c0_i32_0 = arith.constant 0 : i32
    %c0_i32_1 = arith.constant 0 : i32
    %c0_i32_2 = arith.constant 0 : i32
    return %c0_i32, %c0_i32_0, %c0_i32_1 : i32, i32, i32
  }
  func.func @transform_4(%arg0: i32) -> (i32, i32, i32) {
    %c0_i32 = arith.constant 0 : i32
    %c0_i32_0 = arith.constant 0 : i32
    %c0_i32_1 = arith.constant 0 : i32
    %c0_i32_2 = arith.constant 0 : i32
    return %c0_i32, %c0_i32_0, %c0_i32_1 : i32, i32, i32
  }
  func.func @transform_5(%arg0: i32) -> (i32, i32) {
    %c0_i32 = arith.constant 0 : i32
    %c0_i32_0 = arith.constant 0 : i32
    %c0_i32_1 = arith.constant 0 : i32
    return %c0_i32, %c0_i32_0 : i32, i32
  }
  func.func @transform_6(%arg0: i32) -> (i32, i32) {
    %c0_i32 = arith.constant 0 : i32
    %c0_i32_0 = arith.constant 0 : i32
    %c0_i32_1 = arith.constant 0 : i32
    return %c0_i32, %c0_i32_0 : i32, i32
  }
  func.func @transform_7(%arg0: i32) -> (i32, i32) {
    %c0_i32 = arith.constant 0 : i32
    %c0_i32_0 = arith.constant 0 : i32
    %c0_i32_1 = arith.constant 0 : i32
    return %c0_i32, %c0_i32_0 : i32, i32
  }
  func.func @transform_8(%arg0: i32) -> (i32, i32) {
    %c0_i32 = arith.constant 0 : i32
    %c0_i32_0 = arith.constant 0 : i32
    return %arg0, %c0_i32 : i32, i32
  }
  func.func @transform_9(%arg0: i32) -> (i32, i32) {
    %c0_i32 = arith.constant 0 : i32
    %c0_i32_0 = arith.constant 0 : i32
    return %arg0, %c0_i32 : i32, i32
  }
}

</mosaic_0001>

<bundles_post_ra>
// kernel: tpu_custom_call.1
= control target key start
LH: loop header
LB: loop body
LE: loop exit
PB: predicated region body
PF: predicated region fallthrough
CT: control target
= control target key end

     0   :  { %15 = vsyncpa [#allocation6], 0  ;;  %s4156_s0 = inlined_call_operand.hbm [shape: f32[32,128], index: 0, kind: input, shape index: {}]   ;;  %s4157_s1 = inlined_call_operand.hbm [shape: f32[32,128], index: 1, kind: input, shape index: {}]   ;;  %s4158_s2 = inlined_call_operand.hbm [shape: f32[3,136,384], index: 2, kind: input, shape index: {}]   ;;  %s4159_s3 = inlined_call_operand.hbm [shape: f32[3,144,256], index: 3, kind: input, shape index: {}]   ;;  %s4160_s4 = inlined_call_operand.hbm [shape: f32[3,144,128], index: 4, kind: input, shape index: {}]   ;;  %s4161_s5 = inlined_call_operand.vmem [shape: f32[1,384], index: 5, kind: input, shape index: {}]   ;;  %s4162_s6 = inlined_call_operand.hbm [shape: f32[128,128], index: 6, kind: input, shape index: {}]   ;;  %s4163_s7 = inlined_call_operand.vmem [shape: f32[1,128], index: 7, kind: input, shape index: {}]   ;;  %s4164_s8 = inlined_call_operand.hbm [shape: f32[32,128], index: 8, kind: output, shape index: {0}]   ;;  %s4165_s9 = inlined_call_operand.hbm [shape: f32[32,128], index: 9, kind: output, shape index: {1}]  }
   0x1   :  { %16 = vsyncpa [#allocation9], 0 }
   0x2   :  { %17 = vsyncpa [#allocation12], 0 }
   0x3   :  { %18 = vsyncpa [#allocation15], 0 }
   0x4   :  { %19 = vsyncpa [#allocation7], 0 }
   0x5   :  { %20 = vsyncpa [#allocation18], 0  ;;  %s38_s11 = sshll.u32 %s4157_s1, 4  ;;  %s2904_s12 = smov [#allocation8]   ;;  %s39_s11 = int_to_ptr.hbm [resolvable:$true] %s38_s11 }
   0x6   :  { %s40_s13 = sshll.u32 %s2904_s12, 4  ;;  %s64_s16 = sshll.u32 %s4159_s3, 4  ;;  %s41_s13 = int_to_ptr.vmem [resolvable:$true] %s40_s13  ;;  %s65_s16 = int_to_ptr.hbm [resolvable:$true] %s64_s16 }
   0x7   :  { %s2905_s17 = smov 128   ;;  %s2906_s18 = smov 8  }
   0x8   :  { %46 = dma.hbm_to_vmem [thread:$0]  %s39_s11, 512, %s41_s13, [#allocation9], %s2905_s17, %s2905_s17, %s2906_s18  }
   0x9   :  { %s2907_s19 = smov [#allocation11]   ;;  %s2908_s21 = smov 256  }
   0xa   :  { %s66_s20 = sshll.u32 %s2907_s19, 4  ;;  %s2909_s1 = smov 16   ;;  %s67_s20 = int_to_ptr.vmem [resolvable:$true] %s66_s20 }
   0xb   :  { %72 = dma.hbm_to_vmem [thread:$0]  %s65_s16, 13824, %s67_s20, [#allocation12], %s2908_s21, %s2908_s21, %s2909_s1  }
   0xc   :  { %s25_s24 = sshll.u32 %s4156_s0, 4  ;;  %s2910_s25 = smov [#allocation5]   ;;  %s26_s24 = int_to_ptr.hbm [resolvable:$true] %s25_s24 }
   0xd   :  { %s27_s3 = sshll.u32 %s2910_s25, 4  ;;  %s51_s28 = sshll.u32 %s4158_s2, 4  ;;  %s28_s3 = int_to_ptr.vmem [resolvable:$true] %s27_s3  ;;  %s52_s28 = int_to_ptr.hbm [resolvable:$true] %s51_s28 }
   0xe   :  { %33 = dma.hbm_to_vmem [thread:$0]  %s26_s24, 512, %s28_s3, [#allocation6], %s2905_s17, %s2905_s17, %s2906_s18  }
   0xf   :  { %s2911_s29 = smov [#allocation10]   ;;  %s2912_s10 = smov 384  }
  0x10   :  { %s53_s30 = sshll.u32 %s2911_s29, 4  ;;  %s2913_s11 = smov 24   ;;  %s54_s30 = int_to_ptr.vmem [resolvable:$true] %s53_s30 }
  0x11   :  { %59 = dma.hbm_to_vmem [thread:$0]  %s52_s28, 19584, %s54_s30, [#allocation9], %s2912_s10, %s2912_s10, %s2913_s11  }
  0x12   :  { %s77_s13 = sshll.u32 %s4160_s4, 4  ;;  %s2914_s14 = smov [#allocation13]   ;;  %s78_s13 = int_to_ptr.hbm [resolvable:$true] %s77_s13 }
  0x13   :  { %s79_s15 = sshll.u32 %s2914_s14, 4  ;;  %s92_s19 = sshll.u32 %s4162_s6, 4  ;;  %s80_s15 = int_to_ptr.vmem [resolvable:$true] %s79_s15  ;;  %s93_s19 = int_to_ptr.hbm [resolvable:$true] %s92_s19 }
  0x14   :  { %85 = dma.hbm_to_vmem [thread:$0]  %s78_s13, 6912, %s80_s15, [#allocation12], %s2905_s17, %s2905_s17, %s2906_s18  }
  0x15   :  { %s2915_s20 = smov [#allocation14]  }
  0x16   :  { %s94_s21 = sshll.u32 %s2915_s20, 4  ;;  %s95_s21 = int_to_ptr.vmem [resolvable:$true] %s94_s21 }
  0x17   :  { %100 = dma.hbm_to_vmem [thread:$0]  %s93_s19, 2048, %s95_s21, [#allocation15], %s2905_s17, %s2905_s17, %s2906_s18  }
  0x18   :  { %2892 = dma.done.wait [#allocation6], 512  }
  0x19   :  { %2893 = vsyncadd [#allocation6], 4294966784 }
  0x1a   :  { %2894 = dma.done.wait [#allocation9], 20096  }
  0x1b   :  { %2895 = vsyncadd [#allocation9], 4294947200 }
  0x1c   :  { %2896 = dma.done.wait [#allocation12], 20736  }
  0x1d   :  { %2897 = vsyncadd [#allocation12], 4294946560 }
  0x1e   :  { %2898 = dma.done.wait [#allocation15], 2048  }
  0x1f   :  { %2899 = vsyncadd [#allocation15], 4294965248  ;;  %vm136_vm0 = vcmask 64512   ;;  %vm145_vm1 = vcmask 60416   ;;  %v2916_v0 = vmov 0.0   ;;  %v372_v1 = vld [vmem:[#allocation10 + $0x300] sm:$0xff] }
  0x20   :  { %146 = vst.msk [vmem:[#allocation2 + $0x48] sm:$0xf] %vm145_vm1, %v2916_v0  ;;  %v373_v2 = vld [vmem:[#allocation10 + $0x308] sm:$0xff]  ;;  %422 = vmatpush.msra.mxu0 %v372_v1  ;;  %v375_v4 = vld [vmem:[#allocation10 + $0x318] sm:$0xff]  ;;  %v370_v5 = vld [vmem:[#allocation10 + $0x2f0] sm:$0xff]  ;;  %vm388_vm2 = vcmask 1046528  }
  0x21   :  { %135 = vst [vmem:[#allocation2] sm:$0xff] %v2916_v0  ;;  %v369_v3 = vld [vmem:[#allocation10 + $0x2e8] sm:$0xff]  ;;  %486 = vmatpush.msra.mxu2 %v373_v2  ;;  %2589 = vmatpush.msra.mxu3 %v375_v4  ;;  %v376_v8 = vld [vmem:[#allocation10 + $0x320] sm:$0xff]  ;;  %v366_v9 = vld [vmem:[#allocation10 + $0x2d0] sm:$0xff]  ;;  %vm171_vm3 = vcmask 1040384   ;;  %vm194_vm4 = vcmask 1042432  }
  0x22   :  { %137 = vst.msk [vmem:[#allocation2 + $0x8] sm:$0xff] %vm136_vm0, %v2916_v0  ;;  %469 = vmatpush.msra.mxu1 %v375_v4  ;;  %423 = vmatpush.msra.mxu0 %v369_v3  ;;  %v367_v11 = vld [vmem:[#allocation10 + $0x2d8] sm:$0xff]  ;;  %v374_v12 = vld [vmem:[#allocation10 + $0x310] sm:$0xff]  ;;  %v364_v18 = vld [vmem:[#allocation10 + $0x2c0] sm:$0xff]  ;;  %vm148_vm5 = vcmask 130048   ;;  %vm157_vm6 = vcmask 125952  }
  0x23   :  { %139 = vst.msk [vmem:[#allocation2 + $0x18] sm:$0xff] %vm136_vm0, %v2916_v0  ;;  %487 = vmatpush.msra.mxu2 %v370_v5  ;;  %v363_v15 = vld [vmem:[#allocation10 + $0x2b8] sm:$0xff]  ;;  %533 = vmatpush.msrb.mxu3 %v376_v8  ;;  %v360_v19 = vld [vmem:[#allocation10 + $0x2a0] sm:$0xff]  ;;  %v361_v22 = vld [vmem:[#allocation10 + $0x2a8] sm:$0xff]  ;;  %vm1230_vm7 = vcmask 1045504   ;;  %s2468_s24 = sshll.u32 %s4165_s9, 4  ;;  %s2469_s24 = int_to_ptr.hbm [resolvable:$true] %s2468_s24 }
  0x24   :  { %140 = vst [vmem:[#allocation2 + $0x20] sm:$0xff] %v2916_v0  ;;  %550 = vmatpush.msrb.mxu1 %v374_v12  ;;  %v371_v16 = vld [vmem:[#allocation10 + $0x2f8] sm:$0xff]  ;;  %424 = vmatpush.msra.mxu0 %v366_v9  ;;  %v368_v20 = vld [vmem:[#allocation10 + $0x2e0] sm:$0xff]  ;;  %v357_v24 = vld [vmem:[#allocation10 + $0x288] sm:$0xff]  ;;  %s2455_s28 = sshll.u32 %s4164_s8, 4  ;;  %s2456_s28 = int_to_ptr.hbm [resolvable:$true] %s2455_s28 }
  0x25   :  { %141 = vst.msk [vmem:[#allocation2 + $0x28] sm:$0xff] %vm136_vm0, %v2916_v0  ;;  %488 = vmatpush.msra.mxu2 %v367_v11  ;;  %v365_v25 = vld [vmem:[#allocation10 + $0x2c8] sm:$0xff]  ;;  %v358_v26 = vld [vmem:[#allocation10 + $0x290] sm:$0xff]  ;;  %v355_v30 = vld [vmem:[#allocation10 + $0x278] sm:$0xff] }
  0x26   :  { %143 = vst.msk [vmem:[#allocation2 + $0x38] sm:$0xff] %vm136_vm0, %v2916_v0  ;;  %551 = vmatpush.msrb.mxu1 %v371_v16  ;;  %425 = vmatpush.msra.mxu0 %v363_v15  ;;  %v354_v28 = vld [vmem:[#allocation10 + $0x270] sm:$0xff]  ;;  %v351_v31 = vld [vmem:[#allocation10 + $0x258] sm:$0xff]  ;;  %v352_v34 = vld [vmem:[#allocation10 + $0x260] sm:$0xff] }
  0x27   :  { %v325_v6 = vld [vmem:[#allocation2 + $0x48] sm:$0x7]  ;;  %144 = vst [vmem:[#allocation2 + $0x40] sm:$0xf] %v2916_v0  ;;  %489 = vmatpush.msra.mxu2 %v364_v18  ;;  %v362_v29 = vld [vmem:[#allocation10 + $0x2b0] sm:$0xff]  ;;  %v348_v35 = vld [vmem:[#allocation10 + $0x240] sm:$0xff] }
  0x28   :  { %v3011_v7 = vrot.slane %v325_v6, 1  ;;  %147 = vst [vmem:[#allocation3] sm:$0xff] %v2916_v0  ;;  %426 = vmatpush.msra.mxu0 %v360_v19  ;;  %552 = vmatpush.msrb.mxu1 %v368_v20  ;;  %v359_v32 = vld [vmem:[#allocation10 + $0x298] sm:$0xff]  ;;  %v356_v36 = vld [vmem:[#allocation10 + $0x280] sm:$0xff]  ;;  %v349_v38 = vld [vmem:[#allocation10 + $0x248] sm:$0xff] }
  0x29   :  { %152 = vst [vmem:[#allocation3 + $0x20] sm:$0xff] %v2916_v0  ;;  %v323_v10 = vld [vmem:[#allocation2 + $0x8] sm:$0xfe]  ;;  %490 = vmatpush.msra.mxu2 %v361_v22  ;;  %v345_v39 = vld [vmem:[#allocation10 + $0x228] sm:$0xff]  ;;  %v346_v41 = vld [vmem:[#allocation10 + $0x230] sm:$0xff] }
  0x2a   :  { %2493 = vmatmul.msk.f32.vlgmr.msra.gmra.mxu3 %vm136_vm0, %v3011_v7  ;;  %156 = vst [vmem:[#allocation3 + $0x40] sm:$0xf] %v2916_v0  ;;  %v3018_v13 = vld [vmem:[#allocation2 + $0x18] sm:$0xff]  ;;  %v392_v14 = vrot.slane %v323_v10, 1  ;;  %427 = vmatpush.msra.mxu0 %v357_v24  ;;  %v127_v43 = vld [vmem:[#allocation5] sm:$0xff]  ;;  %v342_v45 = vld [vmem:[#allocation10 + $0x210] sm:$0xff] }
  0x2b   :  { %159 = vst [vmem:[#allocation4] sm:$0xff] %v2916_v0  ;;  %v393_v17 = vrot.slane %v3018_v13, 1  ;;  %2590 = vmatpush.msra.mxu3 %v374_v12  ;;  %553 = vmatpush.msrb.mxu1 %v365_v25  ;;  %v3040_v40 = vld [vmem:[#allocation10 + $0x268] sm:$0xff]  ;;  %v172_v46 = vrot.slane %v127_v43, 7  ;;  %v343_v48 = vld [vmem:[#allocation10 + $0x218] sm:$0xff]  ;;  %v3044_v49 = vld [vmem:[#allocation10 + $0x250] sm:$0xff] }
  0x2c   :  { %167 = vst [vmem:[#allocation4 + $0x40] sm:$0xf] %v2916_v0  ;;  %v3026_v23 = vld [vmem:[#allocation2 + $0x28] sm:$0xff]  ;;  %491 = vmatpush.msra.mxu2 %v358_v26  ;;  %428 = vmatpush.msra.mxu0 %v354_v28  ;;  %v128_v44 = vld [vmem:[#allocation5 + $0x8] sm:$0xff]  ;;  %v129_v50 = vld [vmem:[#allocation5 + $0x10] sm:$0xff] }
  0x2d   :  { %v3024_v21 = vsel %vm388_vm2, %v392_v14, %v393_v17  ;;  %v397_v27 = vrot.slane %v3026_v23, 1  ;;  %2591 = vmatpush.msra.mxu3 %v371_v16  ;;  %554 = vmatpush.msrb.mxu1 %v362_v29  ;;  %v3036_v37 = vld [vmem:[#allocation2 + $0x38] sm:$0xff]  ;;  %v173_v47 = vrot.slane %v128_v44, 7  ;;  %v339_v51 = vld [vmem:[#allocation10 + $0x1f8] sm:$0xff]  ;;  %178 = vst [vmem:[#allocation2] sm:$0xfe] %v172_v46 }
  0x2e   :  { %2489 = vmatmul.msk.f32.vlgmr.msra.gmra.mxu1 %vm136_vm0, %v3024_v21  ;;  %492 = vmatpush.msra.mxu2 %v355_v30  ;;  %v401_v42 = vrot.slane %v3036_v37, 1  ;;  %v195_v53 = vrot.slane %v129_v50, 5  ;;  %v340_v55 = vld [vmem:[#allocation10 + $0x200] sm:$0xff]  ;;  %v347_v56 = vld [vmem:[#allocation10 + $0x238] sm:$0xff]  ;;  %v337_v59 = vld [vmem:[#allocation10 + $0x1e8] sm:$0xff]  ;;  %149 = vst.msk [vmem:[#allocation3 + $0x8] sm:$0xff] %vm148_vm5, %v2916_v0 }
  0x2f   :  { %v3034_v33 = vsel %vm388_vm2, %v393_v17, %v397_v27  ;;  %2592 = vmatpush.msra.mxu3 %v368_v20  ;;  %429 = vmatpush.msra.mxu0 %v351_v31  ;;  %v3049_v52 = vsel %vm171_vm3, %v172_v46, %v173_v47  ;;  %v336_v57 = vld [vmem:[#allocation10 + $0x1e0] sm:$0xff]  ;;  %180 = vst [vmem:[#allocation2 + $0x20] sm:$0x1] %v173_v47  ;;  %v130_v58 = vld [vmem:[#allocation5 + $0x18] sm:$0xff]  ;;  %v333_v62 = vld [vmem:[#allocation10 + $0x1c8] sm:$0xff] }
  0x30   :  { %555 = vmatpush.msrb.mxu1 %v359_v32  ;;  %493 = vmatpush.msra.mxu2 %v352_v34  ;;  %v3054_v54 = vsel %vm388_vm2, %v397_v27, %v401_v42  ;;  %179 = vst [vmem:[#allocation2 + $0x10] sm:$0xff] %v3049_v52  ;;  %v196_v60 = vrot.slane %v130_v58, 5  ;;  %v344_v61 = vld [vmem:[#allocation10 + $0x220] sm:$0xff]  ;;  %v334_v63 = vld [vmem:[#allocation10 + $0x1d0] sm:$0xff]  ;;  %v341_v2 = vld [vmem:[#allocation10 + $0x208] sm:$0xff]  ;;  %v390_v4 = vrot.slane %v3049_v52, 1  ;;  %v3071_v11 = vsel %vm388_vm2, %v401_v42, %v3011_v7 }
  0x31   :  { %430 = vmatpush.msra.mxu0 %v348_v35  ;;  %2593 = vmatpush.msra.mxu3 %v365_v25  ;;  %201 = vst [vmem:[#allocation2 + $0x20] sm:$0xf8] %v195_v53  ;;  %v330_v3 = vld [vmem:[#allocation10 + $0x1b0] sm:$0xff]  ;;  %v331_v5 = vld [vmem:[#allocation10 + $0x1b8] sm:$0xff]  ;;  %v328_v12 = vld [vmem:[#allocation10 + $0x1a0] sm:$0xff] }
  0x32   :  { %2494 = vmatmul.msk.f32.vlgmr.msrb.gmra.mxu3 %vm136_vm0, %v3024_v21  ;;  %556 = vmatpush.msrb.mxu1 %v356_v36  ;;  %v3061_v1 = vsel %vm194_vm4, %v195_v53, %v196_v60  ;;  %203 = vst [vmem:[#allocation2 + $0x40] sm:$0x7] %v196_v60  ;;  %v338_v8 = vld [vmem:[#allocation10 + $0x1f0] sm:$0xff]  ;;  %v327_v9 = vld [vmem:[#allocation10 + $0x198] sm:$0xff]  ;;  %v3079_v17 = vld [vmem:[#allocation10 + $0x168] sm:$0xff] }
  0x33   :  { %494 = vmatpush.msra.mxu2 %v349_v38  ;;  %431 = vmatpush.msra.mxu0 %v345_v39  ;;  %202 = vst [vmem:[#allocation2 + $0x30] sm:$0xff] %v3061_v1  ;;  %v335_v15 = vld [vmem:[#allocation10 + $0x1d8] sm:$0xff]  ;;  %v332_v18 = vld [vmem:[#allocation10 + $0x1c0] sm:$0xff]  ;;  %v3083_v20 = vld [vmem:[#allocation10 + $0x150] sm:$0xff]  ;;  %v399_v31 = vrot.slane %v3061_v1, 1 }
  0x34   :  { %557 = vmatpush.msrb.mxu1 %v3040_v40  ;;  %2594 = vmatpush.msra.mxu3 %v362_v29  ;;  %v322_v6 = vld [vmem:[#allocation2] sm:$0xfe]  ;;  %v329_v22 = vld [vmem:[#allocation10 + $0x1a8] sm:$0xff]  ;;  %v3086_v25 = vld [vmem:[#allocation10 + $0x138] sm:$0xff]  ;;  %151 = vst.msk [vmem:[#allocation3 + $0x18] sm:$0xff] %vm148_vm5, %v2916_v0 }
  0x35   :  { %495 = vmatpush.msra.mxu2 %v346_v41  ;;  %432 = vmatpush.msra.mxu0 %v342_v45  ;;  %v389_v10 = vrot.slane %v322_v6, 1  ;;  %v271_v24 = vld [vmem:[#allocation10 + $0x170] sm:$0xff]  ;;  %v268_v27 = vld [vmem:[#allocation10 + $0x158] sm:$0xff]  ;;  %v3093_v28 = vld [vmem:[#allocation10 + $0x120] sm:$0xff]  ;;  %153 = vst.msk [vmem:[#allocation3 + $0x28] sm:$0xff] %vm148_vm5, %v2916_v0 }
  0x36   :  { %2490 = vmatmul.msk.f32.gmra.mxu1 %vm136_vm0, %v3034_v33  ;;  %2595 = vmatpush.msra.mxu3 %v359_v32  ;;  %v273_v29 = vld [vmem:[#allocation10 + $0x180] sm:$0xff]  ;;  %v3096_v32 = vld [vmem:[#allocation10 + $0x108] sm:$0xff]  ;;  %v3099_v35 = vld [vmem:[#allocation10 + $0xf0] sm:$0xff]  ;;  %155 = vst.msk [vmem:[#allocation3 + $0x38] sm:$0xff] %vm148_vm5, %v2916_v0 }
  0x37   :  { %496 = vmatpush.msra.mxu2 %v343_v48  ;;  %558 = vmatpush.msrb.mxu1 %v3044_v49  ;;  %v391_v14 = vsel %vm388_vm2, %v389_v10, %v390_v4  ;;  %v265_v30 = vld [vmem:[#allocation10 + $0x140] sm:$0xff]  ;;  %v262_v34 = vld [vmem:[#allocation10 + $0x128] sm:$0xff]  ;;  %v256_v41 = vld [vmem:[#allocation10 + $0xf8] sm:$0xff]  ;;  %160 = vst.msk [vmem:[#allocation4 + $0x8] sm:$0xff] %vm148_vm5, %v2916_v0 }
  0x38   :  { %433 = vmatpush.msra.mxu0 %v339_v51  ;;  %2596 = vmatpush.msra.mxu3 %v356_v36  ;;  %v3075_v16 = vld [vmem:[#allocation2 + $0x20] sm:$0xff]  ;;  %v3106_v42 = vld [vmem:[#allocation10 + $0xd8] sm:$0xff]  ;;  %v253_v44 = vld [vmem:[#allocation10 + $0xe0] sm:$0xff]  ;;  %162 = vst.msk [vmem:[#allocation4 + $0x18] sm:$0xff] %vm148_vm5, %v2916_v0 }
  0x39   :  { %497 = vmatpush.msra.mxu2 %v340_v55  ;;  %559 = vmatpush.msrb.mxu1 %v347_v56  ;;  %v395_v19 = vrot.slane %v3075_v16, 1  ;;  %v259_v36 = vld [vmem:[#allocation10 + $0x110] sm:$0xff]  ;;  %v3109_v45 = vld [vmem:[#allocation10 + $0xc0] sm:$0xff]  ;;  %v250_v46 = vld [vmem:[#allocation10 + $0xc8] sm:$0xff]  ;;  %164 = vst.msk [vmem:[#allocation4 + $0x28] sm:$0xff] %vm148_vm5, %v2916_v0 }
  0x3a   :  { %2495 = vmatmul.msk.f32.gmra.mxu3 %vm136_vm0, %v3034_v33  ;;  %434 = vmatpush.msra.mxu0 %v336_v57  ;;  %v324_v39 = vld [vmem:[#allocation2 + $0x40] sm:$0x7]  ;;  %v3111_v47 = vld [vmem:[#allocation10 + $0xa8] sm:$0xff]  ;;  %v244_v51 = vld [vmem:[#allocation10 + $0x98] sm:$0xff]  ;;  %166 = vst.msk [vmem:[#allocation4 + $0x38] sm:$0xff] %vm148_vm5, %v2916_v0 }
  0x3b   :  { %498 = vmatpush.msra.mxu2 %v337_v59  ;;  %560 = vmatpush.msrb.mxu1 %v344_v61  ;;  %v396_v26 = vsel %vm388_vm2, %v390_v4, %v395_v19  ;;  %v400_v38 = vsel %vm388_vm2, %v395_v19, %v399_v31  ;;  %v403_v43 = vrot.slane %v324_v39, 1  ;;  %v247_v48 = vld [vmem:[#allocation10 + $0xb0] sm:$0xff]  ;;  %v3119_v53 = vld [vmem:[#allocation10 + $0x78] sm:$0xff]  ;;  %v241_v55 = vld [vmem:[#allocation10 + $0x80] sm:$0xff]  ;;  %158 = vst.msk [vmem:[#allocation3 + $0x48] sm:$0xf] %vm157_vm6, %v2916_v0 }
  0x3c   :  { %435 = vmatpush.msra.mxu0 %v333_v62  ;;  %2597 = vmatpush.msra.mxu3 %v3040_v40  ;;  %v377_v40 = vld [vmem:[#allocation10 + $0x328] sm:$0xff]  ;;  %v3116_v50 = vld [vmem:[#allocation10 + $0x90] sm:$0xff]  ;;  %v3135_v62 = vld [vmem:[#allocation10 + $0x18] sm:$0xff]  ;;  %168 = vst.msk [vmem:[#allocation4 + $0x48] sm:$0xf] %vm157_vm6, %v2916_v0 }
  0x3d   :  { %499 = vmatpush.msra.mxu2 %v334_v63  ;;  %561 = vmatpush.msrb.mxu1 %v341_v2  ;;  %v238_v57 = vld [vmem:[#allocation10 + $0x68] sm:$0xff]  ;;  %v235_v59 = vld [vmem:[#allocation10 + $0x50] sm:$0xff]  ;;  %v3139_v63 = vld [vmem:[#allocation10] sm:$0xff] }
  0x3e   :  { %2491 = vmatmul.msk.f32.gmra.mxu1 %vm136_vm0, %v3054_v54  ;;  %436 = vmatpush.msra.mxu0 %v330_v3  ;;  %v3128_v58 = vld [vmem:[#allocation10 + $0x48] sm:$0xff]  ;;  %v3132_v60 = vld [vmem:[#allocation10 + $0x30] sm:$0xff]  ;;  %v272_v3 = vld [vmem:[#allocation10 + $0x178] sm:$0xff] }
  0x3f   :  { %500 = vmatpush.msra.mxu2 %v331_v5  ;;  %562 = vmatpush.msrb.mxu1 %v338_v8  ;;  %v3144_v4 = vld [vmem:[#allocation2] sm:$0xff]  ;;  %v853_v5 = vld [vmem:[#allocation11 + $0x210] sm:$0xff]  ;;  %v266_v10 = vld [vmem:[#allocation10 + $0x148] sm:$0xff] }
  0x40   :  { %437 = vmatpush.msra.mxu0 %v327_v9  ;;  %2598 = vmatpush.msra.mxu3 %v3044_v49  ;;  %v404_v49 = vsel %vm388_vm2, %v399_v31, %v403_v43  ;;  %v3148_v6 = vld [vmem:[#allocation2 + $0x8] sm:$0xff]  ;;  %v851_v9 = vld [vmem:[#allocation11 + $0x200] sm:$0xff]  ;;  %v251_v31 = vld [vmem:[#allocation10 + $0xd0] sm:$0xff] }
  0x41   :  { %501 = vmatpush.msra.mxu2 %v328_v12  ;;  %438 = vmatmul.f32.vlgmr.msra.gmra.mxu0 %v391_v14  ;;  %v260_v19 = vld [vmem:[#allocation10 + $0x118] sm:$0xff]  ;;  %v239_v39 = vld [vmem:[#allocation10 + $0x70] sm:$0xff] }
  0x42   :  { %2496 = vmatmul.msk.f32.gmra.mxu3 %vm136_vm0, %v3054_v54  ;;  %502 = vmatmul.f32.vlgmr.msra.gmra.mxu2 %v391_v14  ;;  %v315_v0 = vld [vmem:[#allocation11 + $0xe8] sm:$0xff] }
  0x43   :  { %563 = vmatpush.msrb.mxu1 %v335_v15  ;;  %626 = vmatpush.msrb.mxu0 %v3079_v17 }
  0x44   :  { %2599 = vmatpush.msra.mxu3 %v347_v56  ;;  %673 = vmatpush.msrb.mxu2 %v273_v29  ;;  %v3123_v56 = vld [vmem:[#allocation10 + $0x60] sm:$0xff] }
  0x45   :  { %564 = vmatpush.msrb.mxu1 %v332_v18  ;;  %627 = vmatpush.msrb.mxu0 %v3083_v20 }
  0x46   :  { %2492 = vmatmul.msk.f32.gmra.mxu1 %vm136_vm0, %v3071_v11  ;;  %2600 = vmatpush.msra.mxu3 %v344_v61  ;;  %v232_v61 = vld [vmem:[#allocation10 + $0x38] sm:$0xff] }
  0x47   :  { %565 = vmatpush.msrb.mxu1 %v329_v22  ;;  %628 = vmatpush.msrb.mxu0 %v3086_v25 }
  0x48   :  { %2601 = vmatpush.msra.mxu3 %v341_v2  ;;  %v226_v2 = vld [vmem:[#allocation10 + $0x8] sm:$0xff] }
  0x49   :  { %690 = vmatpush.msra.mxu1 %v271_v24  ;;  %441 = vmatmul.f32.gmra.mxu0 %v396_v26  ;;  %v257_v24 = vld [vmem:[#allocation10 + $0x100] sm:$0xff] }
  0x4a   :  { %2497 = vmatmul.msk.f32.gmra.mxu3 %vm136_vm0, %v3071_v11  ;;  %505 = vmatmul.f32.gmra.mxu2 %v396_v26 }
  0x4b   :  { %691 = vmatpush.msra.mxu1 %v268_v27  ;;  %2602 = vmatpush.msra.mxu3 %v338_v8  ;;  %v269_v8 = vld [vmem:[#allocation10 + $0x160] sm:$0xff] }
  0x4c   :  { %629 = vmatpush.msrb.mxu0 %v3093_v28 }
  0x4d   :  { %692 = vmatpush.msra.mxu1 %v265_v30  ;;  %2603 = vmatpush.msra.mxu3 %v335_v15  ;;  %v263_v15 = vld [vmem:[#allocation10 + $0x130] sm:$0xff]  ;;  %v841_v30 = vld [vmem:[#allocation11 + $0x1b0] sm:$0xff] }
  0x4e   :  { %566 = vmatmul.f32.vlgmr.msrb.gmra.mxu1 %v391_v14  ;;  %630 = vmatpush.msrb.mxu0 %v3096_v32  ;;  %v849_v14 = vld [vmem:[#allocation11 + $0x1f0] sm:$0xff] }
  0x4f   :  { %693 = vmatpush.msra.mxu1 %v262_v34  ;;  %2604 = vmatpush.msra.mxu3 %v332_v18  ;;  %v847_v18 = vld [vmem:[#allocation11 + $0x1e0] sm:$0xff] }
  0x50   :  { %631 = vmatpush.msrb.mxu0 %v3099_v35  ;;  %v839_v34 = vld [vmem:[#allocation11 + $0x1a0] sm:$0xff] }
  0x51   :  { %2605 = vmatpush.msra.mxu3 %v329_v22  ;;  %694 = vmatpush.msra.mxu1 %v259_v36  ;;  %v132_v22 = vld [vmem:[#allocation8 + $0x8] sm:$0xff] }
  0x52   :  { %2498 = vmatmul.msk.f32.gmra.mxu3 %vm136_vm0, %v3011_v7  ;;  %444 = vmatmul.f32.gmra.mxu0 %v400_v38  ;;  %v242_v36 = vld [vmem:[#allocation10 + $0x88] sm:$0xff] }
  0x53   :  { %508 = vmatmul.f32.gmra.mxu2 %v400_v38  ;;  %597 = vmatpush.msrb.mxu3 %v377_v40  ;;  %v236_v40 = vld [vmem:[#allocation10 + $0x58] sm:$0xff] }
  0x54   :  { %695 = vmatpush.msra.mxu1 %v256_v41  ;;  %632 = vmatpush.msrb.mxu0 %v3106_v42  ;;  %v274_v41 = vld [vmem:[#allocation10 + $0x188] sm:$0xff] }
  0x56   :  { %569 = vmatmul.f32.gmra.mxu1 %v396_v26  ;;  %633 = vmatpush.msrb.mxu0 %v3109_v45  ;;  %v843_v26 = vld [vmem:[#allocation11 + $0x1c0] sm:$0xff] }
  0x57   :  { %696 = vmatpush.msra.mxu1 %v253_v44  ;;  %v233_v44 = vld [vmem:[#allocation10 + $0x40] sm:$0xff] }
  0x58   :  { %634 = vmatpush.msrb.mxu0 %v3111_v47 }
  0x59   :  { %697 = vmatpush.msra.mxu1 %v250_v46  ;;  %v831_v46 = vld [vmem:[#allocation11 + $0x160] sm:$0xff] }
  0x5a   :  { %578 = vmatmul.f32.vlgmr.msra.gmra.mxu3 %v403_v43  ;;  %447 = vmatmul.f32.gmra.mxu0 %v404_v49 }
  0x5b   :  { %2606 = vmatpush.msra.mxu3 %v3079_v17  ;;  %698 = vmatpush.msra.mxu1 %v247_v48  ;;  %v275_v17 = vld [vmem:[#allocation10 + $0x190] sm:$0xff]  ;;  %v857_v48 = vld [vmem:[#allocation11 + $0x230] sm:$0xff] }
  0x5c   :  { %511 = vmatmul.f32.gmra.mxu2 %v404_v49  ;;  %635 = vmatpush.msrb.mxu0 %v3116_v50 }
  0x5d   :  { %699 = vmatpush.msra.mxu1 %v244_v51  ;;  %2607 = vmatpush.msra.mxu3 %v3083_v20  ;;  %v845_v20 = vld [vmem:[#allocation11 + $0x1d0] sm:$0xff]  ;;  %v227_v51 = vld [vmem:[#allocation10 + $0x10] sm:$0xff] }
  0x5e   :  { %572 = vmatmul.f32.gmra.mxu1 %v400_v38  ;;  %636 = vmatpush.msrb.mxu0 %v3119_v53  ;;  %v835_v38 = vld [vmem:[#allocation11 + $0x180] sm:$0xff] }
  0x5f   :  { %700 = vmatpush.msra.mxu1 %v241_v55  ;;  %2608 = vmatpush.msra.mxu3 %v3086_v25  ;;  %v133_v25 = vld [vmem:[#allocation8 + $0x10] sm:$0xff] }
  0x60   :  { %637 = vmatpush.msrb.mxu0 %v3123_v56  ;;  %801 = vmatpush.msra.mxu2 %v275_v17  ;;  %v206_v27 = vrot.slane %v133_v25, 5 }
  0x61   :  { %701 = vmatpush.msra.mxu1 %v238_v57  ;;  %2609 = vmatpush.msra.mxu3 %v3093_v28  ;;  %v254_v28 = vld [vmem:[#allocation10 + $0xe8] sm:$0xff]  ;;  %v854_v57 = vld [vmem:[#allocation11 + $0x218] sm:$0xff] }
  0x62   :  { %2499 = vmatmul.msk.f32.vlgmr.msrb.gmra.mxu3 %vm136_vm0, %v3024_v21  ;;  %638 = vmatpush.msrb.mxu0 %v3128_v58  ;;  %v229_v21 = vld [vmem:[#allocation10 + $0x20] sm:$0xff]  ;;  %212 = vst [vmem:[#allocation3 + $0x20] sm:$0xf8] %v206_v27 }
  0x63   :  { %702 = vmatpush.msra.mxu1 %v235_v59  ;;  %450 = vmatmul.f32.gmra.mxu0 %v403_v43  ;;  %v855_v59 = vld [vmem:[#allocation11 + $0x220] sm:$0xff] }
  0x64   :  { %514 = vmatmul.f32.gmra.mxu2 %v403_v43  ;;  %639 = vmatpush.msrb.mxu0 %v3132_v60  ;;  %v134_v43 = vld [vmem:[#allocation8 + $0x18] sm:$0xff] }
  0x65   :  { %703 = vmatpush.msra.mxu1 %v232_v61  ;;  %2610 = vmatpush.msra.mxu3 %v3096_v32  ;;  %v248_v32 = vld [vmem:[#allocation10 + $0xb8] sm:$0xff] }
  0x66   :  { %575 = vmatmul.f32.gmra.mxu1 %v404_v49  ;;  %640 = vmatpush.msrb.mxu0 %v3135_v62 }
  0x67   :  { %704 = vmatpush.msra.mxu1 %v229_v21  ;;  %2611 = vmatpush.msra.mxu3 %v3099_v35  ;;  %v245_v35 = vld [vmem:[#allocation10 + $0xa0] sm:$0xff]  ;;  %v823_v21 = vld [vmem:[#allocation11 + $0x120] sm:$0xff] }
  0x68   :  { %641 = vmatpush.msrb.mxu0 %v3139_v63 }
  0x69   :  { %705 = vmatpush.msra.mxu1 %v226_v2  ;;  %2612 = vmatpush.msra.mxu3 %v3106_v42  ;;  %v833_v42 = vld [vmem:[#allocation11 + $0x170] sm:$0xff]  ;;  %v850_v2 = vld [vmem:[#allocation11 + $0x1f8] sm:$0xff] }
  0x6a   :  { %2500 = vmatmul.msk.f32.gmra.mxu3 %vm136_vm0, %v3034_v33  ;;  %754 = vmatpush.msra.mxu0 %v272_v3  ;;  %v131_v33 = vld [vmem:[#allocation8] sm:$0xff] }
  0x6b   :  { %642 = vmatmul.f32.vlgmr.msrb.gmra.mxu0 %v3144_v4  ;;  %902 = vmatpush.msrb.mxu1 %v853_v5  ;;  %v183_v12 = vrot.slane %v131_v33, 7  ;;  %v312_v33 = vld [vmem:[#allocation11 + $0xd0] sm:$0xff] }
  0x6c   :  { %2504 = vmatmul.msk.f32.vlgmr.msrb.gmra.mxu2 %vm136_vm0, %v3148_v6  ;;  %755 = vmatpush.msra.mxu0 %v269_v8  ;;  %v314_v8 = vld [vmem:[#allocation11 + $0xe0] sm:$0xff] }
  0x6d   :  { %903 = vmatpush.msrb.mxu1 %v851_v9  ;;  %2613 = vmatpush.msra.mxu3 %v3109_v45  ;;  %189 = vst [vmem:[#allocation3] sm:$0xfe] %v183_v12  ;;  %v207_v45 = vrot.slane %v134_v43, 5  ;;  %v846_v9 = vld [vmem:[#allocation11 + $0x1d8] sm:$0xff] }
  0x6e   :  { %706 = vmatmul.f32.vlgmr.msra.gmra.mxu1 %v3144_v4  ;;  %756 = vmatpush.msra.mxu0 %v266_v10 }
  0x6f   :  { %2614 = vmatpush.msra.mxu3 %v3111_v47  ;;  %904 = vmatpush.msrb.mxu1 %v849_v14  ;;  %v230_v47 = vld [vmem:[#allocation10 + $0x28] sm:$0xff]  ;;  %v3190_v49 = vsel %vm194_vm4, %v206_v27, %v207_v45  ;;  %214 = vst [vmem:[#allocation3 + $0x40] sm:$0x7] %v207_v45  ;;  %v317_v45 = vld [vmem:[#allocation11 + $0xf8] sm:$0xff] }
  0x70   :  { %757 = vmatpush.msra.mxu0 %v263_v15  ;;  %213 = vst [vmem:[#allocation3 + $0x30] sm:$0xff] %v3190_v49  ;;  %v310_v14 = vld [vmem:[#allocation11 + $0xc0] sm:$0xff]  ;;  %v842_v15 = vld [vmem:[#allocation11 + $0x1b8] sm:$0xff]  ;;  %v879_v25 = vrot.slane %v3190_v49, 1 }
  0x71   :  { %2615 = vmatpush.msra.mxu3 %v3116_v50  ;;  %905 = vmatpush.msrb.mxu1 %v847_v18  ;;  %v829_v50 = vld [vmem:[#allocation11 + $0x150] sm:$0xff]  ;;  %v302_v27 = vld [vmem:[#allocation11 + $0x80] sm:$0xff] }
  0x72   :  { %2501 = vmatmul.msk.f32.gmra.mxu3 %vm136_vm0, %v3054_v54  ;;  %v184_v54 = vrot.slane %v132_v22, 7  ;;  %758 = vmatpush.msra.mxu0 %v260_v19  ;;  %v320_v18 = vld [vmem:[#allocation11 + $0x110] sm:$0xff]  ;;  %v306_v19 = vld [vmem:[#allocation11 + $0xa0] sm:$0xff]  ;;  %v838_v22 = vld [vmem:[#allocation11 + $0x198] sm:$0xff] }
  0x73   :  { %645 = vmatmul.f32.gmra.mxu0 %v3049_v52  ;;  %2616 = vmatpush.msra.mxu3 %v3119_v53  ;;  %v827_v53 = vld [vmem:[#allocation11 + $0x140] sm:$0xff] }
  0x74   :  { %2505 = vmatmul.msk.f32.gmra.mxu2 %vm136_vm0, %v3018_v13  ;;  %906 = vmatpush.msrb.mxu1 %v845_v20  ;;  %v3167_v29 = vsel %vm171_vm3, %v183_v12, %v184_v54  ;;  %191 = vst [vmem:[#allocation3 + $0x20] sm:$0x1] %v184_v54  ;;  %v818_v55 = vld [vmem:[#allocation3] sm:$0xfe]  ;;  %v844_v12 = vld [vmem:[#allocation11 + $0x1c8] sm:$0xff] }
  0x75   :  { %759 = vmatpush.msra.mxu0 %v257_v24  ;;  %190 = vst [vmem:[#allocation3 + $0x10] sm:$0xff] %v3167_v29  ;;  %2617 = vmatpush.msra.mxu3 %v3123_v56  ;;  %v3194_v56 = vld [vmem:[#allocation2 + $0x48] sm:$0x3]  ;;  %v870_v61 = vrot.slane %v3167_v29, 1  ;;  %v858_v20 = vld [vmem:[#allocation11 + $0x238] sm:$0xff]  ;;  %v856_v54 = vld [vmem:[#allocation11 + $0x228] sm:$0xff] }
  0x76   :  { %709 = vmatmul.f32.gmra.mxu1 %v3049_v52  ;;  %1012 = vmatpush.msrb.mxu2 %v858_v20  ;;  %v304_v24 = vld [vmem:[#allocation11 + $0x90] sm:$0xff]  ;;  %v319_v20 = vld [vmem:[#allocation11 + $0x108] sm:$0xff] }
  0x77   :  { %907 = vmatpush.msrb.mxu1 %v843_v26  ;;  %760 = vmatpush.msra.mxu0 %v254_v28  ;;  %v836_v26 = vld [vmem:[#allocation11 + $0x188] sm:$0xff]  ;;  %v834_v28 = vld [vmem:[#allocation11 + $0x178] sm:$0xff] }
  0x78   :  { %2618 = vmatpush.msra.mxu3 %v3128_v58  ;;  %v825_v58 = vld [vmem:[#allocation11 + $0x130] sm:$0xff]  ;;  %1013 = vmatpush.msrb.mxu2 %v856_v54  ;;  %v821_v54 = vld [vmem:[#allocation3 + $0x48] sm:$0x7] }
  0x79   :  { %908 = vmatpush.msrb.mxu1 %v841_v30  ;;  %761 = vmatpush.msra.mxu0 %v251_v31  ;;  %v300_v30 = vld [vmem:[#allocation11 + $0x70] sm:$0xff] }
  0x7a   :  { %2502 = vmatmul.msk.f32.gmra.mxu3 %vm136_vm0, %v3071_v11  ;;  %v837_v11 = vld [vmem:[#allocation11 + $0x190] sm:$0xff] }
  0x7b   :  { %648 = vmatmul.f32.gmra.mxu0 %v3075_v16  ;;  %2619 = vmatpush.msra.mxu3 %v3132_v60  ;;  %v869_v60 = vrot.slane %v818_v55, 1  ;;  %v3210_v5 = vld [vmem:[#allocation3 + $0x20] sm:$0xff] }
  0x7c   :  { %2506 = vmatmul.msk.f32.gmra.mxu2 %vm136_vm0, %v3026_v23  ;;  %762 = vmatpush.msra.mxu0 %v248_v32  ;;  %v875_v10 = vrot.slane %v3210_v5, 1  ;;  %v820_v32 = vld [vmem:[#allocation3 + $0x40] sm:$0x7] }
  0x7d   :  { %909 = vmatpush.msrb.mxu1 %v839_v34  ;;  %2620 = vmatpush.msra.mxu3 %v3135_v62  ;;  %v852_v62 = vld [vmem:[#allocation11 + $0x208] sm:$0xff]  ;;  %v3206_v3 = vsel %vm388_vm2, %v869_v60, %v870_v61  ;;  %v298_v34 = vld [vmem:[#allocation11 + $0x60] sm:$0xff] }
  0x7e   :  { %712 = vmatmul.f32.gmra.mxu1 %v3075_v16  ;;  %763 = vmatpush.msra.mxu0 %v245_v35  ;;  %v3232_v17 = vsel %vm388_vm2, %v870_v61, %v875_v10  ;;  %v3242_v31 = vsel %vm388_vm2, %v875_v10, %v879_v25  ;;  %v296_v35 = vld [vmem:[#allocation11 + $0x50] sm:$0xff]  ;;  %v307_v60 = vld [vmem:[#allocation11 + $0xa8] sm:$0xff]  ;;  %v3278_v61 = vld [vmem:[#allocation3 + $0x28] sm:$0xff] }
  0x7f   :  { %910 = vmatpush.msrb.mxu1 %v837_v11  ;;  %2621 = vmatpush.msra.mxu3 %v3139_v63  ;;  %v316_v63 = vld [vmem:[#allocation11 + $0xf0] sm:$0xff]  ;;  %v3246_v11 = vrot.slane %v820_v32, 1  ;;  %v287_v32 = vld [vmem:[#allocation11 + $0x8] sm:$0xff] }
  0x80   :  { %764 = vmatpush.msra.mxu0 %v242_v36  ;;  %v828_v36 = vld [vmem:[#allocation11 + $0x148] sm:$0xff] }
  0x81   :  { %911 = vmatpush.msrb.mxu1 %v835_v38  ;;  %737 = vmatpush.msrb.mxu3 %v274_v41  ;;  %v294_v38 = vld [vmem:[#allocation11 + $0x40] sm:$0xff] }
  0x82   :  { %2503 = vmatmul.msk.f32.gmra.mxu3 %vm136_vm0, %v3011_v7  ;;  %765 = vmatpush.msra.mxu0 %v239_v39  ;;  %v3187_v7 = vld [vmem:[#allocation2 + $0x40] sm:$0x3]  ;;  %v826_v39 = vld [vmem:[#allocation11 + $0x138] sm:$0xff] }
  0x83   :  { %651 = vmatmul.f32.gmra.mxu0 %v3061_v1  ;;  %912 = vmatpush.msrb.mxu1 %v833_v42  ;;  %v290_v42 = vld [vmem:[#allocation11 + $0x20] sm:$0xff] }
  0x84   :  { %2507 = vmatmul.msk.f32.gmra.mxu2 %vm136_vm0, %v3036_v37  ;;  %766 = vmatpush.msra.mxu0 %v236_v40  ;;  %v292_v40 = vld [vmem:[#allocation11 + $0x30] sm:$0xff] }
  0x85   :  { %913 = vmatpush.msrb.mxu1 %v831_v46  ;;  %v286_v46 = vld [vmem:[#allocation11] sm:$0xff] }
  0x86   :  { %715 = vmatmul.f32.gmra.mxu1 %v3061_v1  ;;  %767 = vmatpush.msra.mxu0 %v233_v44  ;;  %v288_v44 = vld [vmem:[#allocation11 + $0x10] sm:$0xff] }
  0x87   :  { %914 = vmatpush.msrb.mxu1 %v829_v50  ;;  %v819_v50 = vld [vmem:[#allocation3 + $0x8] sm:$0xfe] }
  0x88   :  { %768 = vmatpush.msra.mxu0 %v230_v47  ;;  %v318_v47 = vld [vmem:[#allocation11 + $0x100] sm:$0xff] }
  0x89   :  { %915 = vmatpush.msrb.mxu1 %v827_v53  ;;  %v872_v53 = vrot.slane %v819_v50, 1 }
  0x8a   :  { %654 = vmatmul.f32.vlgmr.msra.gmra.mxu3 %v3187_v7  ;;  %769 = vmatpush.msra.mxu0 %v227_v51 }
  0x8b   :  { %948 = vmatpush.msra.mxu3 %v857_v48  ;;  %770 = vmatmul.f32.vlgmr.msra.gmra.mxu0 %v3144_v4  ;;  %v848_v4 = vld [vmem:[#allocation11 + $0x1e8] sm:$0xff]  ;;  %v3266_v48 = vld [vmem:[#allocation3 + $0x18] sm:$0xff] }
  0x8c   :  { %2508 = vmatmul.msk.f32.gmra.mxu2 %vm136_vm0, %v3194_v56  ;;  %966 = vmatpush.msrb.mxu0 %v854_v57  ;;  %v311_v57 = vld [vmem:[#allocation11 + $0xc8] sm:$0xff] }
  0x8d   :  { %916 = vmatpush.msrb.mxu1 %v825_v58  ;;  %949 = vmatpush.msra.mxu3 %v855_v59  ;;  %v309_v58 = vld [vmem:[#allocation11 + $0xb8] sm:$0xff] }
  0x8e   :  { %718 = vmatmul.f32.gmra.mxu1 %v3187_v7  ;;  %967 = vmatpush.msrb.mxu0 %v852_v62 }
  0x8f   :  { %917 = vmatpush.msrb.mxu1 %v823_v21  ;;  %v3283_v21 = vld [vmem:[#allocation3] sm:$0xff] }
  0x90   :  { %968 = vmatpush.msrb.mxu0 %v850_v2  ;;  %v877_v2 = vrot.slane %v3278_v61, 1 }
  0x91   :  { %1042 = vmatpush.msra.mxu1 %v316_v63  ;;  %v305_v63 = vld [vmem:[#allocation11 + $0x98] sm:$0xff] }
  0x92   :  { %2509 = vmatmul.msk.f32.vlgmr.msrb.gmra.mxu3 %vm136_vm0, %v3148_v6  ;;  %969 = vmatpush.msrb.mxu0 %v848_v4  ;;  %v303_v4 = vld [vmem:[#allocation11 + $0x88] sm:$0xff] }
  0x93   :  { %773 = vmatmul.f32.gmra.mxu0 %v3049_v52  ;;  %1043 = vmatpush.msra.mxu1 %v314_v8  ;;  %v308_v52 = vld [vmem:[#allocation11 + $0xb0] sm:$0xff] }
  0x94   :  { %2514 = vmatmul.msk.f32.vlgmr.msra.gmra.mxu2 %vm136_vm0, %v3148_v6  ;;  %970 = vmatpush.msrb.mxu0 %v846_v9  ;;  %v840_v6 = vld [vmem:[#allocation11 + $0x1a8] sm:$0xff] }
  0x95   :  { %1044 = vmatpush.msra.mxu1 %v312_v33  ;;  %1088 = vmatpush.msrb.mxu3 %v320_v18  ;;  %v299_v9 = vld [vmem:[#allocation11 + $0x68] sm:$0xff]  ;;  %v3290_v33 = vld [vmem:[#allocation3 + $0x38] sm:$0xff]  ;;  %v321_v18 = vld [vmem:[#allocation11 + $0x118] sm:$0xff] }
  0x96   :  { %918 = vmatmul.f32.vlgmr.msrb.gmra.mxu1 %v3206_v3  ;;  %971 = vmatpush.msrb.mxu0 %v844_v12  ;;  %v297_v12 = vld [vmem:[#allocation11 + $0x58] sm:$0xff] }
  0x97   :  { %1045 = vmatpush.msra.mxu1 %v310_v14  ;;  %1089 = vmatpush.msrb.mxu3 %v318_v47  ;;  %v1202_v47 = vld [vmem:[#allocation10 + $0x408] sm:$0xff] }
  0x98   :  { %972 = vmatpush.msrb.mxu0 %v842_v15  ;;  %v881_v15 = vrot.slane %v3290_v33, 1  ;;  %1152 = vmatpush.msra.mxu2 %v321_v18  ;;  %v1197_v18 = vld [vmem:[#allocation10 + $0x3e0] sm:$0xff] }
  0x99   :  { %1046 = vmatpush.msra.mxu1 %v308_v52  ;;  %v1223_v52 = vld [vmem:[#allocation10 + $0x4b0] sm:$0xff] }
  0x9a   :  { %2510 = vmatmul.msk.f32.gmra.mxu3 %vm136_vm0, %v3018_v13  ;;  %973 = vmatpush.msrb.mxu0 %v840_v6  ;;  %v295_v6 = vld [vmem:[#allocation11 + $0x48] sm:$0xff] }
  0x9b   :  { %776 = vmatmul.f32.gmra.mxu0 %v3075_v16  ;;  %1047 = vmatpush.msra.mxu1 %v306_v19  ;;  %v832_v16 = vld [vmem:[#allocation11 + $0x168] sm:$0xff]  ;;  %v293_v19 = vld [vmem:[#allocation11 + $0x38] sm:$0xff] }
  0x9c   :  { %2515 = vmatmul.msk.f32.gmra.mxu2 %vm136_vm0, %v3018_v13  ;;  %974 = vmatpush.msrb.mxu0 %v838_v22  ;;  %v830_v13 = vld [vmem:[#allocation11 + $0x158] sm:$0xff]  ;;  %v882_v22 = vsel %vm388_vm2, %v877_v2, %v881_v15 }
  0x9d   :  { %1048 = vmatpush.msra.mxu1 %v304_v24  ;;  %v291_v24 = vld [vmem:[#allocation11 + $0x28] sm:$0xff]  ;;  %1153 = vmatpush.msra.mxu2 %v319_v20  ;;  %v1194_v20 = vld [vmem:[#allocation10 + $0x3c8] sm:$0xff] }
  0x9e   :  { %921 = vmatmul.f32.gmra.mxu1 %v3232_v17  ;;  %975 = vmatpush.msrb.mxu0 %v836_v26 }
  0x9f   :  { %1049 = vmatpush.msra.mxu1 %v302_v27 }
  0xa0   :  { %976 = vmatpush.msrb.mxu0 %v834_v28  ;;  %v289_v28 = vld [vmem:[#allocation11 + $0x18] sm:$0xff] }
  0xa1   :  { %1050 = vmatpush.msra.mxu1 %v300_v30 }
  0xa2   :  { %2511 = vmatmul.msk.f32.gmra.mxu3 %vm136_vm0, %v3026_v23  ;;  %977 = vmatpush.msrb.mxu0 %v832_v16  ;;  %v1220_v16 = vld [vmem:[#allocation10 + $0x498] sm:$0xff] }
  0xa3   :  { %779 = vmatmul.f32.gmra.mxu0 %v3061_v1  ;;  %1051 = vmatpush.msra.mxu1 %v298_v34  ;;  %v3257_v1 = vsel %vm388_vm2, %v879_v25, %v3246_v11  ;;  %v1217_v34 = vld [vmem:[#allocation10 + $0x480] sm:$0xff] }
  0xa4   :  { %2516 = vmatmul.msk.f32.gmra.mxu2 %vm136_vm0, %v3026_v23  ;;  %978 = vmatpush.msrb.mxu0 %v830_v13  ;;  %v824_v23 = vld [vmem:[#allocation11 + $0x128] sm:$0xff] }
  0xa5   :  { %1052 = vmatpush.msra.mxu1 %v296_v35  ;;  %v1214_v35 = vld [vmem:[#allocation10 + $0x468] sm:$0xff] }
  0xa6   :  { %924 = vmatmul.f32.gmra.mxu1 %v3242_v31  ;;  %979 = vmatpush.msrb.mxu0 %v828_v36 }
  0xa7   :  { %1053 = vmatpush.msra.mxu1 %v294_v38 }
  0xa8   :  { %980 = vmatpush.msrb.mxu0 %v826_v39 }
  0xa9   :  { %1054 = vmatpush.msra.mxu1 %v292_v40 }
  0xaa   :  { %2512 = vmatmul.msk.f32.gmra.mxu3 %vm136_vm0, %v3036_v37  ;;  %981 = vmatpush.msrb.mxu0 %v824_v23 }
  0xab   :  { %v3251_v41 = vpop.f32.mrf.mxu1  ;;  %782 = vmatmul.f32.gmra.mxu0 %v3187_v7  ;;  %1055 = vmatpush.msra.mxu1 %v290_v42  ;;  %v313_v7 = vld [vmem:[#allocation11 + $0xd8] sm:$0xff]  ;;  %v1211_v42 = vld [vmem:[#allocation10 + $0x450] sm:$0xff] }
  0xac   :  { %2517 = vmatmul.msk.f32.gmra.mxu2 %vm136_vm0, %v3036_v37  ;;  %1106 = vmatpush.msra.mxu0 %v317_v45  ;;  %v873_v37 = vrot.slane %v3266_v48, 1  ;;  %v1205_v45 = vld [vmem:[#allocation10 + $0x420] sm:$0xff] }
  0xad   :  { %v3260_v43 = vpop.f32.mrf.mxu3  ;;  %1056 = vmatpush.msra.mxu1 %v288_v44  ;;  %v1208_v44 = vld [vmem:[#allocation10 + $0x438] sm:$0xff] }
  0xae   :  { %927 = vmatmul.f32.gmra.mxu1 %v3257_v1  ;;  %1107 = vmatpush.msra.mxu0 %v315_v0  ;;  %v874_v59 = vsel %vm388_vm2, %v872_v53, %v873_v37  ;;  %v878_v8 = vsel %vm388_vm2, %v873_v37, %v877_v2  ;;  %v1218_v0 = vld [vmem:[#allocation10 + $0x488] sm:$0xff]  ;;  %v3330_v53 = vld [vmem:[#allocation3 + $0x40] sm:$0x3]  ;;  %v1215_v37 = vld [vmem:[#allocation10 + $0x470] sm:$0xff] }
  0xaf   :  { %1057 = vmatpush.msra.mxu1 %v286_v46  ;;  %v1221_v46 = vld [vmem:[#allocation10 + $0x4a0] sm:$0xff]  ;;  %v277_v2 = vld [vmem:[#allocation3 + $0x8] sm:$0xff] }
  0xb0   :  { %1108 = vmatpush.msra.mxu0 %v313_v7 }
  0xb1   :  { %1264 = vmatpush.msrb.mxu1 %v1220_v16  ;;  %v1178_v16 = vld [vmem:[#allocation10 + $0x348] sm:$0xff] }
  0xb2   :  { %2513 = vmatmul.msk.f32.gmra.mxu3 %vm136_vm0, %v3194_v56  ;;  %1109 = vmatpush.msra.mxu0 %v311_v57  ;;  %v1199_v57 = vld [vmem:[#allocation10 + $0x3f0] sm:$0xff] }
  0xb3   :  { %v3268_v51 = vpop.f32.mrf.mxu1  ;;  %982 = vmatmul.f32.vlgmr.msrb.gmra.mxu0 %v3206_v3  ;;  %1265 = vmatpush.msrb.mxu1 %v1217_v34 }
  0xb4   :  { %2518 = vmatmul.msk.f32.gmra.mxu2 %vm136_vm0, %v3194_v56  ;;  %1110 = vmatpush.msra.mxu0 %v309_v58  ;;  %v301_v56 = vld [vmem:[#allocation11 + $0x78] sm:$0xff]  ;;  %v1212_v58 = vld [vmem:[#allocation10 + $0x458] sm:$0xff] }
  0xb5   :  { %v535_v55 = vpop.f32.mrf.mxu3  ;;  %1266 = vmatpush.msrb.mxu1 %v1214_v35  ;;  %v1224_v35 = vld [vmem:[#allocation10 + $0x4b8] sm:$0xff] }
  0xb6   :  { %930 = vmatmul.f32.gmra.mxu1 %v3246_v11  ;;  %1111 = vmatpush.msra.mxu0 %v307_v60 }
  0xb7   :  { %1267 = vmatpush.msrb.mxu1 %v1211_v42  ;;  %v1170_v42 = vld [vmem:[#allocation2] sm:$0xfc] }
  0xb8   :  { %1112 = vmatpush.msra.mxu0 %v305_v63  ;;  %v1209_v63 = vld [vmem:[#allocation10 + $0x440] sm:$0xff] }
  0xb9   :  { %1268 = vmatpush.msrb.mxu1 %v1208_v44  ;;  %v2688_v44 = vld [vmem:[#allocation2 + $0x10] sm:$0xff] }
  0xba   :  { %2519 = vmatmul.msk.f32.vlgmr.msra.gmra.mxu3 %vm148_vm5, %v874_v59  ;;  %1113 = vmatpush.msra.mxu0 %v303_v4  ;;  %v1206_v4 = vld [vmem:[#allocation10 + $0x428] sm:$0xff] }
  0xbb   :  { %v3280_v62 = vpop.f32.mrf.mxu1  ;;  %985 = vmatmul.f32.gmra.mxu0 %v3232_v17  ;;  %1311 = vmatpush.msra.mxu3 %v1223_v52  ;;  %v1200_v52 = vld [vmem:[#allocation10 + $0x3f8] sm:$0xff] }
  0xbc   :  { %2524 = vmatmul.msk.f32.vlgmr.msrb.gmra.mxu2 %vm148_vm5, %v874_v59  ;;  %1114 = vmatpush.msra.mxu0 %v301_v56  ;;  %v1196_v59 = vld [vmem:[#allocation10 + $0x3d8] sm:$0xff] }
  0xbd   :  { %v538_v3 = vpop.f32.mrf.mxu3  ;;  %1269 = vmatpush.msrb.mxu1 %v1205_v45  ;;  %v1222_v45 = vld [vmem:[#allocation10 + $0x4a8] sm:$0xff]  ;;  %1375 = vmatpush.msrb.mxu2 %v1224_v35 }
  0xbe   :  { %1058 = vmatmul.f32.vlgmr.msra.gmra.mxu1 %v3283_v21  ;;  %1115 = vmatpush.msra.mxu0 %v299_v9  ;;  %v3295_v14 = vpop.f32.mrf.mxu0  ;;  %v1203_v9 = vld [vmem:[#allocation10 + $0x410] sm:$0xff] }
  0xbf   :  { %1270 = vmatpush.msrb.mxu1 %v1202_v47 }
  0xc0   :  { %1116 = vmatpush.msra.mxu0 %v297_v12 }
  0xc1   :  { %1271 = vmatpush.msrb.mxu1 %v1199_v57 }
  0xc2   :  { %2520 = vmatmul.msk.f32.gmra.mxu3 %vm148_vm5, %v878_v8  ;;  %1117 = vmatpush.msra.mxu0 %v295_v6 }
  0xc3   :  { %v3292_v10 = vpop.f32.mrf.mxu1  ;;  %988 = vmatmul.f32.gmra.mxu0 %v3242_v31  ;;  %v885_v31 = vrot.slane %v821_v54, 1  ;;  %1272 = vmatpush.msrb.mxu1 %v1196_v59  ;;  %v1191_v54 = vld [vmem:[#allocation10 + $0x3b0] sm:$0xff] }
  0xc4   :  { %2525 = vmatmul.msk.f32.gmra.mxu2 %vm148_vm5, %v878_v8  ;;  %1118 = vmatpush.msra.mxu0 %v293_v19  ;;  %v1184_v19 = vld [vmem:[#allocation10 + $0x378] sm:$0xff]  ;;  %v1219_v59 = vld [vmem:[#allocation10 + $0x490] sm:$0xff] }
  0xc5   :  { %v3298_v17 = vpop.f32.mrf.mxu3  ;;  %v503_v25 = vpop.f32.mrf.mxu2  ;;  %v886_v36 = vsel %vm388_vm2, %v881_v15, %v885_v31 }
  0xc6   :  { %1061 = vmatmul.f32.gmra.mxu1 %v3167_v29  ;;  %1119 = vmatpush.msra.mxu0 %v291_v24  ;;  %v3306_v27 = vadd.f32 %v535_v55, %v503_v25  ;;  %v3309_v30 = vpop.f32.mrf.mxu0 }
  0xc8   :  { %1120 = vmatpush.msra.mxu0 %v289_v28  ;;  %v1181_v28 = vld [vmem:[#allocation10 + $0x360] sm:$0xff] }
  0xca   :  { %2521 = vmatmul.msk.f32.gmra.mxu3 %vm148_vm5, %v882_v22  ;;  %1121 = vmatpush.msra.mxu0 %v287_v32  ;;  %v1188_v32 = vld [vmem:[#allocation10 + $0x398] sm:$0xff] }
  0xcb   :  { %v3304_v26 = vpop.f32.mrf.mxu1  ;;  %991 = vmatmul.f32.gmra.mxu0 %v3257_v1 }
  0xcc   :  { %2526 = vmatmul.msk.f32.gmra.mxu2 %vm148_vm5, %v882_v22  ;;  %1328 = vmatpush.msrb.mxu0 %v1221_v46  ;;  %v1231_v46 = vrot.slane %v1170_v42, 2 }
  0xcd   :  { %v544_v13 = vpop.f32.mrf.mxu3  ;;  %v506_v38 = vpop.f32.mrf.mxu2 }
  0xce   :  { %1064 = vmatmul.f32.gmra.mxu1 %v3210_v5  ;;  %v3317_v40 = vadd.f32 %v538_v3, %v506_v38  ;;  %1329 = vmatpush.msrb.mxu0 %v1218_v0  ;;  %v1193_v3 = vld [vmem:[#allocation10 + $0x3c0] sm:$0xff]  ;;  %v1182_v38 = vld [vmem:[#allocation10 + $0x368] sm:$0xff] }
  0xcf   :  { %v3320_v23 = vpop.f32.mrf.mxu0  ;;  %1273 = vmatpush.msrb.mxu1 %v1193_v3  ;;  %v2689_v3 = vld [vmem:[#allocation2 + $0x20] sm:$0xff] }
  0xd0   :  { %1330 = vmatpush.msrb.mxu0 %v1215_v37  ;;  %v1179_v37 = vld [vmem:[#allocation10 + $0x350] sm:$0xff] }
  0xd2   :  { %2522 = vmatmul.msk.f32.gmra.mxu3 %vm148_vm5, %v886_v36  ;;  %1331 = vmatpush.msrb.mxu0 %v1212_v58  ;;  %v1176_v58 = vld [vmem:[#allocation10 + $0x338] sm:$0xff] }
  0xd3   :  { %v3315_v39 = vpop.f32.mrf.mxu1  ;;  %994 = vmatmul.f32.gmra.mxu0 %v3246_v11 }
  0xd4   :  { %2527 = vmatmul.msk.f32.gmra.mxu2 %vm148_vm5, %v886_v36  ;;  %1332 = vmatpush.msrb.mxu0 %v1209_v63  ;;  %v1175_v36 = vld [vmem:[#allocation10 + $0x330] sm:$0xff] }
  0xd5   :  { %v3322_v1 = vpop.f32.mrf.mxu3 }
  0xd6   :  { %1067 = vmatmul.f32.gmra.mxu1 %v3190_v49  ;;  %v509_v7 = vpop.f32.mrf.mxu2  ;;  %1333 = vmatpush.msrb.mxu0 %v1206_v4  ;;  %v1237_v4 = vrot.slane %v2689_v3, 2  ;;  %v1172_v3 = vld [vmem:[#allocation2 + $0x40] sm:$0xf] }
  0xd7   :  { %v3333_v11 = vadd.f32 %v3298_v17, %v509_v7  ;;  %v3335_v55 = vpop.f32.mrf.mxu0  ;;  %v1187_v17 = vld [vmem:[#allocation10 + $0x390] sm:$0xff] }
  0xd8   :  { %1334 = vmatpush.msrb.mxu0 %v1203_v9 }
  0xda   :  { %2523 = vmatmul.msk.f32.gmra.mxu3 %vm148_vm5, %v885_v31  ;;  %1335 = vmatpush.msrb.mxu0 %v1200_v52 }
  0xdb   :  { %v3327_v50 = vpop.f32.mrf.mxu1  ;;  %1122 = vmatmul.f32.vlgmr.msra.gmra.mxu0 %v3283_v21  ;;  %v1190_v21 = vld [vmem:[#allocation10 + $0x3a8] sm:$0xff] }
  0xdc   :  { %2528 = vmatmul.msk.f32.gmra.mxu2 %vm148_vm5, %v885_v31  ;;  %1274 = vmatpush.msrb.mxu1 %v1190_v21  ;;  %v1225_v31 = vld [vmem:[#allocation10 + $0x4c0] sm:$0xff] }
  0xdd   :  { %v3337_v60 = vpop.f32.mrf.mxu3  ;;  %1336 = vmatpush.msrb.mxu0 %v1197_v18 }
  0xde   :  { %1070 = vmatmul.f32.gmra.mxu1 %v3330_v53 }
  0xdf   :  { %v512_v8 = vpop.f32.mrf.mxu2  ;;  %1275 = vmatpush.msrb.mxu1 %v1187_v17  ;;  %1337 = vmatpush.msrb.mxu0 %v1194_v20  ;;  %v1210_v17 = vld [vmem:[#allocation10 + $0x448] sm:$0xff]  ;;  %v1506_v20 = vld [vmem:[#allocation11 + $0x330] sm:$0xff] }
  0xe0   :  { %v3345_v12 = vadd.f32 %v544_v13, %v512_v8  ;;  %v3347_v15 = vpop.f32.mrf.mxu0  ;;  %v1185_v13 = vld [vmem:[#allocation10 + $0x380] sm:$0xff] }
  0xe1   :  { %1276 = vmatpush.msrb.mxu1 %v1184_v19  ;;  %1338 = vmatpush.msrb.mxu0 %v1191_v54  ;;  %v1213_v8 = vld [vmem:[#allocation10 + $0x460] sm:$0xff]  ;;  %v1207_v19 = vld [vmem:[#allocation10 + $0x430] sm:$0xff]  ;;  %v1204_v54 = vld [vmem:[#allocation10 + $0x418] sm:$0xff] }
  0xe2   :  { %2529 = vmatmul.msk.f32.vlgmr.msrb.gmra.mxu3 %vm148_vm5, %v277_v2 }
  0xe3   :  { %v3342_v56 = vpop.f32.mrf.mxu1  ;;  %1125 = vmatmul.f32.gmra.mxu0 %v3167_v29  ;;  %1277 = vmatpush.msrb.mxu1 %v1181_v28  ;;  %v1504_v28 = vld [vmem:[#allocation11 + $0x320] sm:$0xff] }
  0xe4   :  { %2534 = vmatmul.msk.f32.vlgmr.msra.gmra.mxu2 %vm148_vm5, %v277_v2  ;;  %1439 = vmatpush.msrb.mxu3 %v1225_v31  ;;  %v1216_v2 = vld [vmem:[#allocation10 + $0x478] sm:$0xff]  ;;  %v2690_v31 = vld [vmem:[#allocation2 + $0x30] sm:$0xff] }
  0xe5   :  { %v3349_v6 = vpop.f32.mrf.mxu3  ;;  %1339 = vmatpush.msrb.mxu0 %v1188_v32  ;;  %1278 = vmatpush.msrb.mxu1 %v1178_v16  ;;  %v1241_v16 = vrot.slane %v2690_v31, 2  ;;  %v1171_v32 = vld [vmem:[#allocation2 + $0x8] sm:$0xfc] }
  0xe6   :  { %v1234_v42 = vrot.slane %v1171_v32, 2  ;;  %v2692_v31 = vld [vmem:[#allocation2 + $0x28] sm:$0xff] }
  0xe7   :  { %v515_v24 = vpop.f32.mrf.mxu2  ;;  %1340 = vmatpush.msrb.mxu0 %v1185_v13  ;;  %1279 = vmatpush.msrb.mxu1 %v1175_v36  ;;  %v3402_v13 = vsel %vm1230_vm7, %v1237_v4, %v1241_v16  ;;  %v1502_v36 = vld [vmem:[#allocation11 + $0x310] sm:$0xff]  ;;  %v1239_v32 = vrot.slane %v2692_v31, 2  ;;  %v2693_v31 = vld [vmem:[#allocation2 + $0x38] sm:$0xff] }
  0xe8   :  { %v3358_v25 = vadd.f32 %v3322_v1, %v515_v24  ;;  %v3360_v29 = vpop.f32.mrf.mxu0  ;;  %v1232_v1 = vrot.slane %v2688_v44, 2  ;;  %v285_v24 = vld [vmem:[#allocation3 + $0x48] sm:$0x3] }
  0xe9   :  { %1341 = vmatpush.msrb.mxu0 %v1182_v38  ;;  %1392 = vmatpush.msra.mxu1 %v1222_v45  ;;  %v2691_v44 = vld [vmem:[#allocation2 + $0x18] sm:$0xff]  ;;  %v1201_v45 = vld [vmem:[#allocation10 + $0x400] sm:$0xff] }
  0xea   :  { %2530 = vmatmul.msk.f32.gmra.mxu3 %vm148_vm5, %v3266_v48  ;;  %v3374_v7 = vsel %vm1230_vm7, %v1231_v46, %v1232_v1  ;;  %v3385_v9 = vsel %vm1230_vm7, %v1232_v1, %v1237_v4  ;;  %v1235_v1 = vrot.slane %v2691_v44, 2  ;;  %v1500_v46 = vld [vmem:[#allocation11 + $0x300] sm:$0xff]  ;;  %v1189_v44 = vld [vmem:[#allocation10 + $0x3a0] sm:$0xff] }
  0xeb   :  { %v3353_v22 = vpop.f32.mrf.mxu1  ;;  %1128 = vmatmul.f32.gmra.mxu0 %v3210_v5  ;;  %1280 = vmatmul.f32.vlgmr.msrb.gmra.mxu1 %v3374_v7 }
  0xec   :  { %2535 = vmatmul.msk.f32.gmra.mxu2 %vm148_vm5, %v3266_v48  ;;  %1342 = vmatpush.msrb.mxu0 %v1179_v37  ;;  %v1198_v37 = vld [vmem:[#allocation10 + $0x3e8] sm:$0xff]  ;;  %v3418_v4 = vsel %vm1230_vm7, %v1234_v42, %v1235_v1  ;;  %v484_v42 = vadd.f32 %v3260_v43, %v3347_v15 }
  0xed   :  { %v3362_v34 = vpop.f32.mrf.mxu3  ;;  %1393 = vmatpush.msra.mxu1 %v1219_v59  ;;  %v1488_v43 = vld [vmem:[#allocation11 + $0x2a0] sm:$0xff] }
  0xee   :  { %1343 = vmatpush.msrb.mxu0 %v1176_v58 }
  0xef   :  { %v3369_v0 = vpop.f32.mrf.mxu2  ;;  %1394 = vmatpush.msra.mxu1 %v1216_v2  ;;  %v1498_v2 = vld [vmem:[#allocation11 + $0x2f0] sm:$0xff] }
  0xf0   :  { %v3376_v57 = vpop.f32.mrf.mxu0  ;;  %1549 = vmatpush.msra.mxu0 %v1506_v20 }
  0xf1   :  { %1395 = vmatpush.msra.mxu1 %v1213_v8  ;;  %v1195_v8 = vld [vmem:[#allocation10 + $0x3d0] sm:$0xff] }
  0xf2   :  { %2531 = vmatmul.msk.f32.gmra.mxu3 %vm148_vm5, %v3278_v61  ;;  %1550 = vmatpush.msra.mxu0 %v1504_v28 }
  0xf3   :  { %v3367_v47 = vpop.f32.mrf.mxu1  ;;  %1131 = vmatmul.f32.gmra.mxu0 %v3190_v49  ;;  %1283 = vmatmul.f32.gmra.mxu1 %v3385_v9 }
  0xf4   :  { %2536 = vmatmul.msk.f32.gmra.mxu2 %vm148_vm5, %v3278_v61  ;;  %1396 = vmatpush.msra.mxu1 %v1210_v17  ;;  %v3420_v17 = vrot.slane %v1172_v3, 2 }
  0xf5   :  { %v3379_v63 = vpop.f32.mrf.mxu3  ;;  %1551 = vmatpush.msra.mxu0 %v1502_v36  ;;  %v1192_v36 = vld [vmem:[#allocation10 + $0x3b8] sm:$0xff] }
  0xf6   :  { %1397 = vmatpush.msra.mxu1 %v1207_v19  ;;  %v1496_v19 = vld [vmem:[#allocation11 + $0x2e0] sm:$0xff] }
  0xf7   :  { %v3389_v52 = vpop.f32.mrf.mxu2  ;;  %1552 = vmatpush.msra.mxu0 %v1500_v46 }
  0xf8   :  { %v3393_v49 = vpop.f32.mrf.mxu0  ;;  %1398 = vmatpush.msra.mxu1 %v1204_v54 }
  0xf9   :  { %1553 = vmatpush.msra.mxu0 %v1498_v2  ;;  %v1186_v2 = vld [vmem:[#allocation10 + $0x388] sm:$0xff] }
  0xfa   :  { %2532 = vmatmul.msk.f32.gmra.mxu3 %vm148_vm5, %v3290_v33  ;;  %1399 = vmatpush.msra.mxu1 %v1201_v45 }
  0xfb   :  { %v3387_v21 = vpop.f32.mrf.mxu1  ;;  %1134 = vmatmul.f32.gmra.mxu0 %v3330_v53  ;;  %1286 = vmatmul.f32.gmra.mxu1 %v3402_v13 }
  0xfc   :  { %2537 = vmatmul.msk.f32.gmra.mxu2 %vm148_vm5, %v3290_v33  ;;  %1400 = vmatpush.msra.mxu1 %v1198_v37  ;;  %v1490_v37 = vld [vmem:[#allocation11 + $0x2b0] sm:$0xff] }
  0xfd   :  { %v3396_v18 = vpop.f32.mrf.mxu3  ;;  %1554 = vmatpush.msra.mxu0 %v1496_v19 }
  0xfe   :  { %1401 = vmatpush.msra.mxu1 %v1195_v8  ;;  %v1486_v8 = vld [vmem:[#allocation11 + $0x290] sm:$0xff] }
  0xff   :  { %v3406_v53 = vpop.f32.mrf.mxu2 }
 0x100   :  { %v3409_v38 = vpop.f32.mrf.mxu0  ;;  %1402 = vmatpush.msra.mxu1 %v1192_v36  ;;  %v1243_v36 = vrot.slane %v2693_v31, 2  ;;  %v1177_v31 = vld [vmem:[#allocation10 + $0x340] sm:$0xff] }
 0x102   :  { %2533 = vmatmul.msk.f32.gmra.mxu3 %vm148_vm5, %v285_v24  ;;  %1403 = vmatpush.msra.mxu1 %v1189_v44  ;;  %v708_v44 = vadd.f32 %v3353_v22, %v3306_v27  ;;  %v3460_v27 = vsel %vm1230_vm7, %v1239_v32, %v1243_v36  ;;  %v1507_v22 = vld [vmem:[#allocation11 + $0x338] sm:$0xff] }
 0x103   :  { %v3404_v35 = vpop.f32.mrf.mxu1  ;;  %1344 = vmatmul.f32.vlgmr.msrb.gmra.mxu0 %v3374_v7 }
 0x104   :  { %2538 = vmatmul.msk.f32.gmra.mxu2 %vm148_vm5, %v285_v24  ;;  %v1494_v24 = vld [vmem:[#allocation11 + $0x2d0] sm:$0xff]  ;;  %1404 = vmatpush.msra.mxu1 %v1186_v2 }
 0x105   :  { %v611_v58 = vpop.f32.mrf.mxu3  ;;  %1555 = vmatpush.msra.mxu0 %v1494_v24 }
 0x106   :  { %v3413_v59 = vadd.f32 %v611_v58, %v3337_v60  ;;  %v3424_v60 = vsel %vm1230_vm7, %v1241_v16, %v3420_v17  ;;  %v1492_v16 = vld [vmem:[#allocation11 + $0x2c0] sm:$0xff]  ;;  %v3439_v58 = vsel %vm1230_vm7, %v1235_v1, %v1239_v32  ;;  %v1183_v1 = vld [vmem:[#allocation10 + $0x370] sm:$0xff] }
 0x107   :  { %v3428_v54 = vpop.f32.mrf.mxu2  ;;  %1289 = vmatmul.f32.gmra.mxu1 %v3424_v60  ;;  %1556 = vmatpush.msra.mxu0 %v1492_v16  ;;  %v1180_v16 = vld [vmem:[#allocation10 + $0x358] sm:$0xff] }
 0x108   :  { %4166 = vst [vmem:[#allocation25_spill] sm:$0xff] %v3413_v59  ;;  %v771_v28 = vpop.f32.mrf.mxu0  ;;  %1405 = vmatpush.msra.mxu1 %v1183_v1  ;;  %v600_v59 = vadd.f32 %v3349_v6, %v3304_v26  ;;  %v1480_v1 = vld [vmem:[#allocation11 + $0x260] sm:$0xff]  ;;  %v1478_v6 = vld [vmem:[#allocation11 + $0x250] sm:$0xff] }
 0x109   :  { %1557 = vmatpush.msra.mxu0 %v1490_v37  ;;  %v1510_v37 = vld [vmem:[#allocation11 + $0x350] sm:$0xff] }
 0x10a   :  { %2539 = vmatmul.msk.f32.vlgmr.msra.gmra.mxu3 %vm136_vm0, %v3418_v4  ;;  %1595 = vmatpush.msra.mxu2 %v1510_v37  ;;  %v1505_v37 = vld [vmem:[#allocation11 + $0x328] sm:$0xff] }
 0x10b   :  { %v3426_v20 = vpop.f32.mrf.mxu1  ;;  %1347 = vmatmul.f32.gmra.mxu0 %v3385_v9  ;;  %1406 = vmatpush.msra.mxu1 %v1180_v16 }
 0x10c   :  { %2544 = vmatmul.msk.f32.vlgmr.msrb.gmra.mxu2 %vm136_vm0, %v3418_v4  ;;  %1558 = vmatpush.msra.mxu0 %v1488_v43  ;;  %v1482_v43 = vld [vmem:[#allocation11 + $0x270] sm:$0xff] }
 0x10d   :  { %v655_v45 = vpop.f32.mrf.mxu3  ;;  %1407 = vmatpush.msra.mxu1 %v1177_v31 }
 0x10e   :  { %v656_v46 = vadd.f32 %v655_v45, %v484_v42  ;;  %v1511_v42 = vld [vmem:[#allocation11 + $0x358] sm:$0xff]  ;;  %v1484_v45 = vld [vmem:[#allocation11 + $0x280] sm:$0xff]  ;;  %1559 = vmatpush.msra.mxu0 %v1486_v8  ;;  %v1173_v8 = vld [vmem:[#allocation2 + $0x48] sm:$0xf] }
 0x10f   :  { %v687_v15 = vpop.f32.mrf.mxu2  ;;  %1292 = vmatmul.f32.gmra.mxu1 %v3420_v17  ;;  %1659 = vmatpush.msra.mxu3 %v1511_v42  ;;  %v772_v42 = vadd.f32 %v771_v28, %v600_v59  ;;  %v711_v59 = vadd.f32 %v3367_v47, %v3317_v40  ;;  %v1476_v28 = vld [vmem:[#allocation11 + $0x240] sm:$0xff] }
 0x110   :  { %v3445_v19 = vadd.f32 %v687_v15, %v656_v46  ;;  %v3447_v24 = vpop.f32.mrf.mxu0  ;;  %v1508_v15 = vld [vmem:[#allocation11 + $0x340] sm:$0xff]  ;;  %1560 = vmatpush.msra.mxu0 %v1484_v45  ;;  %1613 = vmatpush.msrb.mxu1 %v1507_v22  ;;  %v3470_v45 = vrot.slane %v1173_v8, 2  ;;  %v1499_v8 = vld [vmem:[#allocation11 + $0x2f8] sm:$0xff] }
 0x111   :  { %1596 = vmatpush.msra.mxu2 %v1508_v15  ;;  %v1503_v15 = vld [vmem:[#allocation11 + $0x318] sm:$0xff] }
 0x112   :  { %2540 = vmatmul.msk.f32.gmra.mxu3 %vm136_vm0, %v3439_v58  ;;  %1561 = vmatpush.msra.mxu0 %v1482_v43  ;;  %v3482_v31 = vsel %vm1230_vm7, %v1243_v36, %v3470_v45  ;;  %v714_v36 = vadd.f32 %v3387_v21, %v3333_v11 }
 0x113   :  { %v3443_v3 = vpop.f32.mrf.mxu1  ;;  %1350 = vmatmul.f32.gmra.mxu0 %v3402_v13  ;;  %1614 = vmatpush.msrb.mxu1 %v1505_v37 }
 0x114   :  { %2545 = vmatmul.msk.f32.gmra.mxu2 %vm136_vm0, %v3439_v58  ;;  %1562 = vmatpush.msra.mxu0 %v1480_v1  ;;  %v1471_v1 = vld [vmem:[#allocation3] sm:$0xfc] }
 0x115   :  { %v739_v2 = vpop.f32.mrf.mxu3  ;;  %1615 = vmatpush.msrb.mxu1 %v1503_v15  ;;  %v1516_v37 = vrot.slane %v1471_v1, 2 }
 0x116   :  { %v3452_v46 = vadd.f32 %v739_v2, %v708_v44  ;;  %1563 = vmatpush.msra.mxu0 %v1478_v6  ;;  %v1497_v6 = vld [vmem:[#allocation11 + $0x2e8] sm:$0xff] }
 0x117   :  { %v803_v16 = vpop.f32.mrf.mxu2  ;;  %1408 = vmatmul.f32.vlgmr.msra.gmra.mxu1 %v3374_v7  ;;  %v1501_v7 = vld [vmem:[#allocation11 + $0x308] sm:$0xff] }
 0x118   :  { %4167 = vst [vmem:[#allocation26_spill] sm:$0xff] %v3452_v46  ;;  %v3466_v44 = vadd.f32 %v803_v16, %v772_v42  ;;  %v3468_v32 = vpop.f32.mrf.mxu0  ;;  %1564 = vmatpush.msra.mxu0 %v1476_v28  ;;  %1616 = vmatpush.msrb.mxu1 %v1501_v7  ;;  %v1493_v7 = vld [vmem:[#allocation11 + $0x2c8] sm:$0xff] }
 0x11a   :  { %2541 = vmatmul.msk.f32.gmra.mxu3 %vm136_vm0, %v3460_v27  ;;  %1617 = vmatpush.msrb.mxu1 %v1499_v8  ;;  %v1491_v8 = vld [vmem:[#allocation11 + $0x2b8] sm:$0xff] }
 0x11b   :  { %v3464_v26 = vpop.f32.mrf.mxu1  ;;  %1353 = vmatmul.f32.gmra.mxu0 %v3424_v60 }
 0x11c   :  { %2546 = vmatmul.msk.f32.gmra.mxu2 %vm136_vm0, %v3460_v27  ;;  %1618 = vmatpush.msrb.mxu1 %v1497_v6  ;;  %v1472_v6 = vld [vmem:[#allocation3 + $0x8] sm:$0xfc] }
 0x11d   :  { %v742_v2 = vpop.f32.mrf.mxu3 }
 0x11e   :  { %v3475_v43 = vadd.f32 %v742_v2, %v711_v59  ;;  %v2694_v59 = vld [vmem:[#allocation3 + $0x10] sm:$0xff]  ;;  %v1495_v2 = vld [vmem:[#allocation11 + $0x2d8] sm:$0xff] }
 0x11f   :  { %v3484_v40 = vpop.f32.mrf.mxu2  ;;  %1411 = vmatmul.f32.gmra.mxu1 %v3385_v9  ;;  %v1517_v28 = vrot.slane %v2694_v59, 2  ;;  %v1509_v9 = vld [vmem:[#allocation11 + $0x348] sm:$0xff] }
 0x120   :  { %4168 = vst [vmem:[#allocation27_spill] sm:$0xff] %v3475_v43  ;;  %v3490_v22 = vpop.f32.mrf.mxu0  ;;  %1660 = vmatpush.msra.mxu3 %v1509_v9  ;;  %1619 = vmatpush.msrb.mxu1 %v1495_v2  ;;  %v1520_v9 = vrot.slane %v3266_v48, 2  ;;  %v1489_v2 = vld [vmem:[#allocation11 + $0x2a8] sm:$0xff] }
 0x121   :  { %v3507_v15 = vsel %vm1230_vm7, %v1516_v37, %v1517_v28  ;;  %v1519_v37 = vrot.slane %v1472_v6, 2 }
 0x122   :  { %2542 = vmatmul.msk.f32.gmra.mxu3 %vm136_vm0, %v3482_v31  ;;  %1620 = vmatpush.msrb.mxu1 %v1493_v7 }
 0x123   :  { %v3488_v47 = vpop.f32.mrf.mxu1  ;;  %1356 = vmatmul.f32.gmra.mxu0 %v3420_v17  ;;  %v1521_v48 = vsel %vm1230_vm7, %v1519_v37, %v1520_v9  ;;  %v1481_v37 = vld [vmem:[#allocation11 + $0x268] sm:$0xff] }
 0x124   :  { %2547 = vmatmul.msk.f32.gmra.mxu2 %vm136_vm0, %v3482_v31  ;;  %1621 = vmatpush.msrb.mxu1 %v1491_v8  ;;  %v1487_v8 = vld [vmem:[#allocation11 + $0x298] sm:$0xff] }
 0x125   :  { %v745_v42 = vpop.f32.mrf.mxu3 }
 0x126   :  { %v3495_v16 = vadd.f32 %v745_v42, %v714_v36  ;;  %v717_v36 = vadd.f32 %v3404_v35, %v3345_v12  ;;  %1622 = vmatpush.msrb.mxu1 %v1489_v2 }
 0x127   :  { %v3500_v11 = vpop.f32.mrf.mxu2  ;;  %1414 = vmatmul.f32.gmra.mxu1 %v3402_v13  ;;  %v1522_v13 = vrot.slane %v3210_v5, 2  ;;  %v720_v5 = vadd.f32 %v3426_v20, %v3358_v25 }
 0x128   :  { %4169 = vst [vmem:[#allocation28_spill] sm:$0xff] %v3495_v16  ;;  %v3504_v21 = vpop.f32.mrf.mxu0  ;;  %1623 = vmatpush.msrb.mxu1 %v1487_v8  ;;  %v1479_v8 = vld [vmem:[#allocation11 + $0x258] sm:$0xff] }
 0x129   :  { %4170 = vst [vmem:[#allocation29_spill] sm:$0xff] %v3504_v21  ;;  %v1523_v7 = vsel %vm1230_vm7, %v1517_v28, %v1522_v13 }
 0x12a   :  { %2543 = vmatmul.msk.f32.gmra.mxu3 %vm136_vm0, %v3470_v45 }
 0x12b   :  { %v3512_v1 = vpop.f32.mrf.mxu1  ;;  %1565 = vmatmul.f32.vlgmr.msra.gmra.mxu0 %v3507_v15 }
 0x12c   :  { %2548 = vmatmul.msk.f32.gmra.mxu2 %vm136_vm0, %v3470_v45 }
 0x12d   :  { %v748_v42 = vpop.f32.mrf.mxu3 }
 0x12e   :  { %v3514_v59 = vadd.f32 %v748_v42, %v717_v36  ;;  %v1485_v36 = vld [vmem:[#allocation11 + $0x288] sm:$0xff] }
 0x12f   :  { %v3521_v12 = vpop.f32.mrf.mxu2  ;;  %1417 = vmatmul.f32.gmra.mxu1 %v3424_v60  ;;  %v1483_v60 = vld [vmem:[#allocation11 + $0x278] sm:$0xff] }
 0x130   :  { %4171 = vst [vmem:[#allocation30_spill] sm:$0xff] %v3514_v59  ;;  %v3525_v35 = vpop.f32.mrf.mxu0  ;;  %1624 = vmatpush.msrb.mxu1 %v1485_v36  ;;  %v1524_v59 = vrot.slane %v3278_v61, 2  ;;  %v1477_v61 = vld [vmem:[#allocation11 + $0x248] sm:$0xff] }
 0x132   :  { %2549 = vmatmul.msk.f32.vlgmr.msrb.gmra.mxu3 %vm136_vm0, %v3418_v4  ;;  %v2695_v4 = vld [vmem:[#allocation3 + $0x30] sm:$0xff]  ;;  %1625 = vmatpush.msrb.mxu1 %v1483_v60  ;;  %v1525_v36 = vsel %vm1230_vm7, %v1520_v9, %v1524_v59 }
 0x133   :  { %v3534_v2 = vpop.f32.mrf.mxu1  ;;  %1568 = vmatmul.f32.gmra.mxu0 %v1523_v7  ;;  %v1526_v28 = vrot.slane %v2695_v4, 2 }
 0x134   :  { %4173 = vst [vmem:[#allocation32_spill] sm:$0xff] %v3534_v2  ;;  %2554 = vmatmul.msk.f32.vlgmr.msra.gmra.mxu2 %vm148_vm5, %v1521_v48  ;;  %1626 = vmatpush.msrb.mxu1 %v1481_v37 }
 0x135   :  { %v751_v42 = vpop.f32.mrf.mxu3  ;;  %v1527_v20 = vsel %vm1230_vm7, %v1522_v13, %v1526_v28  ;;  %v1528_v13 = vrot.slane %v3290_v33, 2 }
 0x136   :  { %v3532_v6 = vadd.f32 %v751_v42, %v720_v5  ;;  %v1473_v5 = vld [vmem:[#allocation3 + $0x40] sm:$0xf]  ;;  %1627 = vmatpush.msrb.mxu1 %v1479_v8 }
 0x137   :  { %v3538_v16 = vpop.f32.mrf.mxu2  ;;  %1420 = vmatmul.f32.gmra.mxu1 %v3420_v17  ;;  %v1529_v37 = vsel %vm1230_vm7, %v1524_v59, %v1528_v13 }
 0x138   :  { %4172 = vst [vmem:[#allocation31_spill] sm:$0xff] %v3532_v6  ;;  %v3542_v25 = vpop.f32.mrf.mxu0  ;;  %1628 = vmatpush.msrb.mxu1 %v1477_v61 }
 0x139   :  { %4174 = vst [vmem:[#allocation33_spill] sm:$0xff] %v3538_v16 }
 0x13a   :  { %2550 = vmatmul.msk.f32.gmra.mxu3 %vm136_vm0, %v3439_v58  ;;  %v1530_v58 = vrot.slane %v1473_v5, 2  ;;  %v1474_v5 = vld [vmem:[#allocation3 + $0x48] sm:$0xf] }
 0x13b   :  { %1571 = vmatmul.f32.gmra.mxu0 %v1527_v20  ;;  %v3550_v4 = vpop.f32.mrf.mxu1  ;;  %v1532_v33 = vrot.slane %v1474_v5, 2 }
 0x13c   :  { %2555 = vmatmul.msk.f32.gmra.mxu2 %vm148_vm5, %v1525_v36  ;;  %v1531_v60 = vsel %vm1230_vm7, %v1526_v28, %v1530_v58 }
 0x13d   :  { %v3547_v42 = vpop.f32.mrf.mxu3 }
 0x13f   :  { %v3553_v17 = vpop.f32.mrf.mxu2  ;;  %1629 = vmatmul.f32.vlgmr.msrb.gmra.mxu1 %v3507_v15  ;;  %v1533_v15 = vsel %vm1230_vm7, %v1528_v13, %v1532_v33 }
 0x140   :  { %v3557_v9 = vpop.f32.mrf.mxu0 }
 0x141   :  { %4175 = vst [vmem:[#allocation34_spill] sm:$0xff] %v3557_v9 }
 0x142   :  { %2551 = vmatmul.msk.f32.gmra.mxu3 %vm136_vm0, %v3460_v27 }
 0x143   :  { %1574 = vmatmul.f32.gmra.mxu0 %v1531_v60  ;;  %v3565_v61 = vpop.f32.mrf.mxu1 }
 0x144   :  { %2556 = vmatmul.msk.f32.gmra.mxu2 %vm148_vm5, %v1529_v37 }
 0x145   :  { %v3562_v8 = vpop.f32.mrf.mxu3 }
 0x147   :  { %v3567_v6 = vpop.f32.mrf.mxu2  ;;  %1632 = vmatmul.f32.gmra.mxu1 %v1523_v7 }
 0x148   :  { %4176 = vst [vmem:[#allocation35_spill] sm:$0xff] %v3567_v6  ;;  %v3571_v27 = vpop.f32.mrf.mxu0 }
 0x149   :  { %4177 = vst [vmem:[#allocation36_spill] sm:$0xff] %v3571_v27 }
 0x14a   :  { %2552 = vmatmul.msk.f32.gmra.mxu3 %vm136_vm0, %v3482_v31 }
 0x14b   :  { %1577 = vmatmul.f32.gmra.mxu0 %v1530_v58  ;;  %v3583_v43 = vpop.f32.mrf.mxu1 }
 0x14c   :  { %2557 = vmatmul.msk.f32.gmra.mxu2 %vm148_vm5, %v1533_v15 }
 0x14d   :  { %v3574_v59 = vpop.f32.mrf.mxu3 }
 0x14f   :  { %v3577_v28 = vpop.f32.mrf.mxu2  ;;  %1635 = vmatmul.f32.gmra.mxu1 %v1527_v20 }
 0x150   :  { %4178 = vst [vmem:[#allocation37_spill] sm:$0xff] %v3577_v28  ;;  %v3581_v5 = vpop.f32.mrf.mxu0 }
 0x151   :  { %4179 = vst [vmem:[#allocation38_spill] sm:$0xff] %v3581_v5 }
 0x152   :  { %2553 = vmatmul.msk.f32.gmra.mxu3 %vm136_vm0, %v3470_v45 }
 0x153   :  { %v3595_v27 = vpop.f32.mrf.mxu1 }
 0x154   :  { %2558 = vmatmul.msk.f32.gmra.mxu2 %vm148_vm5, %v1532_v33  ;;  %4183 = vst [vmem:[#allocation42_spill] sm:$0xff] %v3595_v27 }
 0x155   :  { %v3585_v31 = vpop.f32.mrf.mxu3 }
 0x157   :  { %v3588_v7 = vpop.f32.mrf.mxu2  ;;  %1638 = vmatmul.f32.gmra.mxu1 %v1531_v60 }
 0x158   :  { %4180 = vst [vmem:[#allocation39_spill] sm:$0xff] %v3588_v7  ;;  %v3591_v13 = vpop.f32.mrf.mxu0 }
 0x159   :  { %4181 = vst [vmem:[#allocation40_spill] sm:$0xff] %v3591_v13 }
 0x15a   :  { %2559 = vmatmul.msk.f32.vlgmr.msra.gmra.mxu3 %vm148_vm5, %v1521_v48 }
 0x15b   :  { %v3604_v16 = vpop.f32.mrf.mxu1 }
 0x15c   :  { %4186 = vst [vmem:[#allocation45_spill] sm:$0xff] %v3604_v16 }
 0x15d   :  { %v3593_v46 = vpop.f32.mrf.mxu3 }
 0x15e   :  { %4182 = vst [vmem:[#allocation41_spill] sm:$0xff] %v3593_v46 }
 0x15f   :  { %v3597_v45 = vpop.f32.mrf.mxu2  ;;  %1641 = vmatmul.f32.gmra.mxu1 %v1530_v58 }
 0x160   :  { %4184 = vst [vmem:[#allocation43_spill] sm:$0xff] %v3597_v45  ;;  %v3600_v20 = vpop.f32.mrf.mxu0 }
 0x161   :  { %4185 = vst [vmem:[#allocation44_spill] sm:$0xff] %v3600_v20 }
 0x162   :  { %2560 = vmatmul.msk.f32.gmra.mxu3 %vm148_vm5, %v1525_v36 }
 0x165   :  { %v3602_v5 = vpop.f32.mrf.mxu3 }
 0x167   :  { %v3606_v7 = vpop.f32.mrf.mxu2 }
 0x168   :  { %4187 = vst [vmem:[#allocation46_spill] sm:$0xff] %v3606_v7  ;;  %v3609_v48 = vpop.f32.mrf.mxu0  ;;  %v1281_v13 = vpop.f32.mrf.mxu1 }
 0x169   :  { %4188 = vst [vmem:[#allocation47_spill] sm:$0xff] %v3609_v48 }
 0x16a   :  { %2561 = vmatmul.msk.f32.gmra.mxu3 %vm148_vm5, %v1529_v37 }
 0x16d   :  { %v3611_v60 = vpop.f32.mrf.mxu3 }
 0x16f   :  { %v3613_v46 = vpop.f32.mrf.mxu2 }
 0x170   :  { %4189 = vst [vmem:[#allocation48_spill] sm:$0xff] %v3613_v46  ;;  %v3616_v36 = vpop.f32.mrf.mxu0  ;;  %v1284_v45 = vpop.f32.mrf.mxu1 }
 0x171   :  { %4190 = vst [vmem:[#allocation49_spill] sm:$0xff] %v3616_v36 }
 0x172   :  { %2562 = vmatmul.msk.f32.gmra.mxu3 %vm148_vm5, %v1533_v15  ;;  %v472_v15 = vadd.f32 %v3251_v41, %v3295_v14  ;;  %v475_v41 = vadd.f32 %v3268_v51, %v3309_v30 }
 0x175   :  { %v3618_v58 = vpop.f32.mrf.mxu3 }
 0x177   :  { %v3620_v20 = vpop.f32.mrf.mxu2 }
 0x178   :  { %4191 = vst [vmem:[#allocation50_spill] sm:$0xff] %v3620_v20  ;;  %v3623_v7 = vpop.f32.mrf.mxu0  ;;  %v1287_v46 = vpop.f32.mrf.mxu1  ;;  %v644_v20 = vadd.f32 %v3360_v29, %v472_v15 }
 0x179   :  { %4192 = vst [vmem:[#allocation51_spill] sm:$0xff] %v3623_v7 }
 0x17a   :  { %2563 = vmatmul.msk.f32.gmra.mxu3 %vm148_vm5, %v1532_v33  ;;  %v3640_v33 = vld [vmem:[%s4161_s5] sm:$0x7]  ;;  %s2917_s5 = smov [#allocation17]  }
 0x17b   :  { %s2466_s1 = sshll.u32 %s2917_s5, 4  ;;  %s2467_s1 = int_to_ptr.vmem [resolvable:$true] %s2466_s1 }
 0x17d   :  { %v3625_v37 = vpop.f32.mrf.mxu3 }
 0x17e   :  { %4193 = vst [vmem:[#allocation52_spill] sm:$0xff] %v3625_v37 }
 0x17f   :  { %v3627_v48 = vpop.f32.mrf.mxu2 }
 0x180   :  { %4194 = vst [vmem:[#allocation53_spill] sm:$0xff] %v3627_v48  ;;  %v3629_v16 = vpop.f32.mrf.mxu0 }
 0x181   :  { %4195 = vst [vmem:[#allocation54_spill] sm:$0xff] %v3629_v16  ;;  %v676_v16 = vadd.f32 %v3369_v0, %v644_v20 }
 0x184   :  { %v1290_v37 = vpop.f32.mrf.mxu1 }
 0x185   :  { %v3631_v2 = vpop.f32.mrf.mxu3 }
 0x186   :  { %4196 = vst [vmem:[#allocation55_spill] sm:$0xff] %v3631_v2  ;;  %v1689_v2 = vperm.slane %v3640_v33, 0 }
 0x187   :  { %v3635_v36 = vpop.f32.mrf.mxu2 }
 0x188   :  { %4197 = vst [vmem:[#allocation56_spill] sm:$0xff] %v3635_v36  ;;  %v3642_v7 = vpop.f32.mrf.mxu0 }
 0x189   :  { %4198 = vst [vmem:[#allocation57_spill] sm:$0xff] %v3642_v7  ;;  %v647_v7 = vadd.f32 %v3376_v57, %v475_v41 }
 0x18b   :  { %v679_v29 = vadd.f32 %v3389_v52, %v647_v7 }
 0x18c   :  { %v1293_v6 = vpop.f32.mrf.mxu1 }
 0x18d   :  { %v1313_v48 = vpop.f32.mrf.mxu3 }
 0x18e   :  { %v1314_v27 = vadd.f32 %v1313_v48, %v1281_v13  ;;  %v478_v13 = vadd.f32 %v3280_v62, %v3320_v23 }
 0x18f   :  { %v3649_v36 = vpop.f32.mrf.mxu2 }
 0x190   :  { %v1456_v28 = vadd.f32 %v1314_v27, %v676_v16  ;;  %v3651_v9 = vpop.f32.mrf.mxu0  ;;  %v650_v51 = vadd.f32 %v3393_v49, %v478_v13 }
 0x192   :  { %v1695_v14 = vadd.f32 %v1689_v2, %v1456_v28  ;;  %v682_v57 = vadd.f32 %v3406_v53, %v650_v51 }
 0x194   :  { %v1409_v52 = vpop.f32.mrf.mxu1 }
 0x195   :  { %v1316_v21 = vpop.f32.mrf.mxu3 }
 0x196   :  { %v1317_v15 = vadd.f32 %v1316_v21, %v1284_v45  ;;  %v481_v21 = vadd.f32 %v3292_v10, %v3335_v55 }
 0x197   :  { %v3659_v27 = vpop.f32.mrf.mxu2 }
 0x198   :  { %v1459_v0 = vadd.f32 %v1317_v15, %v679_v29  ;;  %v3662_v30 = vpop.f32.mrf.mxu0  ;;  %v653_v23 = vadd.f32 %v3409_v38, %v481_v21 }
 0x19a   :  { %v3657_v16 = vadd.f32 %v1689_v2, %v1459_v0  ;;  %v685_v49 = vadd.f32 %v3428_v54, %v653_v23  ;;  %v952_v54 = vadd.f32 %v3547_v42, %v3443_v3 }
 0x19c   :  { %v1412_v0 = vpop.f32.mrf.mxu1 }
 0x19d   :  { %v1319_v28 = vpop.f32.mrf.mxu3 }
 0x19e   :  { %v1320_v20 = vadd.f32 %v1319_v28, %v1287_v46 }
 0x19f   :  { %v3669_v62 = vpop.f32.mrf.mxu2 }
 0x1a0   :  { %v1462_v48 = vadd.f32 %v1320_v20, %v682_v57  ;;  %v3673_v29 = vpop.f32.mrf.mxu0 }
 0x1a2   :  { %v3667_v7 = vadd.f32 %v1689_v2, %v1462_v48  ;;  %v3687_v48 = vperm.slane %v3640_v33, 2 }
 0x1a4   :  { %v1415_v57 = vpop.f32.mrf.mxu1 }
 0x1a5   :  { %v1322_v45 = vpop.f32.mrf.mxu3 }
 0x1a6   :  { %v1323_v41 = vadd.f32 %v1322_v45, %v1290_v37 }
 0x1a7   :  { %v3677_v46 = vpop.f32.mrf.mxu2 }
 0x1a8   :  { %v1465_v15 = vadd.f32 %v1323_v41, %v685_v49  ;;  %v1566_v51 = vpop.f32.mrf.mxu0  ;;  %v955_v49 = vadd.f32 %v3562_v8, %v3464_v26 }
 0x1aa   :  { %v3675_v53 = vadd.f32 %v1689_v2, %v1465_v15 }
 0x1ad   :  { %v1325_v13 = vpop.f32.mrf.mxu3 }
 0x1ae   :  { %v1326_v10 = vadd.f32 %v1325_v13, %v1293_v6  ;;  %v1060_v6 = vadd.f32 %v3550_v4, %v952_v54 }
 0x1af   :  { %v3682_v38 = vpop.f32.mrf.mxu2 }
 0x1b0   :  { %v1468_v55 = vadd.f32 %v1326_v10, %v3445_v19  ;;  %v603_v19 = vadd.f32 %v3362_v34, %v3315_v39  ;;  %v1569_v45 = vpop.f32.mrf.mxu0  ;;  %v1092_v3 = vadd.f32 %v3602_v5, %v1060_v6  ;;  %v1418_v39 = vpop.f32.mrf.mxu1  ;;  %v1063_v10 = vadd.f32 %v3565_v61, %v955_v49 }
 0x1b1   :  { %v606_v5 = vadd.f32 %v3379_v63, %v3327_v50 }
 0x1b2   :  { %v3680_v28 = vadd.f32 %v1689_v2, %v1468_v55  ;;  %v1095_v26 = vadd.f32 %v3611_v60, %v1063_v10  ;;  %v4204_v10 = vld [vmem:[#allocation42_spill] sm:$0xff] }
 0x1b5   :  { %v1441_v37 = vpop.f32.mrf.mxu3 }
 0x1b6   :  { %v1442_v20 = vadd.f32 %v1441_v37, %v1409_v52  ;;  %v775_v52 = vadd.f32 %v3447_v24, %v603_v19 }
 0x1b7   :  { %v1598_v23 = vpop.f32.mrf.mxu2 }
 0x1b8   :  { %v1458_v21 = vadd.f32 %v1442_v20, %v3466_v44  ;;  %v1599_v42 = vadd.f32 %v1598_v23, %v1566_v51  ;;  %v807_v4 = vadd.f32 %v3484_v40, %v775_v52  ;;  %v778_v40 = vadd.f32 %v3468_v32, %v606_v5  ;;  %v1421_v19 = vpop.f32.mrf.mxu1 }
 0x1b9   :  { %v609_v32 = vadd.f32 %v3396_v18, %v3342_v56  ;;  %v1016_v18 = vadd.f32 %v3553_v17, %v3525_v35  ;;  %v4205_v35 = vld [vmem:[#allocation32_spill] sm:$0xff]  ;;  %v4206_v17 = vld [vmem:[#allocation41_spill] sm:$0xff] }
 0x1ba   :  { %v3694_v2 = vadd.f32 %v3687_v48, %v1458_v21  ;;  %v1677_v41 = vadd.f32 %v1599_v42, %v1092_v3  ;;  %v810_v37 = vadd.f32 %v3500_v11, %v778_v40  ;;  %v4199_v42 = vld [vmem:[#allocation35_spill] sm:$0xff]  ;;  %v964_v5 = vadd.f32 %v4206_v17, %v4205_v35  ;;  %v4219_v17 = vld [vmem:[#allocation54_spill] sm:$0xff] }
 0x1bb   :  { %v1019_v52 = vadd.f32 %v4199_v42, %v3542_v25 }
 0x1bc   :  { %v1710_v13 = vadd.f32 %v1695_v14, %v1677_v41  ;;  %v958_v14 = vadd.f32 %v3574_v59, %v3488_v47 }
 0x1bd   :  { %v1444_v44 = vpop.f32.mrf.mxu3 }
 0x1be   :  { %v1445_v15 = vadd.f32 %v1444_v44, %v1412_v0  ;;  %v2564_v55 = vmul.f32 -1.442695, %v1710_v13  ;;  %v1572_v0 = vpop.f32.mrf.mxu0  ;;  %v1066_v6 = vadd.f32 %v3583_v43, %v958_v14  ;;  %v961_v43 = vadd.f32 %v3585_v31, %v3512_v1  ;;  %v4200_v44 = vld [vmem:[#allocation25_spill] sm:$0xff]  ;;  %v4202_v31 = vld [vmem:[#allocation34_spill] sm:$0xff] }
 0x1bf   :  { %v1601_v24 = vpop.f32.mrf.mxu2 }
 0x1c0   :  { %v1461_v34 = vadd.f32 %v1445_v15, %v807_v4  ;;  %2638 = vpow2.f32 %v2564_v55  ;;  %v1602_v8 = vadd.f32 %v1601_v24, %v1569_v45  ;;  %v1098_v11 = vadd.f32 %v3618_v58, %v1066_v6  ;;  %v4201_v4 = vld [vmem:[#allocation29_spill] sm:$0xff]  ;;  %v1967_v6 = vld [vmem:[#allocation13 + $0x68] sm:$0xff] }
 0x1c1   :  { %v784_v15 = vadd.f32 %v4201_v4, %v4200_v44  ;;  %v1069_v55 = vadd.f32 %v4204_v10, %v961_v43  ;;  %v4217_v44 = vld [vmem:[#allocation47_spill] sm:$0xff]  ;;  %v1965_v10 = vld [vmem:[#allocation13 + $0x58] sm:$0xff] }
 0x1c2   :  { %v3705_v51 = vadd.f32 %v3687_v48, %v1461_v34  ;;  %v1679_v54 = vadd.f32 %v1602_v8, %v1095_v26  ;;  %v4203_v34 = vld [vmem:[#allocation37_spill] sm:$0xff]  ;;  %v4208_v8 = vld [vmem:[#allocation44_spill] sm:$0xff] }
 0x1c3   :  { %v1127_v40 = vadd.f32 %v4208_v8, %v1019_v52 }
 0x1c4   :  { %v1711_v50 = vadd.f32 %v3657_v16, %v1679_v54  ;;  %v781_v16 = vadd.f32 %v3490_v22, %v609_v32  ;;  %v1969_v22 = vld [vmem:[#allocation13 + $0x78] sm:$0xff] }
 0x1c5   :  { %v1447_v61 = vpop.f32.mrf.mxu3  ;;  %2114 = vmatpush.msra.mxu1 %v1969_v22 }
 0x1c6   :  { %v1448_v20 = vadd.f32 %v1447_v61, %v1415_v57  ;;  %v2639_v21 = vpop.eup %2638  ;;  %v2565_v60 = vmul.f32 -1.442695, %v1711_v50  ;;  %v813_v56 = vadd.f32 %v3521_v12, %v781_v16  ;;  %v1575_v49 = vpop.f32.mrf.mxu0  ;;  %v1022_v12 = vadd.f32 %v4203_v34, %v4202_v31  ;;  %v4209_v61 = vld [vmem:[#allocation52_spill] sm:$0xff]  ;;  %v4213_v16 = vld [vmem:[#allocation45_spill] sm:$0xff]  ;;  %v1990_v34 = vld [vmem:[#allocation13 + $0xf8] sm:$0xff] }
 0x1c7   :  { %v3716_v23 = vadd.f32 1.0, %v2639_v21  ;;  %v1604_v59 = vpop.f32.mrf.mxu2  ;;  %v1992_v21 = vld [vmem:[#allocation13 + $0x108] sm:$0xff]  ;;  %v1072_v43 = vadd.f32 %v4213_v16, %v964_v5  ;;  %v1378_v5 = vadd.f32 %v3649_v36, %v4219_v17  ;;  %v4227_v17 = vld [vmem:[#allocation51_spill] sm:$0xff] }
 0x1c8   :  { %v1464_v63 = vadd.f32 %v1448_v20, %v810_v37  ;;  %2640 = vpow2.f32 %v2565_v60  ;;  %v1605_v57 = vadd.f32 %v1604_v59, %v1572_v0  ;;  %v1101_v37 = vadd.f32 %v4209_v61, %v1069_v55  ;;  %v4210_v60 = vld [vmem:[#allocation33_spill] sm:$0xff]  ;;  %v4211_v59 = vld [vmem:[#allocation36_spill] sm:$0xff]  ;;  %2038 = vmatpush.msrb.mxu0 %v1992_v21 }
 0x1c9   :  { %2642 = vrcp.f32 %v3716_v23  ;;  %v816_v32 = vadd.f32 %v4210_v60, %v784_v15  ;;  %v1130_v4 = vadd.f32 %v4217_v44, %v1022_v12  ;;  %v1746_v35 = vand.u32 2147483648, %v3716_v23  ;;  %v4226_v44 = vld [vmem:[#allocation50_spill] sm:$0xff] }
 0x1ca   :  { %v3719_v47 = vadd.f32 %v3687_v48, %v1464_v63  ;;  %v1681_v45 = vadd.f32 %v1605_v57, %v1098_v11  ;;  %v3751_v63 = vpop.f32.mrf.mxu1  ;;  %v4212_v11 = vld [vmem:[#allocation39_spill] sm:$0xff]  ;;  %vm1740_vm9 = vweird.f32 %v3716_v23 }
 0x1cb   :  { %v1025_v57 = vadd.f32 %v4212_v11, %v4211_v59  ;;  %v1988_v59 = vld [vmem:[#allocation13 + $0xe8] sm:$0xff]  ;;  %v1387_v11 = vadd.f32 %v3677_v46, %v3662_v30 }
 0x1cc   :  { %v1712_v41 = vadd.f32 %v3667_v7, %v1681_v45  ;;  %v4207_v7 = vld [vmem:[#allocation40_spill] sm:$0xff]  ;;  %v4214_v45 = vld [vmem:[#allocation38_spill] sm:$0xff] }
 0x1cd   :  { %v1450_v3 = vpop.f32.mrf.mxu3  ;;  %v1124_v26 = vadd.f32 %v4207_v7, %v1016_v18  ;;  %v4220_v7 = vld [vmem:[#allocation49_spill] sm:$0xff] }
 0x1ce   :  { %v1451_v58 = vadd.f32 %v1450_v3, %v1418_v39  ;;  %v2641_v1 = vpop.eup %2640  ;;  %v2566_v25 = vmul.f32 -1.442695, %v1712_v41  ;;  %v1968_v39 = vld [vmem:[#allocation13 + $0x70] sm:$0xff]  ;;  %v4215_v3 = vld [vmem:[#allocation43_spill] sm:$0xff]  ;;  %v4216_v41 = vld [vmem:[#allocation46_spill] sm:$0xff] }
 0x1cf   :  { %v3739_v24 = vpop.eup %2642  ;;  %v3743_v0 = vadd.f32 1.0, %v2641_v1  ;;  %v1607_v54 = vpop.f32.mrf.mxu2  ;;  %2115 = vmatpush.msra.mxu1 %v1968_v39  ;;  %v3763_v22 = vadd.f32 %v4216_v41, %v1124_v26  ;;  %v3780_v26 = vperm.slane %v3640_v33, 1 }
 0x1d0   :  { %v1467_v13 = vadd.f32 %v1451_v58, %v813_v56  ;;  %v1736_v20 = vmul.f32 %v3739_v24, %v3716_v23  ;;  %2644 = vpow2.f32 %v2566_v25  ;;  %v1608_v50 = vadd.f32 %v1607_v54, %v1575_v49  ;;  %v1991_v58 = vld [vmem:[#allocation13 + $0x100] sm:$0xff]  ;;  %v1578_v39 = vpop.f32.mrf.mxu0  ;;  %v1989_v54 = vld [vmem:[#allocation13 + $0xf0] sm:$0xff] }
 0x1d1   :  { %2646 = vrcp.f32 %v3743_v0  ;;  %2116 = vmatpush.msra.mxu1 %v1967_v6  ;;  %v3760_v56 = vadd.f32 %v4215_v3, %v4214_v45  ;;  %v1966_v49 = vld [vmem:[#allocation13 + $0x60] sm:$0xff]  ;;  %2039 = vmatpush.msrb.mxu0 %v1991_v58  ;;  %vm1741_vm8 = vweird.f32 %v3739_v24  ;;  %vm1755_vm13 = vweird.f32 %v3743_v0 }
 0x1d2   :  { %v3746_v14 = vadd.f32 %v3687_v48, %v1467_v13  ;;  %v1737_v18 = vsub.f32 1.0, %v1736_v20  ;;  %v1683_v42 = vadd.f32 %v1608_v50, %v1101_v37  ;;  %v4218_v13 = vld [vmem:[#allocation48_spill] sm:$0xff]  ;;  %v4221_v37 = vld [vmem:[#allocation55_spill] sm:$0xff]  ;;  %vm3796_vm10 = vmor %vm1740_vm9, %vm1741_vm8 }
 0x1d3   :  { %2117 = vmatpush.msra.mxu1 %v1966_v49  ;;  %v3767_v1 = vadd.f32 %v4218_v13, %v1127_v40  ;;  %2040 = vmatpush.msrb.mxu0 %v1990_v34  ;;  %v1964_v40 = vld [vmem:[#allocation13 + $0x50] sm:$0xff]  ;;  %v1104_v20 = vadd.f32 %v4221_v37, %v1072_v43  ;;  %v1962_v58 = vld [vmem:[#allocation13 + $0x40] sm:$0xff]  ;;  %v1761_v13 = vand.u32 2147483648, %v3743_v0  ;;  %v1759_v34 = vand.u32 2147483647, %v3743_v0 }
 0x1d4   :  { %v1713_v31 = vadd.f32 %v3675_v53, %v1683_v42  ;;  %v1738_v55 = vmul.f32 %v3739_v24, %v1737_v18  ;;  %v3777_v53 = vadd.f32 %v4220_v7, %v1025_v57  ;;  %v4224_v57 = vld [vmem:[#allocation26_spill] sm:$0xff]  ;;  %v4225_v43 = vld [vmem:[#allocation57_spill] sm:$0xff]  ;;  %v1987_v49 = vld [vmem:[#allocation13 + $0xe0] sm:$0xff] }
 0x1d5   :  { %v1453_v52 = vpop.f32.mrf.mxu3  ;;  %2118 = vmatpush.msra.mxu1 %v1965_v10  ;;  %2041 = vmatpush.msrb.mxu0 %v1989_v54  ;;  %v1457_v16 = vadd.f32 %v1378_v5, %v4224_v57  ;;  %v1381_v45 = vadd.f32 %v3659_v27, %v4225_v43  ;;  %v3823_v5 = vadd.f32 %v4227_v17, %v3760_v56  ;;  %v1985_v54 = vld [vmem:[#allocation13 + $0xd0] sm:$0xff]  ;;  %vm1760_vm15 = vcmp.eq.f32.partialorder %v1759_v34, 8.507059e+37 }
 0x1d6   :  { %v1454_v15 = vadd.f32 %v1453_v52, %v1421_v19  ;;  %v1744_v19 = vand.u32 2147483647, %v3716_v23  ;;  %v2645_v12 = vpop.eup %2644  ;;  %v2567_v8 = vmul.f32 -1.442695, %v1713_v31  ;;  %v1739_v36 = vadd.f32 %v3739_v24, %v1738_v55  ;;  %v1633_v52 = vpop.f32.mrf.mxu1  ;;  %v3819_v55 = vld [vmem:[#allocation3] sm:$0xfe] }
 0x1d7   :  { %v3783_v61 = vpop.eup %2646  ;;  %v3786_v50 = vadd.f32 1.0, %v2645_v12  ;;  %v1610_v6 = vpop.f32.mrf.mxu2  ;;  %2119 = vmatpush.msra.mxu1 %v1964_v40  ;;  %2042 = vmatpush.msrb.mxu0 %v1988_v59  ;;  %v4228_v12 = vld [vmem:[#allocation27_spill] sm:$0xff]  ;;  %v1960_v40 = vld [vmem:[#allocation13 + $0x30] sm:$0xff]  ;;  %v1384_v59 = vadd.f32 %v3669_v62, %v3651_v9 }
 0x1d8   :  { %v1470_v25 = vadd.f32 %v1454_v15, %v816_v32  ;;  %v1751_v33 = vmul.f32 %v3783_v61, %v3743_v0  ;;  %2648 = vpow2.f32 %v2567_v8  ;;  %v1611_v60 = vadd.f32 %v1610_v6, %v1578_v39  ;;  %v1963_v32 = vld [vmem:[#allocation13 + $0x48] sm:$0xff]  ;;  %v4231_v9 = vld [vmem:[#allocation53_spill] sm:$0xff] }
 0x1d9   :  { %2650 = vrcp.f32 %v3786_v50  ;;  %2120 = vmatpush.msra.mxu1 %v1963_v32  ;;  %v1743_v23 = vsel %vm3796_vm10, %v3739_v24, %v1739_v36  ;;  %vm1745_vm11 = vcmp.eq.f32.partialorder %v1744_v19, 8.507059e+37  ;;  %v3810_v15 = vadd.f32 %v4226_v44, %v1130_v4  ;;  %2043 = vmatpush.msrb.mxu0 %v1987_v49  ;;  %v1961_v4 = vld [vmem:[#allocation13 + $0x38] sm:$0xff]  ;;  %v1984_v32 = vld [vmem:[#allocation13 + $0xc8] sm:$0xff]  ;;  %v1956_v17 = vld [vmem:[#allocation13 + $0x10] sm:$0xff] }
 0x1da   :  { %v3789_v21 = vadd.f32 %v3687_v48, %v1470_v25  ;;  %v1747_v48 = vor.u32 1.1754944e-38, %v1746_v35  ;;  %v1752_v3 = vsub.f32 1.0, %v1751_v33  ;;  %v1685_v18 = vadd.f32 %v1611_v60, %v1104_v20  ;;  %v1986_v35 = vld [vmem:[#allocation13 + $0xd8] sm:$0xff]  ;;  %v1959_v60 = vld [vmem:[#allocation13 + $0x28] sm:$0xff] }
 0x1db   :  { %2121 = vmatpush.msra.mxu1 %v1962_v58  ;;  %vm1756_vm12 = vweird.f32 %v3783_v61  ;;  %2044 = vmatpush.msrb.mxu0 %v1986_v35  ;;  %v1460_v7 = vadd.f32 %v1381_v45, %v4228_v12  ;;  %v1762_v36 = vor.u32 1.1754944e-38, %v1761_v13  ;;  %v1958_v45 = vld [vmem:[#allocation13 + $0x20] sm:$0xff]  ;;  %v3863_v62 = vadd.f32 %v4231_v9, %v3777_v53  ;;  %v1957_v58 = vld [vmem:[#allocation13 + $0x18] sm:$0xff]  ;;  %v4232_v53 = vld [vmem:[#allocation28_spill] sm:$0xff] }
 0x1dc   :  { %v3807_v41 = vsel %vm1745_vm11, %v1747_v48, %v1743_v23  ;;  %v1753_v27 = vmul.f32 %v3783_v61, %v1752_v3  ;;  %v1714_v10 = vadd.f32 %v3680_v28, %v1685_v18  ;;  %vm3836_vm14 = vmor %vm1755_vm13, %vm1756_vm12  ;;  %v1983_v3 = vld [vmem:[#allocation13 + $0xc0] sm:$0xff]  ;;  %v1776_v46 = vand.u32 2147483648, %v3786_v50  ;;  %v1982_v49 = vld [vmem:[#allocation13 + $0xb8] sm:$0xff] }
 0x1dd   :  { %v1662_v42 = vpop.f32.mrf.mxu3  ;;  %v2322_v24 = vsub.f32 1.0, %v3807_v41  ;;  %2122 = vmatpush.msra.mxu1 %v1961_v4  ;;  %2045 = vmatpush.msrb.mxu0 %v1985_v54  ;;  %v1699_v30 = vadd.f32 %v3780_v26, %v1460_v7  ;;  %v1463_v13 = vadd.f32 %v1384_v59, %v4232_v53  ;;  %v1774_v34 = vand.u32 2147483647, %v3786_v50  ;;  %v4234_v4 = vld [vmem:[#allocation31_spill] sm:$0xff] }
 0x1de   :  { %v1663_v31 = vadd.f32 %v1662_v42, %v3751_v63  ;;  %v1696_v63 = vadd.f32 %v3780_v26, %v1457_v16  ;;  %v2649_v19 = vpop.eup %2648  ;;  %v1754_v28 = vadd.f32 %v3783_v61, %v1753_v27  ;;  %v2568_v8 = vmul.f32 -1.442695, %v1714_v10  ;;  %v1636_v42 = vpop.f32.mrf.mxu1  ;;  %v1994_v27 = vld [vmem:[#allocation13 + $0x118] sm:$0xff] }
 0x1df   :  { %v3827_v39 = vrot.slane %v2322_v24, 7  ;;  %v3832_v56 = vpop.eup %2650  ;;  %v3840_v37 = vadd.f32 1.0, %v2649_v19  ;;  %2123 = vmatpush.msra.mxu1 %v1960_v40  ;;  %2046 = vmatpush.msrb.mxu0 %v1984_v32  ;;  %vm1770_vm1 = vweird.f32 %v3786_v50  ;;  %v1777_v54 = vor.u32 1.1754944e-38, %v1776_v46  ;;  %v4237_v46 = vld [vmem:[#allocation56_spill] sm:$0xff] }
 0x1e0   :  { %v1678_v25 = vadd.f32 %v1663_v31, %v3763_v22  ;;  %v1758_v6 = vsel %vm3836_vm14, %v3783_v61, %v1754_v28  ;;  %v1766_v33 = vmul.f32 %v3832_v56, %v3786_v50  ;;  %2652 = vpow2.f32 %v2568_v8  ;;  %v4233_v31 = vld [vmem:[#allocation30_spill] sm:$0xff]  ;;  %2084 = vmatpush.msrb.mxu2 %v1994_v27  ;;  %v1973_v8 = vld [vmem:[#allocation4 + $0x8] sm:$0xfe] }
 0x1e1   :  { %v3844_v0 = vmul.f32 %v3827_v39, %v3819_v55  ;;  %v3855_v48 = vsel %vm1760_vm15, %v1762_v36, %v1758_v6  ;;  %2654 = vrcp.f32 %v3840_v37  ;;  %2124 = vmatpush.msra.mxu1 %v1959_v60  ;;  %v1390_v61 = vadd.f32 %v3682_v38, %v3673_v29  ;;  %2047 = vmatpush.msrb.mxu0 %v1983_v3  ;;  %v3869_v38 = vld [vmem:[#allocation3 + $0x10] sm:$0xff]  ;;  %v1993_v36 = vld [vmem:[#allocation13 + $0x110] sm:$0xff] }
 0x1e2   :  { %v1810_v20 = vadd.f32 %v1696_v63, %v1678_v25  ;;  %v2323_v57 = vsub.f32 1.0, %v3855_v48  ;;  %v1767_v16 = vsub.f32 1.0, %v1766_v33  ;;  %vm1771_vm0 = vweird.f32 %v3832_v56  ;;  %v1981_v63 = vld [vmem:[#allocation13 + $0xb0] sm:$0xff]  ;;  %v3883_v25 = vld [vmem:[#allocation4 + $0x18] sm:$0xff]  ;;  %v1980_v6 = vld [vmem:[#allocation13 + $0xa8] sm:$0xff]  ;;  %2085 = vmatpush.msrb.mxu2 %v1993_v36 }
 0x1e3   :  { %2125 = vmatpush.msra.mxu1 %v1958_v45  ;;  %v3875_v24 = vadd.f32 %v1387_v11, %v4233_v31  ;;  %2048 = vmatpush.msrb.mxu0 %v1982_v49  ;;  %v3880_v35 = vadd.f32 %v1390_v61, %v4234_v4  ;;  %vm3893_vm4 = vmor %vm1770_vm1, %vm1771_vm0  ;;  %v2009_v40 = vrot.slane %v3883_v25, 1  ;;  %v2008_v33 = vrot.slane %v1973_v8, 1  ;;  %v1971_v45 = vld [vmem:[#allocation13 + $0x88] sm:$0xff]  ;;  %v1970_v49 = vld [vmem:[#allocation13 + $0x80] sm:$0xff] }
 0x1e4   :  { %v2569_v23 = vmul.f32 -1.442695, %v1810_v20  ;;  %v1768_v29 = vmul.f32 %v3832_v56, %v1767_v16  ;;  %v3871_v44 = vrot.slane %v2323_v57, 7  ;;  %v1955_v20 = vld [vmem:[#allocation13 + $0x8] sm:$0xff]  ;;  %v2356_v59 = vrot.slane %v3844_v0, 1  ;;  %v1954_v16 = vld [vmem:[#allocation13] sm:$0xff]  ;;  %2160 = vmatpush.msrb.mxu3 %v1971_v45 }
 0x1e5   :  { %v1665_v43 = vpop.f32.mrf.mxu3  ;;  %2126 = vmatpush.msra.mxu1 %v1957_v58  ;;  %2049 = vmatpush.msrb.mxu0 %v1981_v63  ;;  %vm1775_vm6 = vcmp.eq.f32.partialorder %v1774_v34, 8.507059e+37  ;;  %v1791_v9 = vand.u32 2147483648, %v3840_v37  ;;  %v1978_v58 = vld [vmem:[#allocation13 + $0x98] sm:$0xff]  ;;  %v1702_v31 = vadd.f32 %v3780_v26, %v1463_v13  ;;  %v1705_v27 = vadd.f32 %v3780_v26, %v3875_v24  ;;  %v3940_v63 = vld [vmem:[#allocation4 + $0x28] sm:$0xff] }
 0x1e6   :  { %v1666_v18 = vadd.f32 %v1665_v43, %v1633_v52  ;;  %2656 = vpow2.f32 %v2569_v23  ;;  %v2653_v10 = vpop.eup %2652  ;;  %v1769_v19 = vadd.f32 %v3832_v56, %v1768_v29  ;;  %v1979_v23 = vld [vmem:[#allocation13 + $0xa0] sm:$0xff]  ;;  %v2010_v43 = vsel %vm388_vm2, %v2008_v33, %v2009_v40  ;;  %v1639_v4 = vpop.f32.mrf.mxu1  ;;  %2161 = vmatpush.msrb.mxu3 %v1970_v49 }
 0x1e7   :  { %v3889_v12 = vpop.eup %2654  ;;  %v3897_v50 = vadd.f32 1.0, %v2653_v10  ;;  %2127 = vmatpush.msra.mxu1 %v1956_v17  ;;  %2050 = vmatpush.msrb.mxu0 %v1980_v6  ;;  %v3938_v10 = vld [vmem:[#allocation3 + $0x20] sm:$0xff]  ;;  %v1977_v17 = vld [vmem:[#allocation13 + $0x90] sm:$0xff]  ;;  %v3947_v7 = vadd.f32 %v3780_v26, %v3880_v35  ;;  %vm1785_vm9 = vweird.f32 %v3840_v37  ;;  %v2013_v24 = vrot.slane %v3940_v63, 1 }
 0x1e8   :  { %v1680_v52 = vadd.f32 %v1666_v18, %v3767_v1  ;;  %v2334_v1 = vsel %vm171_vm3, %v3827_v39, %v3871_v44  ;;  %v1781_v22 = vmul.f32 %v3889_v12, %v3840_v37  ;;  %v1773_v60 = vsel %vm3893_vm4, %v3832_v56, %v1769_v19  ;;  %2574 = vmatmul.msk.f32.vlgmr.msrb.gmra.mxu2 %vm148_vm5, %v2010_v43 }
 0x1e9   :  { %v3901_v39 = vmul.f32 %v2334_v1, %v3869_v38  ;;  %2658 = vrcp.f32 %v3897_v50  ;;  %2128 = vmatpush.msra.mxu1 %v1955_v20  ;;  %v3914_v3 = vsel %vm1775_vm6, %v1777_v54, %v1773_v60  ;;  %v3922_v18 = vadd.f32 %v4237_v46, %v3823_v5  ;;  %2051 = vmatpush.msrb.mxu0 %v1979_v23  ;;  %v1945_v5 = vld [vmem:[#allocation4 + $0x8] sm:$0xff]  ;;  %v3989_v46 = vld [vmem:[#allocation4 + $0x38] sm:$0xff] }
 0x1ea   :  { %v1811_v28 = vadd.f32 %v1699_v30, %v1680_v52  ;;  %v1782_v61 = vsub.f32 1.0, %v1781_v22  ;;  %vm1786_vm8 = vweird.f32 %v3889_v12  ;;  %v1789_v52 = vand.u32 2147483647, %v3840_v37  ;;  %2579 = vmatmul.msk.f32.vlgmr.msrb.gmra.mxu3 %vm148_vm5, %v1945_v5 }
 0x1eb   :  { %v2357_v56 = vrot.slane %v3901_v39, 1  ;;  %2129 = vmatpush.msra.mxu1 %v1954_v16  ;;  %2052 = vmatpush.msrb.mxu0 %v1978_v58  ;;  %vm3954_vm10 = vmor %vm1785_vm9, %vm1786_vm8  ;;  %v1806_v54 = vand.u32 2147483648, %v3897_v50  ;;  %v2014_v22 = vsel %vm388_vm2, %v2009_v40, %v2013_v24  ;;  %vm1800_vm12 = vweird.f32 %v3897_v50 }
 0x1ec   :  { %v2570_v32 = vmul.f32 -1.442695, %v1811_v28  ;;  %v2657_v11 = vpop.eup %2656  ;;  %v1783_v29 = vmul.f32 %v3889_v12, %v1782_v61  ;;  %vm1790_vm11 = vcmp.eq.f32.partialorder %v1789_v52, 8.507059e+37  ;;  %v1804_v43 = vand.u32 2147483647, %v3897_v50 }
 0x1ed   :  { %v1668_v57 = vpop.f32.mrf.mxu3  ;;  %v3917_v30 = vadd.f32 1.0, %v2657_v11  ;;  %v3928_v53 = vsel %vm388_vm2, %v2356_v59, %v2357_v56  ;;  %2053 = vmatpush.msrb.mxu0 %v1977_v17 }
 0x1ee   :  { %2660 = vpow2.f32 %v2570_v32  ;;  %v1669_v0 = vadd.f32 %v1668_v57, %v1636_v42  ;;  %v2324_v42 = vsub.f32 1.0, %v3914_v3  ;;  %v1784_v1 = vadd.f32 %v3889_v12, %v1783_v29  ;;  %v1642_v5 = vpop.f32.mrf.mxu1 }
 0x1ef   :  { %2662 = vrcp.f32 %v3917_v30  ;;  %v3943_v19 = vpop.eup %2658  ;;  %v1807_v57 = vor.u32 1.1754944e-38, %v1806_v54  ;;  %v1844_v23 = vand.u32 2147483647, %v3917_v30  ;;  %vm1840_vm14 = vweird.f32 %v3917_v30 }
 0x1f0   :  { %v1682_v34 = vadd.f32 %v1669_v0, %v3810_v15  ;;  %v2335_v13 = vrot.slane %v2324_v42, 7  ;;  %v1792_v15 = vor.u32 1.1754944e-38, %v1791_v9  ;;  %v1796_v8 = vmul.f32 %v3943_v19, %v3897_v50  ;;  %2575 = vmatmul.msk.f32.gmra.mxu2 %vm148_vm5, %v2014_v22  ;;  %v3987_v0 = vld [vmem:[#allocation3 + $0x30] sm:$0xff] }
 0x1f1   :  { %v1788_v20 = vsel %vm3954_vm10, %v3889_v12, %v1784_v1  ;;  %vm1801_vm13 = vweird.f32 %v3943_v19  ;;  %v1846_v49 = vand.u32 2147483648, %v3917_v30  ;;  %v2017_v42 = vrot.slane %v3989_v46, 1 }
 0x1f2   :  { %v1812_v26 = vadd.f32 %v1702_v31, %v1682_v34  ;;  %v2336_v37 = vsel %vm171_vm3, %v3871_v44, %v2335_v13  ;;  %v1797_v6 = vsub.f32 1.0, %v1796_v8  ;;  %v3974_v59 = vsel %vm1790_vm11, %v1792_v15, %v1788_v20  ;;  %2580 = vmatmul.msk.f32.gmra.mxu3 %vm148_vm5, %v3883_v25  ;;  %vm4006_vm15 = vmor %vm1800_vm12, %vm1801_vm13 }
 0x1f3   :  { %v3967_v36 = vmul.f32 %v2336_v37, %v3938_v10  ;;  %v2325_v61 = vsub.f32 1.0, %v3974_v59  ;;  %v2018_v34 = vsel %vm388_vm2, %v2013_v24, %v2017_v42  ;;  %vm1805_vm1 = vcmp.eq.f32.partialorder %v1804_v43, 8.507059e+37 }
 0x1f4   :  { %v2661_v35 = vpop.eup %2660  ;;  %v2571_v60 = vmul.f32 -1.442695, %v1812_v26  ;;  %v1798_v12 = vmul.f32 %v3943_v19, %v1797_v6  ;;  %vm1845_vm4 = vcmp.eq.f32.partialorder %v1844_v23, 8.507059e+37  ;;  %v1847_v24 = vor.u32 1.1754944e-38, %v1846_v49  ;;  %v2197_v49 = vld [vmem:[#allocation13 + $0x190] sm:$0xff] }
 0x1f5   :  { %v3972_v33 = vadd.f32 1.0, %v2661_v35  ;;  %v1671_v32 = vpop.f32.mrf.mxu3  ;;  %v2663_v44 = vpop.eup %2662  ;;  %v2359_v40 = vrot.slane %v3967_v36, 1  ;;  %v2337_v58 = vrot.slane %v2325_v61, 7  ;;  %v4039_v61 = vld [vmem:[#allocation3 + $0x40] sm:$0x7] }
 0x1f6   :  { %v1672_v11 = vadd.f32 %v1671_v32, %v1639_v4  ;;  %v1836_v16 = vmul.f32 %v2663_v44, %v3917_v30  ;;  %vm1841_vm0 = vweird.f32 %v2663_v44 }
 0x1f7   :  { %2664 = vrcp.f32 %v3972_v33  ;;  %v3994_v29 = vsel %vm388_vm2, %v2357_v56, %v2359_v40  ;;  %v2338_v52 = vsel %vm171_vm3, %v2335_v13, %v2337_v58  ;;  %vm1842_vm6 = vmor %vm1840_vm14, %vm1841_vm0  ;;  %vm1855_vm9 = vweird.f32 %v3972_v33 }
 0x1f8   :  { %2666 = vpow2.f32 %v2571_v60  ;;  %v1837_v45 = vsub.f32 1.0, %v1836_v16  ;;  %v1684_v9 = vadd.f32 %v1672_v11, %v3863_v62  ;;  %v1799_v62 = vadd.f32 %v3943_v19, %v1798_v12  ;;  %2576 = vmatmul.msk.f32.gmra.mxu2 %vm148_vm5, %v2018_v34  ;;  %v2198_v12 = vld [vmem:[#allocation13 + $0x198] sm:$0xff] }
 0x1f9   :  { %v4015_v4 = vmul.f32 %v2338_v52, %v3987_v0  ;;  %v1861_v60 = vand.u32 2147483648, %v3972_v33  ;;  %2238 = vmatpush.msra.mxu0 %v2198_v12  ;;  %v1975_v52 = vld [vmem:[#allocation4 + $0x48] sm:$0x7] }
 0x1fa   :  { %v1838_v56 = vmul.f32 %v2663_v44, %v1837_v45  ;;  %v1813_v31 = vadd.f32 %v1705_v27, %v1684_v9  ;;  %v1803_v50 = vsel %vm4006_vm15, %v3943_v19, %v1799_v62  ;;  %2581 = vmatmul.msk.f32.gmra.mxu3 %vm148_vm5, %v3940_v63  ;;  %v2200_v9 = vld [vmem:[#allocation13 + $0x1a8] sm:$0xff] }
 0x1fb   :  { %v4020_v28 = vsel %vm1805_vm1, %v1807_v57, %v1803_v50  ;;  %v2361_v19 = vrot.slane %v4015_v4, 1  ;;  %v1862_v45 = vor.u32 1.1754944e-38, %v1861_v60  ;;  %v2196_v62 = vld [vmem:[#allocation13 + $0x188] sm:$0xff]  ;;  %2284 = vmatpush.msra.mxu2 %v2200_v9  ;;  %2239 = vmatpush.msra.mxu0 %v2197_v49 }
 0x1fc   :  { %v1839_v1 = vadd.f32 %v2663_v44, %v1838_v56  ;;  %v2572_v15 = vmul.f32 -1.442695, %v1813_v31  ;;  %v2326_v35 = vsub.f32 1.0, %v4020_v28  ;;  %v2195_v31 = vld [vmem:[#allocation13 + $0x180] sm:$0xff] }
 0x1fd   :  { %v2665_v17 = vpop.eup %2664  ;;  %v1674_v27 = vpop.f32.mrf.mxu3  ;;  %v4033_v30 = vsel %vm388_vm2, %v2359_v40, %v2361_v19  ;;  %2240 = vmatpush.msra.mxu0 %v2196_v62  ;;  %v2189_v62 = vld [vmem:[#allocation13 + $0x150] sm:$0xff] }
 0x1fe   :  { %v2667_v13 = vpop.eup %2666  ;;  %v1851_v8 = vmul.f32 %v2665_v17, %v3972_v33  ;;  %v1675_v54 = vadd.f32 %v1674_v27, %v1642_v5  ;;  %v1843_v26 = vsel %vm1842_vm6, %v2663_v44, %v1839_v1  ;;  %2668 = vpow2.f32 %v2572_v15  ;;  %v2199_v5 = vld [vmem:[#allocation13 + $0x1a0] sm:$0xff] }
 0x1ff   :  { %v4028_v37 = vadd.f32 1.0, %v2667_v13  ;;  %v1848_v22 = vsel %vm1845_vm4, %v1847_v24, %v1843_v26  ;;  %vm1856_vm8 = vweird.f32 %v2665_v17  ;;  %v1859_v44 = vand.u32 2147483647, %v3972_v33  ;;  %2285 = vmatpush.msra.mxu2 %v2199_v5  ;;  %2241 = vmatpush.msra.mxu0 %v2195_v31  ;;  %v2188_v5 = vld [vmem:[#allocation13 + $0x148] sm:$0xff] }
 0x200   :  { %v1852_v36 = vsub.f32 1.0, %v1851_v8  ;;  %v1686_v20 = vadd.f32 %v1675_v54, %v3922_v18  ;;  %v1920_v6 = vrot.slane %v1848_v22, 7  ;;  %v2339_v18 = vrot.slane %v2326_v35, 7  ;;  %vm4045_vm10 = vmor %vm1855_vm9, %vm1856_vm8  ;;  %v2193_v54 = vld [vmem:[#allocation13 + $0x170] sm:$0xff] }
 0x201   :  { %2670 = vrcp.f32 %v4028_v37  ;;  %vm1860_vm11 = vcmp.eq.f32.partialorder %v1859_v44, 8.507059e+37  ;;  %v2021_v1 = vrot.slane %v1975_v52, 1  ;;  %v1876_v8 = vand.u32 2147483648, %v4028_v37 }
 0x202   :  { %v1853_v32 = vmul.f32 %v2665_v17, %v1852_v36  ;;  %v1814_v11 = vadd.f32 %v3947_v7, %v1686_v20  ;;  %v1934_v40 = vmul.f32 %v1920_v6, %v3819_v55  ;;  %v2340_v7 = vsel %vm171_vm3, %v2337_v58, %v2339_v18  ;;  %2582 = vmatmul.msk.f32.gmra.mxu3 %vm148_vm5, %v3989_v46 }
 0x203   :  { %v4051_v55 = vmul.f32 %v2340_v7, %v4039_v61  ;;  %v2022_v26 = vsel %vm388_vm2, %v2017_v42, %v2021_v1  ;;  %v1874_v36 = vand.u32 2147483647, %v4028_v37  ;;  %vm1870_vm13 = vweird.f32 %v4028_v37  ;;  %v2190_v7 = vld [vmem:[#allocation13 + $0x158] sm:$0xff] }
 0x204   :  { %v1854_v57 = vadd.f32 %v2665_v17, %v1853_v32  ;;  %v2573_v23 = vmul.f32 -1.442695, %v1814_v11  ;;  %v2669_v43 = vpop.eup %2668  ;;  %1939 = vst [vmem:[#allocation4] sm:$0xfe] %v1934_v40  ;;  %2577 = vmatmul.msk.f32.gmra.mxu2 %vm148_vm5, %v2022_v26  ;;  %v2192_v32 = vld [vmem:[#allocation13 + $0x168] sm:$0xff]  ;;  %v1877_v42 = vor.u32 1.1754944e-38, %v1876_v8 }
 0x205   :  { %v4055_v39 = vadd.f32 1.0, %v2669_v43  ;;  %v2363_v34 = vrot.slane %v4051_v55, 1  ;;  %v2191_v40 = vld [vmem:[#allocation13 + $0x160] sm:$0xff]  ;;  %vm1875_vm15 = vcmp.eq.f32.partialorder %v1874_v36, 8.507059e+37  ;;  %v1953_v43 = vld [vmem:[#allocation4 + $0x48] sm:$0x3] }
 0x206   :  { %v1858_v33 = vsel %vm4045_vm10, %v2665_v17, %v1854_v57  ;;  %2672 = vpow2.f32 %v2573_v23  ;;  %v2194_v17 = vld [vmem:[#allocation13 + $0x178] sm:$0xff]  ;;  %v2209_v26 = vrot.slane %v3883_v25, 2 }
 0x207   :  { %v2671_v56 = vpop.eup %2670  ;;  %v1863_v58 = vsel %vm1860_vm11, %v1862_v45, %v1858_v33  ;;  %2674 = vrcp.f32 %v4055_v39  ;;  %v4066_v13 = vsel %vm388_vm2, %v2361_v19, %v2363_v34  ;;  %2242 = vmatpush.msra.mxu0 %v2194_v17  ;;  %v1889_v45 = vand.u32 2147483647, %v4055_v39  ;;  %v2696_v55 = vld [vmem:[#allocation5] sm:$0xff] }
 0x208   :  { %v1921_v4 = vrot.slane %v1863_v58, 7  ;;  %v1866_v50 = vmul.f32 %v2671_v56, %v4028_v37  ;;  %vm1871_vm12 = vweird.f32 %v2671_v56  ;;  %v1891_v9 = vand.u32 2147483648, %v4055_v39 }
 0x209   :  { %2243 = vmatpush.msra.mxu0 %v2193_v54  ;;  %vm1872_vm14 = vmor %vm1870_vm13, %vm1871_vm12  ;;  %vm1885_vm1 = vweird.f32 %v4055_v39  ;;  %vm1890_vm6 = vcmp.eq.f32.partialorder %v1889_v45, 8.507059e+37  ;;  %v2179_v54 = vld [vmem:[#allocation4 + $0x8] sm:$0xfc] }
 0x20a   :  { %v1922_v15 = vsel %vm171_vm3, %v1920_v6, %v1921_v4  ;;  %v1867_v27 = vsub.f32 1.0, %v1866_v50  ;;  %2583 = vmatmul.msk.f32.gmra.mxu3 %vm148_vm5, %v1953_v43  ;;  %v1892_v52 = vor.u32 1.1754944e-38, %v1891_v9  ;;  %v2208_v36 = vrot.slane %v2179_v54, 2  ;;  %v2183_v43 = vld [vmem:[#allocation13 + $0x120] sm:$0xff]  ;;  %v2388_v54 = vld [vmem:[#allocation14 + $0x68] sm:$0xff] }
 0x20b   :  { %v4069_v24 = vmul.f32 %v1922_v15, %v3869_v38  ;;  %v1944_v20 = vld [vmem:[#allocation4] sm:$0xff]  ;;  %2244 = vmatpush.msra.mxu0 %v2192_v32  ;;  %v2186_v32 = vld [vmem:[#allocation13 + $0x138] sm:$0xff] }
 0x20c   :  { %v2673_v35 = vpop.eup %2672  ;;  %v1868_v22 = vmul.f32 %v2671_v56, %v1867_v27  ;;  %v1972_v6 = vld [vmem:[#allocation4] sm:$0xfe]  ;;  %2130 = vmatmul.f32.vlgmr.msra.gmra.mxu1 %v1944_v20  ;;  %2578 = vmatmul.msk.f32.gmra.mxu2 %vm148_vm5, %v2021_v1 }
 0x20d   :  { %v4077_v19 = vadd.f32 1.0, %v2673_v35  ;;  %v2006_v38 = vrot.slane %v4069_v24, 1  ;;  %v2005_v60 = vrot.slane %v1972_v6, 1  ;;  %v2675_v44 = vpop.eup %2674  ;;  %2245 = vmatpush.msra.mxu0 %v2191_v40 }
 0x20e   :  { %v1869_v11 = vadd.f32 %v2671_v56, %v1868_v22  ;;  %v1881_v18 = vmul.f32 %v2675_v44, %v4055_v39  ;;  %vm1886_vm0 = vweird.f32 %v2675_v44  ;;  %v2187_v39 = vld [vmem:[#allocation13 + $0x140] sm:$0xff] }
 0x20f   :  { %2676 = vrcp.f32 %v4077_v19  ;;  %v2007_v57 = vsel %vm388_vm2, %v2005_v60, %v2006_v38  ;;  %2246 = vmatpush.msra.mxu0 %v2190_v7  ;;  %vm1887_vm4 = vmor %vm1885_vm1, %vm1886_vm0  ;;  %v1904_v60 = vand.u32 2147483647, %v4077_v19  ;;  %vm1900_vm9 = vweird.f32 %v4077_v19 }
 0x210   :  { %v1873_v12 = vsel %vm1872_vm14, %v2671_v56, %v1869_v11  ;;  %v1882_v23 = vsub.f32 1.0, %v1881_v18  ;;  %2054 = vmatmul.f32.vlgmr.msrb.gmra.mxu0 %v2007_v57  ;;  %v2210_v11 = vsel %vm1230_vm7, %v2208_v36, %v2209_v26  ;;  %v2384_v36 = vld [vmem:[#allocation14 + $0x48] sm:$0xff] }
 0x211   :  { %v1878_v16 = vsel %vm1875_vm15, %v1877_v42, %v1873_v12  ;;  %2247 = vmatpush.msra.mxu0 %v2189_v62  ;;  %vm1905_vm11 = vcmp.eq.f32.partialorder %v1904_v60, 8.507059e+37  ;;  %v2217_v62 = vrot.slane %v3989_v46, 2  ;;  %v2382_v60 = vld [vmem:[#allocation14 + $0x38] sm:$0xff] }
 0x212   :  { %v1923_v37 = vrot.slane %v1878_v16, 7  ;;  %v1883_v49 = vmul.f32 %v2675_v44, %v1882_v23  ;;  %v2184_v16 = vld [vmem:[#allocation13 + $0x128] sm:$0xff] }
 0x213   :  { %2248 = vmatpush.msra.mxu0 %v2188_v5  ;;  %v2181_v5 = vld [vmem:[#allocation4 + $0x48] sm:$0xf] }
 0x214   :  { %v1924_v33 = vsel %vm171_vm3, %v1921_v4, %v1923_v37  ;;  %v1884_v31 = vadd.f32 %v2675_v44, %v1883_v49  ;;  %2133 = vmatmul.f32.gmra.mxu1 %v4069_v24  ;;  %v2206_v4 = vrot.slane %v4069_v24, 2  ;;  %2584 = vmatmul.msk.f32.vlgmr.msra.gmra.mxu2 %vm148_vm5, %v2210_v11  ;;  %v2387_v24 = vld [vmem:[#allocation14 + $0x60] sm:$0xff] }
 0x215   :  { %v2677_v56 = vpop.eup %2676  ;;  %v1936_v58 = vmul.f32 %v1924_v33, %v3938_v10  ;;  %v1906_v10 = vand.u32 2147483648, %v4077_v19  ;;  %2249 = vmatpush.msra.mxu0 %v2187_v39  ;;  %v2389_v39 = vld [vmem:[#allocation14 + $0x70] sm:$0xff] }
 0x216   :  { %v1896_v50 = vmul.f32 %v2677_v56, %v4077_v19  ;;  %v1888_v17 = vsel %vm1887_vm4, %v2675_v44, %v1884_v31  ;;  %vm1901_vm8 = vweird.f32 %v2677_v56  ;;  %v2213_v19 = vrot.slane %v3940_v63, 2 }
 0x217   :  { %v2011_v15 = vrot.slane %v1936_v58, 1  ;;  %v2211_v1 = vrot.slane %v1936_v58, 2  ;;  %v1893_v27 = vsel %vm1890_vm6, %v1892_v52, %v1888_v17  ;;  %vm1902_vm10 = vmor %vm1900_vm9, %vm1901_vm8  ;;  %v1907_v18 = vor.u32 1.1754944e-38, %v1906_v10  ;;  %2250 = vmatpush.msra.mxu0 %v2186_v32 }
 0x218   :  { %v1897_v8 = vsub.f32 1.0, %v1896_v50  ;;  %v1925_v35 = vrot.slane %v1893_v27, 7  ;;  %v2214_v9 = vsel %vm1230_vm7, %v2209_v26, %v2213_v19  ;;  %v2218_v33 = vsel %vm1230_vm7, %v2213_v19, %v2217_v62  ;;  %v2178_v50 = vld [vmem:[#allocation4] sm:$0xfc] }
 0x219   :  { %v2012_v22 = vsel %vm388_vm2, %v2006_v38, %v2011_v15  ;;  %v2212_v20 = vsel %vm1230_vm7, %v2206_v4, %v2211_v1  ;;  %v2185_v38 = vld [vmem:[#allocation13 + $0x130] sm:$0xff]  ;;  %v2205_v46 = vrot.slane %v2178_v50, 2 }
 0x21a   :  { %v1898_v6 = vmul.f32 %v2677_v56, %v1897_v8  ;;  %2057 = vmatmul.f32.gmra.mxu0 %v2012_v22  ;;  %v1926_v44 = vsel %vm171_vm3, %v1923_v37, %v1925_v35  ;;  %v2390_v8 = vld [vmem:[#allocation14 + $0x78] sm:$0xff]  ;;  %v2385_v22 = vld [vmem:[#allocation14 + $0x50] sm:$0xff] }
 0x21b   :  { %v1937_v25 = vmul.f32 %v1926_v44, %v3987_v0  ;;  %2251 = vmatpush.msra.mxu0 %v2185_v38  ;;  %v2207_v17 = vsel %vm1230_vm7, %v2205_v46, %v2206_v4  ;;  %2395 = vmatpush.msrb.mxu1 %v2390_v8 }
 0x21c   :  { %v1899_v42 = vadd.f32 %v2677_v56, %v1898_v6  ;;  %2136 = vmatmul.f32.gmra.mxu1 %v1936_v58  ;;  %2585 = vmatmul.msk.f32.gmra.mxu2 %vm148_vm5, %v2214_v9  ;;  %v2383_v6 = vld [vmem:[#allocation14 + $0x40] sm:$0xff] }
 0x21d   :  { %v2015_v12 = vrot.slane %v1937_v25, 1  ;;  %v2215_v57 = vrot.slane %v1937_v25, 2  ;;  %2252 = vmatpush.msra.mxu0 %v2184_v16  ;;  %2396 = vmatpush.msrb.mxu1 %v2389_v39  ;;  %v2376_v16 = vld [vmem:[#allocation14 + $0x8] sm:$0xff] }
 0x21e   :  { %v1903_v40 = vsel %vm1902_vm10, %v2677_v56, %v1899_v42  ;;  %v2380_v42 = vld [vmem:[#allocation14 + $0x28] sm:$0xff] }
 0x21f   :  { %v1908_v23 = vsel %vm1905_vm11, %v1907_v18, %v1903_v40  ;;  %v2016_v0 = vsel %vm388_vm2, %v2011_v15, %v2015_v12  ;;  %v2216_v37 = vsel %vm1230_vm7, %v2211_v1, %v2215_v57  ;;  %2253 = vmatpush.msra.mxu0 %v2183_v43  ;;  %2397 = vmatpush.msrb.mxu1 %v2388_v54  ;;  %v2379_v18 = vld [vmem:[#allocation14 + $0x20] sm:$0xff]  ;;  %v2378_v40 = vld [vmem:[#allocation14 + $0x18] sm:$0xff] }
 0x220   :  { %v1927_v7 = vrot.slane %v1908_v23, 7 }
 0x221   :  { %2398 = vmatpush.msrb.mxu1 %v2387_v24 }
 0x222   :  { %v1928_v45 = vsel %vm171_vm3, %v1925_v35, %v1927_v7  ;;  %2060 = vmatmul.f32.gmra.mxu0 %v2016_v0  ;;  %v2386_v35 = vld [vmem:[#allocation14 + $0x58] sm:$0xff]  ;;  %v2375_v7 = vld [vmem:[#allocation14] sm:$0xff] }
 0x223   :  { %v1938_v49 = vmul.f32 %v1928_v45, %v4039_v61  ;;  %v2221_v61 = vrot.slane %v2181_v5, 2  ;;  %2399 = vmatpush.msrb.mxu1 %v2386_v35 }
 0x224   :  { %2139 = vmatmul.f32.gmra.mxu1 %v1937_v25  ;;  %2586 = vmatmul.msk.f32.gmra.mxu2 %vm148_vm5, %v2218_v33  ;;  %v2381_v25 = vld [vmem:[#allocation14 + $0x30] sm:$0xff] }
 0x225   :  { %1943 = vst [vmem:[#allocation4 + $0x40] sm:$0x7] %v1938_v49  ;;  %v2222_v52 = vsel %vm1230_vm7, %v2217_v62, %v2221_v61  ;;  %2400 = vmatpush.msrb.mxu1 %v2385_v22 }
 0x227   :  { %2401 = vmatpush.msrb.mxu1 %v2384_v36 }
 0x229   :  { %2402 = vmatpush.msrb.mxu1 %v2383_v6 }
 0x22b   :  { %2403 = vmatpush.msrb.mxu1 %v2382_v60 }
 0x22c   :  { %v1952_v63 = vld [vmem:[#allocation4 + $0x40] sm:$0x3]  ;;  %2587 = vmatmul.msk.f32.gmra.mxu2 %vm148_vm5, %v2222_v52 }
 0x22d   :  { %v1974_v56 = vld [vmem:[#allocation4 + $0x40] sm:$0x7]  ;;  %2142 = vmatmul.f32.gmra.mxu1 %v1952_v63 }
 0x22e   :  { %v2019_v58 = vrot.slane %v1974_v56, 1  ;;  %v2180_v15 = vld [vmem:[#allocation4 + $0x40] sm:$0xf]  ;;  %2404 = vmatpush.msrb.mxu1 %v2381_v25 }
 0x22f   :  { %v2219_v1 = vrot.slane %v2180_v15, 2 }
 0x230   :  { %v2020_v31 = vsel %vm388_vm2, %v2015_v12, %v2019_v58  ;;  %2405 = vmatpush.msrb.mxu1 %v2380_v42  ;;  %v2377_v12 = vld [vmem:[#allocation14 + $0x10] sm:$0xff]  ;;  %vm2436_vm2 = vcmask 1041408  }
 0x231   :  { %2063 = vmatmul.f32.gmra.mxu0 %v2020_v31  ;;  %v2220_v27 = vsel %vm1230_vm7, %v2215_v57, %v2219_v1 }
 0x232   :  { %2406 = vmatpush.msrb.mxu1 %v2379_v18 }
 0x234   :  { %2588 = vmatmul.msk.f32.gmra.mxu2 %vm148_vm5, %v2221_v61  ;;  %2407 = vmatpush.msrb.mxu1 %v2378_v40 }
 0x236   :  { %2408 = vmatpush.msrb.mxu1 %v2377_v12 }
 0x238   :  { %2409 = vmatpush.msrb.mxu1 %v2376_v16 }
 0x239   :  { %2066 = vmatmul.f32.gmra.mxu0 %v2019_v58 }
 0x23a   :  { %2410 = vmatpush.msrb.mxu1 %v2375_v7 }
 0x241   :  { %2254 = vmatmul.f32.vlgmr.msra.gmra.mxu0 %v2207_v17 }
 0x249   :  { %2257 = vmatmul.f32.gmra.mxu0 %v2212_v20 }
 0x251   :  { %2260 = vmatmul.f32.gmra.mxu0 %v2216_v37 }
 0x259   :  { %2263 = vmatmul.f32.gmra.mxu0 %v2220_v27 }
 0x261   :  { %2266 = vmatmul.f32.gmra.mxu0 %v2219_v1 }
 0x26b   :  { %v2087_v10 = vpop.f32.mrf.mxu2 }
 0x26d   :  { %v2163_v43 = vpop.f32.mrf.mxu3 }
 0x273   :  { %v2090_v26 = vpop.f32.mrf.mxu2 }
 0x275   :  { %v2166_v58 = vpop.f32.mrf.mxu3 }
 0x27b   :  { %v2093_v20 = vpop.f32.mrf.mxu2 }
 0x27d   :  { %v2169_v8 = vpop.f32.mrf.mxu3 }
 0x285   :  { %v2172_v6 = vpop.f32.mrf.mxu3 }
 0x287   :  { %v2096_v44 = vpop.f32.mrf.mxu2 }
 0x289   :  { %v2131_v23 = vpop.f32.mrf.mxu1 }
 0x28d   :  { %v2055_v4 = vpop.f32.mrf.mxu0  ;;  %v2175_v7 = vpop.f32.mrf.mxu3 }
 0x28e   :  { %v2088_v37 = vadd.f32 %v2087_v10, %v2055_v4 }
 0x28f   :  { %v2099_v38 = vpop.f32.mrf.mxu2 }
 0x290   :  { %v2132_v45 = vadd.f32 %v2131_v23, %v2088_v37 }
 0x291   :  { %v2134_v9 = vpop.f32.mrf.mxu1 }
 0x292   :  { %v2164_v33 = vadd.f32 %v2163_v43, %v2132_v45 }
 0x297   :  { %v2058_v32 = vpop.f32.mrf.mxu0  ;;  %v2287_v0 = vpop.f32.mrf.mxu2 }
 0x298   :  { %v2091_v63 = vadd.f32 %v2090_v26, %v2058_v32 }
 0x299   :  { %v2137_v52 = vpop.f32.mrf.mxu1 }
 0x29a   :  { %v2135_v5 = vadd.f32 %v2134_v9, %v2091_v63 }
 0x29c   :  { %v2167_v46 = vadd.f32 %v2166_v58, %v2135_v5 }
 0x29f   :  { %v2061_v11 = vpop.f32.mrf.mxu0  ;;  %v2290_v62 = vpop.f32.mrf.mxu2 }
 0x2a0   :  { %v2094_v17 = vadd.f32 %v2093_v20, %v2061_v11 }
 0x2a1   :  { %v2140_v36 = vpop.f32.mrf.mxu1 }
 0x2a2   :  { %v2138_v39 = vadd.f32 %v2137_v52, %v2094_v17  ;;  %v2699_v52 = vld [vmem:[#allocation5 + $0x18] sm:$0xff] }
 0x2a7   :  { %v2293_v1 = vpop.f32.mrf.mxu2 }
 0x2aa   :  { %v2143_v12 = vpop.f32.mrf.mxu1 }
 0x2ae   :  { %v2064_v57 = vpop.f32.mrf.mxu0 }
 0x2af   :  { %v2097_v35 = vadd.f32 %v2096_v44, %v2064_v57  ;;  %v2296_v60 = vpop.f32.mrf.mxu2 }
 0x2b1   :  { %v2141_v11 = vadd.f32 %v2140_v36, %v2097_v35 }
 0x2b6   :  { %v2067_v19 = vpop.f32.mrf.mxu0 }
 0x2b7   :  { %v2100_v18 = vadd.f32 %v2099_v38, %v2067_v19 }
 0x2b9   :  { %v2144_v16 = vadd.f32 %v2143_v12, %v2100_v18 }
 0x2be   :  { %v2255_v49 = vpop.f32.mrf.mxu0 }
 0x2bf   :  { %v2288_v56 = vadd.f32 %v2287_v0, %v2255_v49  ;;  %v2299_v0 = vpop.f32.mrf.mxu2 }
 0x2c1   :  { %v2302_v31 = vadd.f32 %v2288_v56, %v2164_v33  ;;  %v2697_v33 = vld [vmem:[#allocation5 + $0x8] sm:$0xff]  ;;  %v2698_v56 = vld [vmem:[#allocation5 + $0x10] sm:$0xff] }
 0x2c2   :  { %v2437_v58 = vrot.slane %v2698_v56, 6 }
 0x2c3   :  { %v2307_v61 = vadd.f32 %v2302_v31, %v3694_v2  ;;  %v2170_v2 = vadd.f32 %v2169_v8, %v2138_v39 }
 0x2c5   :  { %2678 = vtanh.f32 %v2307_v61 }
 0x2c6   :  { %v2258_v50 = vpop.f32.mrf.mxu0 }
 0x2c7   :  { %v2291_v15 = vadd.f32 %v2290_v62, %v2258_v50  ;;  %v2438_v50 = vrot.slane %v2699_v52, 6 }
 0x2c9   :  { %v2303_v27 = vadd.f32 %v2291_v15, %v2167_v46  ;;  %v2439_v17 = vsel %vm2436_vm2, %v2437_v58, %v2438_v50 }
 0x2cb   :  { %v2679_v10 = vpop.eup %2678  ;;  %v2308_v54 = vadd.f32 %v2303_v27, %v3705_v51 }
 0x2cc   :  { %v2317_v26 = vmul.f32 %v2679_v10, %v3807_v41 }
 0x2cd   :  { %2680 = vtanh.f32 %v2308_v54 }
 0x2ce   :  { %v2261_v24 = vpop.f32.mrf.mxu0  ;;  %v2370_v4 = vadd.f32 %v3928_v53, %v2317_v26  ;;  %v2173_v53 = vadd.f32 %v2172_v6, %v2141_v11 }
 0x2cf   :  { %v2294_v22 = vadd.f32 %v2293_v1, %v2261_v24 }
 0x2d0   :  { %2411 = vmatmul.f32.vlgmr.msrb.gmra.mxu1 %v2370_v4  ;;  %2427 = vst [vmem:[#allocation17] sm:$0xff] %v2370_v4 }
 0x2d1   :  { %v2304_v20 = vadd.f32 %v2294_v22, %v2170_v2 }
 0x2d3   :  { %v2681_v32 = vpop.eup %2680  ;;  %v2309_v25 = vadd.f32 %v2304_v20, %v3719_v47 }
 0x2d4   :  { %v2318_v51 = vmul.f32 %v2681_v32, %v3855_v48 }
 0x2d5   :  { %2682 = vtanh.f32 %v2309_v25 }
 0x2d6   :  { %v2264_v41 = vpop.f32.mrf.mxu0  ;;  %v2371_v42 = vadd.f32 %v3994_v29, %v2318_v51  ;;  %v2176_v29 = vadd.f32 %v2175_v7, %v2144_v16 }
 0x2d7   :  { %v2297_v44 = vadd.f32 %v2296_v60, %v2264_v41 }
 0x2d8   :  { %2414 = vmatmul.f32.gmra.mxu1 %v2371_v42  ;;  %2428 = vst [vmem:[#allocation17 + $0x8] sm:$0xff] %v2371_v42 }
 0x2d9   :  { %v2305_v40 = vadd.f32 %v2297_v44, %v2173_v53 }
 0x2db   :  { %v2683_v57 = vpop.eup %2682  ;;  %v2310_v23 = vadd.f32 %v2305_v40, %v3746_v14 }
 0x2dc   :  { %v2319_v47 = vmul.f32 %v2683_v57, %v3914_v3 }
 0x2dd   :  { %2684 = vtanh.f32 %v2310_v23 }
 0x2de   :  { %v2267_v48 = vpop.f32.mrf.mxu0  ;;  %v2372_v43 = vadd.f32 %v4033_v30, %v2319_v47 }
 0x2df   :  { %v2300_v37 = vadd.f32 %v2299_v0, %v2267_v48 }
 0x2e0   :  { %2417 = vmatmul.f32.gmra.mxu1 %v2372_v43  ;;  %2433 = vst [vmem:[#allocation17 + $0xe] sm:$0xfc] %v2372_v43 }
 0x2e1   :  { %v2306_v38 = vadd.f32 %v2300_v37, %v2176_v29 }
 0x2e3   :  { %v2685_v19 = vpop.eup %2684  ;;  %v2311_v45 = vadd.f32 %v2306_v38, %v3789_v21  ;;  %v2637_v21 = vld [vmem:[%s4163_s7] ss:$0 sm:$0xff]  ;;  %s2918_s7 = smov [#allocation16]  }
 0x2e4   :  { %v2320_v9 = vmul.f32 %v2685_v19, %v3974_v59  ;;  %s2453_s9 = sshll.u32 %s2918_s7, 4  ;;  %s2454_s9 = int_to_ptr.vmem [resolvable:$true] %s2453_s9 }
 0x2e5   :  { %2686 = vtanh.f32 %v2311_v45 }
 0x2e6   :  { %v2373_v14 = vadd.f32 %v4066_v13, %v2320_v9 }
 0x2e8   :  { %2420 = vmatmul.f32.gmra.mxu1 %v2373_v14  ;;  %2434 = vst [vmem:[#allocation17 + $0x16] sm:$0xff] %v2373_v14 }
 0x2eb   :  { %v2687_v3 = vpop.eup %2686 }
 0x2ec   :  { %v2321_v49 = vmul.f32 %v2687_v3, %v4020_v28 }
 0x2ee   :  { %v2374_v30 = vadd.f32 %v2363_v34, %v2321_v49 }
 0x2f0   :  { %2423 = vmatmul.f32.gmra.mxu1 %v2374_v30  ;;  %2435 = vst [vmem:[#allocation17 + $0x1e] sm:$0x3] %v2374_v30 }
 0x2f1   :  { %2474 = dma.vmem_to_hbm [thread:$0]  %s2467_s1, 512, %s2469_s24, [#allocation18], %s2905_s17, %s2905_s17, %s2906_s18  }
 0x34d   :  { %v2412_v59 = vpop.f32.mrf.mxu1 }
 0x34e   :  { %v2413_v28 = vadd.f32 %v2637_v21, %v2412_v59 }
 0x350   :  { %v2429_v34 = vadd.f32 %v2696_v55, %v2413_v28 }
 0x352   :  { %2431 = vst [vmem:[#allocation16] sm:$0xff] %v2429_v34 }
 0x355   :  { %v2415_v13 = vpop.f32.mrf.mxu1 }
 0x356   :  { %v2416_v62 = vadd.f32 %v2637_v21, %v2415_v13 }
 0x358   :  { %v2430_v63 = vadd.f32 %v2697_v33, %v2416_v62 }
 0x35a   :  { %2432 = vst [vmem:[#allocation16 + $0x8] sm:$0xff] %v2430_v63 }
 0x35d   :  { %v2418_v31 = vpop.f32.mrf.mxu1 }
 0x35e   :  { %v2419_v5 = vadd.f32 %v2637_v21, %v2418_v31 }
 0x360   :  { %v2443_v61 = vadd.f32 %v2437_v58, %v2419_v5 }
 0x362   :  { %2446 = vst [vmem:[#allocation16 + $0xe] sm:$0xfc] %v2443_v61 }
 0x365   :  { %v2421_v46 = vpop.f32.mrf.mxu1 }
 0x366   :  { %v2422_v15 = vadd.f32 %v2637_v21, %v2421_v46 }
 0x368   :  { %v2444_v1 = vadd.f32 %v2439_v17, %v2422_v15 }
 0x36a   :  { %2447 = vst [vmem:[#allocation16 + $0x16] sm:$0xff] %v2444_v1 }
 0x36d   :  { %v2424_v27 = vpop.f32.mrf.mxu1 }
 0x36e   :  { %v2425_v8 = vadd.f32 %v2637_v21, %v2424_v27 }
 0x370   :  { %v2445_v10 = vadd.f32 %v2438_v50, %v2425_v8 }
 0x372   :  { %2448 = vst [vmem:[#allocation16 + $0x1e] sm:$0x3] %v2445_v10 }
 0x373   :  { %2461 = dma.vmem_to_hbm [thread:$0]  %s2454_s9, 512, %s2456_s28, [#allocation7], %s2905_s17, %s2905_s17, %s2906_s18  }
 0x374   :  { %2900 = dma.done.wait [#allocation7], 512  }
 0x375   :  { %2901 = vsyncadd [#allocation7], 4294966784 }
 0x376   :  { %2902 = dma.done.wait [#allocation18], 512  }
 0x377   :  { %2903 = vsyncadd [#allocation18], 4294966784 }
 0x378   :  { %2483 = vsyncpa [#allocation6], 1 }
 0x379   :  { %2484 = vsyncpa [#allocation9], 1 }
 0x37a   :  { %2485 = vsyncpa [#allocation12], 1 }
 0x37b   :  { %2486 = vsyncpa [#allocation15], 1 }
 0x37c   :  { %2487 = vsyncpa [#allocation7], 1 }
 0x37d   :  { %2488 = vsyncpa [#allocation18], 1 }

</bundles_post_ra>
